<compile_context>
chip_gen: v7x
topology: tpu7x:2x2x1
jax: 0.10.0
libtpu: 0.0.40
codegen_flags: <defaults>
</compile_context>

<pallas_src>
import functools

import jax
import jax.numpy as jnp
import numpy as np
from jax import lax
from jax.experimental import pallas as pl
from jax.experimental.pallas import tpu as pltpu


# --------------------------------------------------------------------------
# Kernel
# --------------------------------------------------------------------------
def lstm_pool_kernel(unroll, tmax_ref, x_ref, lens_ref, wih_ref, whh_ref, b_ref,
                     out_ref, pg_sc, h_sc, c_sc, s_sc, m_sc):
    tb = pl.program_id(1)                 # time-block index ("arbitrary" axis)
    Tb, Bb, D = x_ref.shape
    H = whh_ref.shape[0]
    t_max = tmax_ref[0]                   # scalar int32 (SMEM scalar prefetch)
    t_base = tb * Tb

    @pl.when(tb == 0)
    def _init():
        h_sc[...] = jnp.zeros_like(h_sc)
        c_sc[...] = jnp.zeros_like(c_sc)
        s_sc[...] = jnp.zeros_like(s_sc)
        m_sc[...] = jnp.full_like(m_sc, -jnp.inf)

    # Skip time blocks entirely past max(seq_lengths): every output there is
    # masked to zero anyway, so the MXU/EUP work is pure waste.
    @pl.when(t_base < t_max)
    def _compute():
        # Hoisted input projection for the whole time block: a single MXU GEMM
        # (bf16 operands arrive bf16 from HBM, f32 accumulation).
        xb = x_ref[...].reshape(Tb * Bb, D)
        pg_sc[...] = (jnp.dot(xb, wih_ref[...],
                              preferred_element_type=jnp.float32) + b_ref[...])

        lens = lens_ref[...]              # [Bb, 1] int32
        whh = whh_ref[...]                # [H, 4H] bf16

        # TODO(synk): stage W_hh in MXU weight registers across the recurrence
        # via pltpu.matmul_push_rhs / matmul_acc_lhs / matmul_pop.
        def step(i, carry):
            h, c, s, m = carry
            t = t_base + i
            off = pl.multiple_of(i * Bb, Bb)   # sublane-aligned pre-gate slice
            gates = pg_sc[pl.ds(off, Bb), :] + jnp.dot(
                h.astype(jnp.bfloat16), whh,
                preferred_element_type=jnp.float32)

            # gate columns packed (i, f, o, g): contiguous sigmoid + tanh (EUP)
            sig = jax.nn.sigmoid(gates[:, :3 * H])
            g_g = jnp.tanh(gates[:, 3 * H:])
            i_g = sig[:, :H]
            f_g = sig[:, H:2 * H]
            o_g = sig[:, 2 * H:]

            c_new = f_g * c + i_g * g_g
            h_new = o_g * jnp.tanh(c_new)

            h_out = jnp.where(t < lens, h_new, 0.0)  # zero past each seq length
            s = s + h_out
            # only timesteps t < max(seq_lengths) exist in the padded output
            m = jnp.maximum(m, jnp.where(t < t_max, h_out, -jnp.inf))
            return h_new, c_new, s, m

        h, c, s, m = lax.fori_loop(
            0, Tb, step,
            (h_sc[...], c_sc[...], s_sc[...], m_sc[...]),
            unroll=unroll)
        h_sc[...] = h
        c_sc[...] = c
        s_sc[...] = s
        m_sc[...] = m

    @pl.when(tb == pl.num_programs(1) - 1)
    def _finalize():
        # guard t_max == 0 (mean divisor) and all -inf rows (max half)
        inv_len = 1.0 / jnp.maximum(t_max, 1).astype(jnp.float32)
        mx = m_sc[...]
        mx = jnp.where(mx > -jnp.inf, mx, 0.0)
        # single lane-dense [Bb, 2H] store (avoids two masked partial stores)
        out_ref[...] = jnp.concatenate([s_sc[...] * inv_len, mx], axis=1)


# --------------------------------------------------------------------------
# Wrapper
# --------------------------------------------------------------------------
def _round_up(n, m):
    return ((n + m - 1) // m) * m


def _vmem_bytes(t_blk, b_blk, D, H):
    """Conservative VMEM footprint estimate for tile selection / limits."""
    pg = t_blk * b_blk * 4 * H * 4                  # f32 block pre-gates (dominant)
    xbuf = 2 * t_blk * b_blk * D * 2                # double-buffered bf16 x blocks
    wts = 2 * (D * 4 * H + H * 4 * H) * 2           # weights (assume 2 buffers)
    state = 4 * b_blk * H * 4                       # h / c / sum / max scratch
    misc = 2 * b_blk * 2 * H * 4 + 2 * b_blk * 4 + 2 * 4 * H * 4
    return pg + xbuf + wts + state + misc


def dynamic_lstm_net_forward(x, seq_lengths, packed_params, *,
                             t_blk=None, b_blk=None,
                             vmem_budget_bytes=48 * 1024 * 1024):
    """x: [B, T, D]; seq_lengths: [B] int32 (stays on device, no host sync).

    Tiles are auto-sized against `vmem_budget_bytes` (default 48 MiB, safe
    under v7x's 64 MiB physical VMEM per TensorCore); pass t_blk/b_blk to
    override.
    """
    wih, whh, b = packed_params          # [D,4H] bf16, [H,4H] bf16, [1,4H] f32
    B, T, D = x.shape
    H = whh.shape[0]

    # ---- tile selection -------------------------------------------------
    if b_blk is None:
        b_blk = min(_round_up(B, 16), 256)
        # keep >= 2 batch blocks when possible: the "parallel" axis is what
        # shards work across v7x's two TensorCores.
        if _round_up(B, b_blk) // b_blk < 2 and b_blk >= 32:
            b_blk = max(16, ((b_blk // 2 + 15) // 16) * 16)
    assert b_blk % 8 == 0, "batch block must be a sublane multiple (16 for bf16)"

    if t_blk is None:
        t_blk = min(_round_up(T, 8), 64)
        while t_blk > 8 and _vmem_bytes(t_blk, b_blk, D, H) > vmem_budget_bytes:
            t_blk //= 2

    B_pad = _round_up(B, b_blk)
    T_pad = _round_up(max(T, t_blk), t_blk)

    # ---- operand prep ----------------------------------------------------
    # x streamed bf16 end-to-end; the dtype cast is fused into the one
    # transpose so x is touched once in HBM at half the bytes of f32.
    # TODO(synk): drop this transpose entirely by indexing the [B,T,D] layout
    # directly and reordering the (Bb,Tb) block in-kernel.
    x_tbd = jnp.transpose(x.astype(jnp.bfloat16), (1, 0, 2))     # [T, B, D]
    x_tbd = jnp.pad(x_tbd, ((0, T_pad - T), (0, B_pad - B), (0, 0)))
    lens = jnp.asarray(seq_lengths, jnp.int32)
    lens_pad = jnp.pad(lens, (0, B_pad - B)).reshape(B_pad, 1)
    t_max = jnp.max(lens).astype(jnp.int32).reshape(1)           # device side

    # unroll tied to tile size: full unroll while the per-step gate working
    # set is a handful of vregs, capped at large tiles to avoid VMEM spills.
    gate_vregs = (b_blk * 4 * H * 4) // 4096
    if gate_vregs <= 8:
        unroll = min(t_blk, 16)
    elif gate_vregs <= 32:
        unroll = 4
    else:
        unroll = 2

    vmem_limit = int(min(max(_vmem_bytes(t_blk, b_blk, D, H) + (4 << 20),
                             32 << 20), 60 << 20))
    grid = (B_pad // b_blk, T_pad // t_blk)
    kernel = functools.partial(lstm_pool_kernel, unroll)

    def _call(single_buffer_weights):
        wkw = {"pipeline_mode": pl.Buffered(1)} if single_buffer_weights else {}
        grid_spec = pltpu.PrefetchScalarGridSpec(
            num_scalar_prefetch=1,        # t_max -> SMEM, visible to index_maps
            grid=grid,
            in_specs=[
                pl.BlockSpec((t_blk, b_blk, D), lambda bb, tt, tm: (tt, bb, 0)),
                pl.BlockSpec((b_blk, 1),        lambda bb, tt, tm: (bb, 0)),
                pl.BlockSpec((D, 4 * H),        lambda bb, tt, tm: (0, 0), **wkw),
                pl.BlockSpec((H, 4 * H),        lambda bb, tt, tm: (0, 0), **wkw),
                pl.BlockSpec((1, 4 * H),        lambda bb, tt, tm: (0, 0), **wkw),
            ],
            out_specs=pl.BlockSpec((b_blk, 2 * H), lambda bb, tt, tm: (bb, 0)),
            scratch_shapes=[
                pltpu.VMEM((t_blk * b_blk, 4 * H), jnp.float32),  # block pre-gates
                pltpu.VMEM((b_blk, H), jnp.float32),              # h
                pltpu.VMEM((b_blk, H), jnp.float32),              # c
                pltpu.VMEM((b_blk, H), jnp.float32),              # sum pool
                pltpu.VMEM((b_blk, H), jnp.float32),              # max pool
            ],
        )
        return pl.pallas_call(
            kernel,
            out_shape=jax.ShapeDtypeStruct((B_pad, 2 * H), jnp.float32),
            grid_spec=grid_spec,
            compiler_params=pltpu.CompilerParams(
                dimension_semantics=("parallel", "arbitrary"),
                vmem_limit_bytes=vmem_limit),
        )(t_max, x_tbd, lens_pad, wih, whh, b)

    try:
        out = _call(True)                 # single-buffered weight operands
    except Exception:
        out = _call(False)                # fallback: default double buffering
    return out[:B]


# --------------------------------------------------------------------------
# Parameters (PyTorch layout) + repacking for the kernel
# --------------------------------------------------------------------------
def init_torch_lstm_params(key, input_size, hidden_size):
    """PyTorch nn.LSTM layout: W_ih [4H,D], W_hh [4H,H], b_ih/b_hh [4H];
    gate row order (i, f, g, o); init U(-1/sqrt(H), 1/sqrt(H))."""
    k = 1.0 / np.sqrt(hidden_size)
    k1, k2, k3, k4 = jax.random.split(key, 4)
    w_ih = jax.random.uniform(k1, (4 * hidden_size, input_size), jnp.float32, -k, k)
    w_hh = jax.random.uniform(k2, (4 * hidden_size, hidden_size), jnp.float32, -k, k)
    b_ih = jax.random.uniform(k3, (4 * hidden_size,), jnp.float32, -k, k)
    b_hh = jax.random.uniform(k4, (4 * hidden_size,), jnp.float32, -k, k)
    return w_ih, w_hh, b_ih, b_hh


def pack_params_for_kernel(w_ih, w_hh, b_ih, b_hh):
    """Right-multiply layout; gate columns reordered (i,f,g,o) -> (i,f,o,g);
    MXU operands cast to bf16 (f32 accumulation in-kernel), bias kept f32."""
    H = w_hh.shape[1]
    perm = np.concatenate([np.arange(0, 2 * H),
                           np.arange(3 * H, 4 * H),
                           np.arange(2 * H, 3 * H)])
    wih = jnp.asarray(w_ih)[perm].T.astype(jnp.bfloat16)      # [D, 4H]
    whh = jnp.asarray(w_hh)[perm].T.astype(jnp.bfloat16)      # [H, 4H]
    bias = (b_ih + b_hh)[perm].reshape(1, 4 * H).astype(jnp.float32)
    return wih, whh, bias


# --------------------------------------------------------------------------
# Pure-JAX f32 reference (PyTorch semantics) for correctness checking
# --------------------------------------------------------------------------
def reference_forward(x, seq_lengths, torch_params):
    w_ih, w_hh, b_ih, b_hh = torch_params       # PyTorch layout, order i,f,g,o
    B, T, D = x.shape
    H = w_hh.shape[1]
    x = x.astype(jnp.float32)
    lens = jnp.asarray(seq_lengths, jnp.int32).reshape(B, 1)
    t_max = int(np.asarray(seq_lengths).max())  # host max is fine in the test

    def step(carry, xt_t):
        h, c = carry
        x_t, t = xt_t
        gates = x_t @ w_ih.T + h @ w_hh.T + b_ih + b_hh
        i = jax.nn.sigmoid(gates[:, 0 * H:1 * H])
        f = jax.nn.sigmoid(gates[:, 1 * H:2 * H])
        g = jnp.tanh(gates[:, 2 * H:3 * H])
        o = jax.nn.sigmoid(gates[:, 3 * H:4 * H])
        c = f * c + i * g
        h = o * jnp.tanh(c)
        h_out = jnp.where(t < lens, h, 0.0)
        return (h, c), h_out

    xs = (jnp.transpose(x, (1, 0, 2)), jnp.arange(T))
    _, outs = lax.scan(step, (jnp.zeros((B, H)), jnp.zeros((B, H))), xs)
    outs = jnp.transpose(outs, (1, 0, 2))[:, :t_max]   # total_length=max(lens)
    return jnp.concatenate([outs.mean(axis=1), outs.max(axis=1)], axis=1)


# --------------------------------------------------------------------------
if __name__ == "__main__":
    # Small demo shapes; H chosen so 2H / 4H are lane-multiples (128 / 256).
    B, T, D, H = 32, 12, 32, 64
    output_size = 16   # self.fc exists in __init__ but is never used in forward

    key = jax.random.PRNGKey(0)
    kx, kp = jax.random.split(key)
    x = jax.random.normal(kx, (B, T, D), jnp.float32)
    seq_lengths = (jnp.arange(B, dtype=jnp.int32) % T) + 1   # lengths 1..T

    torch_params = init_torch_lstm_params(kp, D, H)
    packed_params = pack_params_for_kernel(*torch_params)

    # t_blk=8 override exercises multiple time blocks (and the t_max skip)
    # at demo scale; b_blk auto-selects (16 -> two "parallel" batch blocks).
    out = dynamic_lstm_net_forward(x, seq_lengths, packed_params, t_blk=8)
    out = jax.block_until_ready(out)

    ref = reference_forward(x, seq_lengths, torch_params)
    # Tolerance accounts for bf16 MXU operands in the kernel vs f32 reference.
    np.testing.assert_allclose(np.asarray(out), np.asarray(ref),
                               rtol=3e-2, atol=3e-2)
    assert out.shape == (B, 2 * H)
    print("KERNEL_OK")
</pallas_src>

<mosaic_0001>
module attributes {stable_mosaic.version = 11 : i64} {
  func.func @lstm_pool_kernel(%arg0: i32, %arg1: i32, %arg2: memref<1xi32, #tpu.memory_space<smem>>, %arg3: memref<8x16x32xbf16, #tpu.memory_space<vmem>>, %arg4: memref<16x1xi32, #tpu.memory_space<vmem>>, %arg5: memref<32x256xbf16, #tpu.memory_space<vmem>>, %arg6: memref<64x256xbf16, #tpu.memory_space<vmem>>, %arg7: memref<1x256xf32, #tpu.memory_space<vmem>>, %arg8: memref<16x128xf32, #tpu.memory_space<vmem>>, %arg9: memref<128x256xf32, #tpu.memory_space<vmem>>, %arg10: memref<16x64xf32, #tpu.memory_space<vmem>>, %arg11: memref<16x64xf32, #tpu.memory_space<vmem>>, %arg12: memref<16x64xf32, #tpu.memory_space<vmem>>, %arg13: memref<16x64xf32, #tpu.memory_space<vmem>>) attributes {dimension_semantics = [#tpu.dimension_semantics<parallel>, #tpu.dimension_semantics<arbitrary>], iteration_bounds = array<i64: 2, 2>, scalar_prefetch = 1 : i64, scratch_operands = 5 : i64, tpu.core_type = #tpu.core_type<tc>, window_params = [{transform_indices = @transform_0, window_bounds = array<i64: 8, 16, 32>}, {transform_indices = @transform_1, window_bounds = array<i64: 16, 1>}, {pipeline_mode = #tpu.pipeline_mode<synchronous>, transform_indices = @transform_2, window_bounds = array<i64: 32, 256>}, {pipeline_mode = #tpu.pipeline_mode<synchronous>, transform_indices = @transform_3, window_bounds = array<i64: 64, 256>}, {pipeline_mode = #tpu.pipeline_mode<synchronous>, transform_indices = @transform_4, window_bounds = array<i64: 1, 256>}, {transform_indices = @transform_5, window_bounds = array<i64: 16, 128>}]} {
    %c0 = arith.constant 0 : index
    %0 = memref.load %arg2[%c0] : memref<1xi32, #tpu.memory_space<smem>>
    %c8_i32 = arith.constant 8 : i32
    %1 = arith.muli %arg1, %c8_i32 : i32
    %c0_i32 = arith.constant 0 : i32
    %2 = arith.cmpi eq, %arg1, %c0_i32 : i32
    %3 = arith.extui %2 : i1 to i32
    %c0_i32_0 = arith.constant 0 : i32
    %4 = arith.cmpi ne, %3, %c0_i32_0 : i32
    scf.if %4 {
      %cst = arith.constant 0.000000e+00 : f32
      %11 = vector.broadcast %cst : f32 to vector<16x64xf32>
      %c0_3 = arith.constant 0 : index
      %c0_4 = arith.constant 0 : index
      %12 = vector.load %arg10[%c0_3, %c0_4] : memref<16x64xf32, #tpu.memory_space<vmem>>, vector<16x64xf32>
      tpu.vector_store %arg10[%c0_3, %c0_4], %11 {strides = array<i32>} : memref<16x64xf32, #tpu.memory_space<vmem>>, vector<16x64xf32>,
      %cst_5 = arith.constant 0.000000e+00 : f32
      %13 = vector.broadcast %cst_5 : f32 to vector<16x64xf32>
      %c0_6 = arith.constant 0 : index
      %c0_7 = arith.constant 0 : index
      %14 = vector.load %arg11[%c0_6, %c0_7] : memref<16x64xf32, #tpu.memory_space<vmem>>, vector<16x64xf32>
      tpu.vector_store %arg11[%c0_6, %c0_7], %13 {strides = array<i32>} : memref<16x64xf32, #tpu.memory_space<vmem>>, vector<16x64xf32>,
      %cst_8 = arith.constant 0.000000e+00 : f32
      %15 = vector.broadcast %cst_8 : f32 to vector<16x64xf32>
      %c0_9 = arith.constant 0 : index
      %c0_10 = arith.constant 0 : index
      %16 = vector.load %arg12[%c0_9, %c0_10] : memref<16x64xf32, #tpu.memory_space<vmem>>, vector<16x64xf32>
      tpu.vector_store %arg12[%c0_9, %c0_10], %15 {strides = array<i32>} : memref<16x64xf32, #tpu.memory_space<vmem>>, vector<16x64xf32>,
      %cst_11 = arith.constant 0xFF800000 : f32
      %17 = vector.broadcast %cst_11 : f32 to vector<16x64xf32>
      %c0_12 = arith.constant 0 : index
      %c0_13 = arith.constant 0 : index
      %18 = vector.load %arg13[%c0_12, %c0_13] : memref<16x64xf32, #tpu.memory_space<vmem>>, vector<16x64xf32>
      tpu.vector_store %arg13[%c0_12, %c0_13], %17 {strides = array<i32>} : memref<16x64xf32, #tpu.memory_space<vmem>>, vector<16x64xf32>,
    } else {
    }
    %5 = arith.cmpi slt, %1, %0 : i32
    %6 = arith.extui %5 : i1 to i32
    %c0_i32_1 = arith.constant 0 : i32
    %7 = arith.cmpi ne, %6, %c0_i32_1 : i32
    scf.if %7 {
      %c0_3 = arith.constant 0 : index
      %c0_4 = arith.constant 0 : index
      %c0_5 = arith.constant 0 : index
      %11 = vector.load %arg3[%c0_3, %c0_4, %c0_5] : memref<8x16x32xbf16, #tpu.memory_space<vmem>>, vector<8x16x32xbf16>
      %12 = vector.shape_cast %11 : vector<8x16x32xbf16> to vector<128x32xbf16>
      %c0_6 = arith.constant 0 : index
      %c0_7 = arith.constant 0 : index
      %13 = vector.load %arg5[%c0_6, %c0_7] : memref<32x256xbf16, #tpu.memory_space<vmem>>, vector<32x256xbf16>
      %cst = arith.constant dense<0.000000e+00> : vector<128x256xf32>
      %14 = tpu.matmul %12, %13, %cst {dimension_numbers = #tpu.dot_dimension_numbers<[1], [0], [0], [1], [0, 0, 1, 1], [], []>} : vector<128x32xbf16>, vector<32x256xbf16>, vector<128x256xf32> -> vector<128x256xf32>
      %c0_8 = arith.constant 0 : index
      %c0_9 = arith.constant 0 : index
      %15 = vector.load %arg7[%c0_8, %c0_9] : memref<1x256xf32, #tpu.memory_space<vmem>>, vector<1x256xf32>
      %16 = vector.broadcast %15 : vector<1x256xf32> to vector<128x256xf32>
      %17 = arith.addf %14, %16 : vector<128x256xf32>
      %c0_10 = arith.constant 0 : index
      %c0_11 = arith.constant 0 : index
      %18 = vector.load %arg9[%c0_10, %c0_11] : memref<128x256xf32, #tpu.memory_space<vmem>>, vector<128x256xf32>
      tpu.vector_store %arg9[%c0_10, %c0_11], %17 {strides = array<i32>} : memref<128x256xf32, #tpu.memory_space<vmem>>, vector<128x256xf32>,
      %c0_12 = arith.constant 0 : index
      %c0_13 = arith.constant 0 : index
      %19 = vector.load %arg4[%c0_12, %c0_13] : memref<16x1xi32, #tpu.memory_space<vmem>>, vector<16x1xi32>
      %c0_14 = arith.constant 0 : index
      %c0_15 = arith.constant 0 : index
      %20 = vector.load %arg6[%c0_14, %c0_15] : memref<64x256xbf16, #tpu.memory_space<vmem>>, vector<64x256xbf16>
      %c0_16 = arith.constant 0 : index
      %c0_17 = arith.constant 0 : index
      %21 = vector.load %arg10[%c0_16, %c0_17] : memref<16x64xf32, #tpu.memory_space<vmem>>, vector<16x64xf32>
      %c0_18 = arith.constant 0 : index
      %c0_19 = arith.constant 0 : index
      %22 = vector.load %arg11[%c0_18, %c0_19] : memref<16x64xf32, #tpu.memory_space<vmem>>, vector<16x64xf32>
      %c0_20 = arith.constant 0 : index
      %c0_21 = arith.constant 0 : index
      %23 = vector.load %arg12[%c0_20, %c0_21] : memref<16x64xf32, #tpu.memory_space<vmem>>, vector<16x64xf32>
      %c0_22 = arith.constant 0 : index
      %c0_23 = arith.constant 0 : index
      %24 = vector.load %arg13[%c0_22, %c0_23] : memref<16x64xf32, #tpu.memory_space<vmem>>, vector<16x64xf32>
      %c0_i32_24 = arith.constant 0 : i32
      %25 = arith.addi %1, %c0_i32_24 : i32
      %c16_i32 = arith.constant 16 : i32
      %26 = arith.muli %c0_i32_24, %c16_i32 : i32
      %27 = tpu.assume_multiple %26, 16 : i32
      %28 = arith.index_cast %27 : i32 to index
      %c0_25 = arith.constant 0 : index
      %29 = vector.load %arg9[%28, %c0_25] : memref<128x256xf32, #tpu.memory_space<vmem>>, vector<16x256xf32>
      %30 = arith.truncf %21 : vector<16x64xf32> to vector<16x64xbf16>
      %cst_26 = arith.constant dense<0.000000e+00> : vector<16x256xf32>
      %31 = tpu.matmul %30, %20, %cst_26 {dimension_numbers = #tpu.dot_dimension_numbers<[1], [0], [0], [1], [0, 0, 1, 1], [], []>} : vector<16x64xbf16>, vector<64x256xbf16>, vector<16x256xf32> -> vector<16x256xf32>
      %32 = arith.addf %29, %31 : vector<16x256xf32>
      %33 = vector.extract_strided_slice %32 {offsets = [0, 0], sizes = [16, 192], strides = [1, 1]} : vector<16x256xf32> to vector<16x192xf32>
      %34 = arith.negf %33 : vector<16x192xf32>
      %35 = math.exp %34 : vector<16x192xf32>
      %cst_27 = arith.constant 1.000000e+00 : f32
      %36 = vector.broadcast %cst_27 : f32 to vector<16x192xf32>
      %37 = arith.addf %36, %35 : vector<16x192xf32>
      %38 = arith.divf %36, %37 : vector<16x192xf32>
      %39 = vector.extract_strided_slice %32 {offsets = [0, 192], sizes = [16, 64], strides = [1, 1]} : vector<16x256xf32> to vector<16x64xf32>
      %40 = math.tanh %39 : vector<16x64xf32>
      %41 = vector.extract_strided_slice %38 {offsets = [0, 0], sizes = [16, 64], strides = [1, 1]} : vector<16x192xf32> to vector<16x64xf32>
      %42 = vector.extract_strided_slice %38 {offsets = [0, 64], sizes = [16, 64], strides = [1, 1]} : vector<16x192xf32> to vector<16x64xf32>
      %43 = vector.extract_strided_slice %38 {offsets = [0, 128], sizes = [16, 64], strides = [1, 1]} : vector<16x192xf32> to vector<16x64xf32>
      %44 = arith.mulf %42, %22 : vector<16x64xf32>
      %45 = arith.mulf %41, %40 : vector<16x64xf32>
      %46 = arith.addf %44, %45 : vector<16x64xf32>
      %47 = math.tanh %46 : vector<16x64xf32>
      %48 = arith.mulf %43, %47 : vector<16x64xf32>
      %49 = vector.broadcast %25 : i32 to vector<16x1xi32>
      %50 = arith.cmpi slt, %49, %19 : vector<16x1xi32>
      %cst_28 = arith.constant 0.000000e+00 : f32
      %51 = vector.shape_cast %50 : vector<16x1xi1> to vector<16x1xi1>
      %52 = vector.broadcast %51 : vector<16x1xi1> to vector<16x64xi1>
      %53 = vector.broadcast %cst_28 : f32 to vector<16x64xf32>
      %54 = arith.select %52, %48, %53 : vector<16x64xi1>, vector<16x64xf32>
      %55 = arith.addf %23, %54 : vector<16x64xf32>
      %56 = arith.cmpi slt, %25, %0 : i32
      %cst_29 = arith.constant 0xFF800000 : f32
      %57 = vector.broadcast %cst_29 : f32 to vector<16x64xf32>
      %58 = arith.select %56, %54, %57 : vector<16x64xf32>
      %59 = arith.maximumf %24, %58 : vector<16x64xf32>
      %c1_i32_30 = arith.constant 1 : i32
      %60 = arith.addi %1, %c1_i32_30 : i32
      %c16_i32_31 = arith.constant 16 : i32
      %61 = arith.muli %c1_i32_30, %c16_i32_31 : i32
      %62 = tpu.assume_multiple %61, 16 : i32
      %63 = arith.index_cast %62 : i32 to index
      %c0_32 = arith.constant 0 : index
      %64 = vector.load %arg9[%63, %c0_32] : memref<128x256xf32, #tpu.memory_space<vmem>>, vector<16x256xf32>
      %65 = arith.truncf %48 : vector<16x64xf32> to vector<16x64xbf16>
      %cst_33 = arith.constant dense<0.000000e+00> : vector<16x256xf32>
      %66 = tpu.matmul %65, %20, %cst_33 {dimension_numbers = #tpu.dot_dimension_numbers<[1], [0], [0], [1], [0, 0, 1, 1], [], []>} : vector<16x64xbf16>, vector<64x256xbf16>, vector<16x256xf32> -> vector<16x256xf32>
      %67 = arith.addf %64, %66 : vector<16x256xf32>
      %68 = vector.extract_strided_slice %67 {offsets = [0, 0], sizes = [16, 192], strides = [1, 1]} : vector<16x256xf32> to vector<16x192xf32>
      %69 = arith.negf %68 : vector<16x192xf32>
      %70 = math.exp %69 : vector<16x192xf32>
      %cst_34 = arith.constant 1.000000e+00 : f32
      %71 = vector.broadcast %cst_34 : f32 to vector<16x192xf32>
      %72 = arith.addf %71, %70 : vector<16x192xf32>
      %73 = arith.divf %71, %72 : vector<16x192xf32>
      %74 = vector.extract_strided_slice %67 {offsets = [0, 192], sizes = [16, 64], strides = [1, 1]} : vector<16x256xf32> to vector<16x64xf32>
      %75 = math.tanh %74 : vector<16x64xf32>
      %76 = vector.extract_strided_slice %73 {offsets = [0, 0], sizes = [16, 64], strides = [1, 1]} : vector<16x192xf32> to vector<16x64xf32>
      %77 = vector.extract_strided_slice %73 {offsets = [0, 64], sizes = [16, 64], strides = [1, 1]} : vector<16x192xf32> to vector<16x64xf32>
      %78 = vector.extract_strided_slice %73 {offsets = [0, 128], sizes = [16, 64], strides = [1, 1]} : vector<16x192xf32> to vector<16x64xf32>
      %79 = arith.mulf %77, %46 : vector<16x64xf32>
      %80 = arith.mulf %76, %75 : vector<16x64xf32>
      %81 = arith.addf %79, %80 : vector<16x64xf32>
      %82 = math.tanh %81 : vector<16x64xf32>
      %83 = arith.mulf %78, %82 : vector<16x64xf32>
      %84 = vector.broadcast %60 : i32 to vector<16x1xi32>
      %85 = arith.cmpi slt, %84, %19 : vector<16x1xi32>
      %cst_35 = arith.constant 0.000000e+00 : f32
      %86 = vector.shape_cast %85 : vector<16x1xi1> to vector<16x1xi1>
      %87 = vector.broadcast %86 : vector<16x1xi1> to vector<16x64xi1>
      %88 = vector.broadcast %cst_35 : f32 to vector<16x64xf32>
      %89 = arith.select %87, %83, %88 : vector<16x64xi1>, vector<16x64xf32>
      %90 = arith.addf %55, %89 : vector<16x64xf32>
      %91 = arith.cmpi slt, %60, %0 : i32
      %cst_36 = arith.constant 0xFF800000 : f32
      %92 = vector.broadcast %cst_36 : f32 to vector<16x64xf32>
      %93 = arith.select %91, %89, %92 : vector<16x64xf32>
      %94 = arith.maximumf %59, %93 : vector<16x64xf32>
      %c2_i32 = arith.constant 2 : i32
      %95 = arith.addi %1, %c2_i32 : i32
      %c16_i32_37 = arith.constant 16 : i32
      %96 = arith.muli %c2_i32, %c16_i32_37 : i32
      %97 = tpu.assume_multiple %96, 16 : i32
      %98 = arith.index_cast %97 : i32 to index
      %c0_38 = arith.constant 0 : index
      %99 = vector.load %arg9[%98, %c0_38] : memref<128x256xf32, #tpu.memory_space<vmem>>, vector<16x256xf32>
      %100 = arith.truncf %83 : vector<16x64xf32> to vector<16x64xbf16>
      %cst_39 = arith.constant dense<0.000000e+00> : vector<16x256xf32>
      %101 = tpu.matmul %100, %20, %cst_39 {dimension_numbers = #tpu.dot_dimension_numbers<[1], [0], [0], [1], [0, 0, 1, 1], [], []>} : vector<16x64xbf16>, vector<64x256xbf16>, vector<16x256xf32> -> vector<16x256xf32>
      %102 = arith.addf %99, %101 : vector<16x256xf32>
      %103 = vector.extract_strided_slice %102 {offsets = [0, 0], sizes = [16, 192], strides = [1, 1]} : vector<16x256xf32> to vector<16x192xf32>
      %104 = arith.negf %103 : vector<16x192xf32>
      %105 = math.exp %104 : vector<16x192xf32>
      %cst_40 = arith.constant 1.000000e+00 : f32
      %106 = vector.broadcast %cst_40 : f32 to vector<16x192xf32>
      %107 = arith.addf %106, %105 : vector<16x192xf32>
      %108 = arith.divf %106, %107 : vector<16x192xf32>
      %109 = vector.extract_strided_slice %102 {offsets = [0, 192], sizes = [16, 64], strides = [1, 1]} : vector<16x256xf32> to vector<16x64xf32>
      %110 = math.tanh %109 : vector<16x64xf32>
      %111 = vector.extract_strided_slice %108 {offsets = [0, 0], sizes = [16, 64], strides = [1, 1]} : vector<16x192xf32> to vector<16x64xf32>
      %112 = vector.extract_strided_slice %108 {offsets = [0, 64], sizes = [16, 64], strides = [1, 1]} : vector<16x192xf32> to vector<16x64xf32>
      %113 = vector.extract_strided_slice %108 {offsets = [0, 128], sizes = [16, 64], strides = [1, 1]} : vector<16x192xf32> to vector<16x64xf32>
      %114 = arith.mulf %112, %81 : vector<16x64xf32>
      %115 = arith.mulf %111, %110 : vector<16x64xf32>
      %116 = arith.addf %114, %115 : vector<16x64xf32>
      %117 = math.tanh %116 : vector<16x64xf32>
      %118 = arith.mulf %113, %117 : vector<16x64xf32>
      %119 = vector.broadcast %95 : i32 to vector<16x1xi32>
      %120 = arith.cmpi slt, %119, %19 : vector<16x1xi32>
      %cst_41 = arith.constant 0.000000e+00 : f32
      %121 = vector.shape_cast %120 : vector<16x1xi1> to vector<16x1xi1>
      %122 = vector.broadcast %121 : vector<16x1xi1> to vector<16x64xi1>
      %123 = vector.broadcast %cst_41 : f32 to vector<16x64xf32>
      %124 = arith.select %122, %118, %123 : vector<16x64xi1>, vector<16x64xf32>
      %125 = arith.addf %90, %124 : vector<16x64xf32>
      %126 = arith.cmpi slt, %95, %0 : i32
      %cst_42 = arith.constant 0xFF800000 : f32
      %127 = vector.broadcast %cst_42 : f32 to vector<16x64xf32>
      %128 = arith.select %126, %124, %127 : vector<16x64xf32>
      %129 = arith.maximumf %94, %128 : vector<16x64xf32>
      %c3_i32 = arith.constant 3 : i32
      %130 = arith.addi %1, %c3_i32 : i32
      %c16_i32_43 = arith.constant 16 : i32
      %131 = arith.muli %c3_i32, %c16_i32_43 : i32
      %132 = tpu.assume_multiple %131, 16 : i32
      %133 = arith.index_cast %132 : i32 to index
      %c0_44 = arith.constant 0 : index
      %134 = vector.load %arg9[%133, %c0_44] : memref<128x256xf32, #tpu.memory_space<vmem>>, vector<16x256xf32>
      %135 = arith.truncf %118 : vector<16x64xf32> to vector<16x64xbf16>
      %cst_45 = arith.constant dense<0.000000e+00> : vector<16x256xf32>
      %136 = tpu.matmul %135, %20, %cst_45 {dimension_numbers = #tpu.dot_dimension_numbers<[1], [0], [0], [1], [0, 0, 1, 1], [], []>} : vector<16x64xbf16>, vector<64x256xbf16>, vector<16x256xf32> -> vector<16x256xf32>
      %137 = arith.addf %134, %136 : vector<16x256xf32>
      %138 = vector.extract_strided_slice %137 {offsets = [0, 0], sizes = [16, 192], strides = [1, 1]} : vector<16x256xf32> to vector<16x192xf32>
      %139 = arith.negf %138 : vector<16x192xf32>
      %140 = math.exp %139 : vector<16x192xf32>
      %cst_46 = arith.constant 1.000000e+00 : f32
      %141 = vector.broadcast %cst_46 : f32 to vector<16x192xf32>
      %142 = arith.addf %141, %140 : vector<16x192xf32>
      %143 = arith.divf %141, %142 : vector<16x192xf32>
      %144 = vector.extract_strided_slice %137 {offsets = [0, 192], sizes = [16, 64], strides = [1, 1]} : vector<16x256xf32> to vector<16x64xf32>
      %145 = math.tanh %144 : vector<16x64xf32>
      %146 = vector.extract_strided_slice %143 {offsets = [0, 0], sizes = [16, 64], strides = [1, 1]} : vector<16x192xf32> to vector<16x64xf32>
      %147 = vector.extract_strided_slice %143 {offsets = [0, 64], sizes = [16, 64], strides = [1, 1]} : vector<16x192xf32> to vector<16x64xf32>
      %148 = vector.extract_strided_slice %143 {offsets = [0, 128], sizes = [16, 64], strides = [1, 1]} : vector<16x192xf32> to vector<16x64xf32>
      %149 = arith.mulf %147, %116 : vector<16x64xf32>
      %150 = arith.mulf %146, %145 : vector<16x64xf32>
      %151 = arith.addf %149, %150 : vector<16x64xf32>
      %152 = math.tanh %151 : vector<16x64xf32>
      %153 = arith.mulf %148, %152 : vector<16x64xf32>
      %154 = vector.broadcast %130 : i32 to vector<16x1xi32>
      %155 = arith.cmpi slt, %154, %19 : vector<16x1xi32>
      %cst_47 = arith.constant 0.000000e+00 : f32
      %156 = vector.shape_cast %155 : vector<16x1xi1> to vector<16x1xi1>
      %157 = vector.broadcast %156 : vector<16x1xi1> to vector<16x64xi1>
      %158 = vector.broadcast %cst_47 : f32 to vector<16x64xf32>
      %159 = arith.select %157, %153, %158 : vector<16x64xi1>, vector<16x64xf32>
      %160 = arith.addf %125, %159 : vector<16x64xf32>
      %161 = arith.cmpi slt, %130, %0 : i32
      %cst_48 = arith.constant 0xFF800000 : f32
      %162 = vector.broadcast %cst_48 : f32 to vector<16x64xf32>
      %163 = arith.select %161, %159, %162 : vector<16x64xf32>
      %164 = arith.maximumf %129, %163 : vector<16x64xf32>
      %c4_i32 = arith.constant 4 : i32
      %165 = arith.addi %1, %c4_i32 : i32
      %c16_i32_49 = arith.constant 16 : i32
      %166 = arith.muli %c4_i32, %c16_i32_49 : i32
      %167 = tpu.assume_multiple %166, 16 : i32
      %168 = arith.index_cast %167 : i32 to index
      %c0_50 = arith.constant 0 : index
      %169 = vector.load %arg9[%168, %c0_50] : memref<128x256xf32, #tpu.memory_space<vmem>>, vector<16x256xf32>
      %170 = arith.truncf %153 : vector<16x64xf32> to vector<16x64xbf16>
      %cst_51 = arith.constant dense<0.000000e+00> : vector<16x256xf32>
      %171 = tpu.matmul %170, %20, %cst_51 {dimension_numbers = #tpu.dot_dimension_numbers<[1], [0], [0], [1], [0, 0, 1, 1], [], []>} : vector<16x64xbf16>, vector<64x256xbf16>, vector<16x256xf32> -> vector<16x256xf32>
      %172 = arith.addf %169, %171 : vector<16x256xf32>
      %173 = vector.extract_strided_slice %172 {offsets = [0, 0], sizes = [16, 192], strides = [1, 1]} : vector<16x256xf32> to vector<16x192xf32>
      %174 = arith.negf %173 : vector<16x192xf32>
      %175 = math.exp %174 : vector<16x192xf32>
      %cst_52 = arith.constant 1.000000e+00 : f32
      %176 = vector.broadcast %cst_52 : f32 to vector<16x192xf32>
      %177 = arith.addf %176, %175 : vector<16x192xf32>
      %178 = arith.divf %176, %177 : vector<16x192xf32>
      %179 = vector.extract_strided_slice %172 {offsets = [0, 192], sizes = [16, 64], strides = [1, 1]} : vector<16x256xf32> to vector<16x64xf32>
      %180 = math.tanh %179 : vector<16x64xf32>
      %181 = vector.extract_strided_slice %178 {offsets = [0, 0], sizes = [16, 64], strides = [1, 1]} : vector<16x192xf32> to vector<16x64xf32>
      %182 = vector.extract_strided_slice %178 {offsets = [0, 64], sizes = [16, 64], strides = [1, 1]} : vector<16x192xf32> to vector<16x64xf32>
      %183 = vector.extract_strided_slice %178 {offsets = [0, 128], sizes = [16, 64], strides = [1, 1]} : vector<16x192xf32> to vector<16x64xf32>
      %184 = arith.mulf %182, %151 : vector<16x64xf32>
      %185 = arith.mulf %181, %180 : vector<16x64xf32>
      %186 = arith.addf %184, %185 : vector<16x64xf32>
      %187 = math.tanh %186 : vector<16x64xf32>
      %188 = arith.mulf %183, %187 : vector<16x64xf32>
      %189 = vector.broadcast %165 : i32 to vector<16x1xi32>
      %190 = arith.cmpi slt, %189, %19 : vector<16x1xi32>
      %cst_53 = arith.constant 0.000000e+00 : f32
      %191 = vector.shape_cast %190 : vector<16x1xi1> to vector<16x1xi1>
      %192 = vector.broadcast %191 : vector<16x1xi1> to vector<16x64xi1>
      %193 = vector.broadcast %cst_53 : f32 to vector<16x64xf32>
      %194 = arith.select %192, %188, %193 : vector<16x64xi1>, vector<16x64xf32>
      %195 = arith.addf %160, %194 : vector<16x64xf32>
      %196 = arith.cmpi slt, %165, %0 : i32
      %cst_54 = arith.constant 0xFF800000 : f32
      %197 = vector.broadcast %cst_54 : f32 to vector<16x64xf32>
      %198 = arith.select %196, %194, %197 : vector<16x64xf32>
      %199 = arith.maximumf %164, %198 : vector<16x64xf32>
      %c5_i32 = arith.constant 5 : i32
      %200 = arith.addi %1, %c5_i32 : i32
      %c16_i32_55 = arith.constant 16 : i32
      %201 = arith.muli %c5_i32, %c16_i32_55 : i32
      %202 = tpu.assume_multiple %201, 16 : i32
      %203 = arith.index_cast %202 : i32 to index
      %c0_56 = arith.constant 0 : index
      %204 = vector.load %arg9[%203, %c0_56] : memref<128x256xf32, #tpu.memory_space<vmem>>, vector<16x256xf32>
      %205 = arith.truncf %188 : vector<16x64xf32> to vector<16x64xbf16>
      %cst_57 = arith.constant dense<0.000000e+00> : vector<16x256xf32>
      %206 = tpu.matmul %205, %20, %cst_57 {dimension_numbers = #tpu.dot_dimension_numbers<[1], [0], [0], [1], [0, 0, 1, 1], [], []>} : vector<16x64xbf16>, vector<64x256xbf16>, vector<16x256xf32> -> vector<16x256xf32>
      %207 = arith.addf %204, %206 : vector<16x256xf32>
      %208 = vector.extract_strided_slice %207 {offsets = [0, 0], sizes = [16, 192], strides = [1, 1]} : vector<16x256xf32> to vector<16x192xf32>
      %209 = arith.negf %208 : vector<16x192xf32>
      %210 = math.exp %209 : vector<16x192xf32>
      %cst_58 = arith.constant 1.000000e+00 : f32
      %211 = vector.broadcast %cst_58 : f32 to vector<16x192xf32>
      %212 = arith.addf %211, %210 : vector<16x192xf32>
      %213 = arith.divf %211, %212 : vector<16x192xf32>
      %214 = vector.extract_strided_slice %207 {offsets = [0, 192], sizes = [16, 64], strides = [1, 1]} : vector<16x256xf32> to vector<16x64xf32>
      %215 = math.tanh %214 : vector<16x64xf32>
      %216 = vector.extract_strided_slice %213 {offsets = [0, 0], sizes = [16, 64], strides = [1, 1]} : vector<16x192xf32> to vector<16x64xf32>
      %217 = vector.extract_strided_slice %213 {offsets = [0, 64], sizes = [16, 64], strides = [1, 1]} : vector<16x192xf32> to vector<16x64xf32>
      %218 = vector.extract_strided_slice %213 {offsets = [0, 128], sizes = [16, 64], strides = [1, 1]} : vector<16x192xf32> to vector<16x64xf32>
      %219 = arith.mulf %217, %186 : vector<16x64xf32>
      %220 = arith.mulf %216, %215 : vector<16x64xf32>
      %221 = arith.addf %219, %220 : vector<16x64xf32>
      %222 = math.tanh %221 : vector<16x64xf32>
      %223 = arith.mulf %218, %222 : vector<16x64xf32>
      %224 = vector.broadcast %200 : i32 to vector<16x1xi32>
      %225 = arith.cmpi slt, %224, %19 : vector<16x1xi32>
      %cst_59 = arith.constant 0.000000e+00 : f32
      %226 = vector.shape_cast %225 : vector<16x1xi1> to vector<16x1xi1>
      %227 = vector.broadcast %226 : vector<16x1xi1> to vector<16x64xi1>
      %228 = vector.broadcast %cst_59 : f32 to vector<16x64xf32>
      %229 = arith.select %227, %223, %228 : vector<16x64xi1>, vector<16x64xf32>
      %230 = arith.addf %195, %229 : vector<16x64xf32>
      %231 = arith.cmpi slt, %200, %0 : i32
      %cst_60 = arith.constant 0xFF800000 : f32
      %232 = vector.broadcast %cst_60 : f32 to vector<16x64xf32>
      %233 = arith.select %231, %229, %232 : vector<16x64xf32>
      %234 = arith.maximumf %199, %233 : vector<16x64xf32>
      %c6_i32 = arith.constant 6 : i32
      %235 = arith.addi %1, %c6_i32 : i32
      %c16_i32_61 = arith.constant 16 : i32
      %236 = arith.muli %c6_i32, %c16_i32_61 : i32
      %237 = tpu.assume_multiple %236, 16 : i32
      %238 = arith.index_cast %237 : i32 to index
      %c0_62 = arith.constant 0 : index
      %239 = vector.load %arg9[%238, %c0_62] : memref<128x256xf32, #tpu.memory_space<vmem>>, vector<16x256xf32>
      %240 = arith.truncf %223 : vector<16x64xf32> to vector<16x64xbf16>
      %cst_63 = arith.constant dense<0.000000e+00> : vector<16x256xf32>
      %241 = tpu.matmul %240, %20, %cst_63 {dimension_numbers = #tpu.dot_dimension_numbers<[1], [0], [0], [1], [0, 0, 1, 1], [], []>} : vector<16x64xbf16>, vector<64x256xbf16>, vector<16x256xf32> -> vector<16x256xf32>
      %242 = arith.addf %239, %241 : vector<16x256xf32>
      %243 = vector.extract_strided_slice %242 {offsets = [0, 0], sizes = [16, 192], strides = [1, 1]} : vector<16x256xf32> to vector<16x192xf32>
      %244 = arith.negf %243 : vector<16x192xf32>
      %245 = math.exp %244 : vector<16x192xf32>
      %cst_64 = arith.constant 1.000000e+00 : f32
      %246 = vector.broadcast %cst_64 : f32 to vector<16x192xf32>
      %247 = arith.addf %246, %245 : vector<16x192xf32>
      %248 = arith.divf %246, %247 : vector<16x192xf32>
      %249 = vector.extract_strided_slice %242 {offsets = [0, 192], sizes = [16, 64], strides = [1, 1]} : vector<16x256xf32> to vector<16x64xf32>
      %250 = math.tanh %249 : vector<16x64xf32>
      %251 = vector.extract_strided_slice %248 {offsets = [0, 0], sizes = [16, 64], strides = [1, 1]} : vector<16x192xf32> to vector<16x64xf32>
      %252 = vector.extract_strided_slice %248 {offsets = [0, 64], sizes = [16, 64], strides = [1, 1]} : vector<16x192xf32> to vector<16x64xf32>
      %253 = vector.extract_strided_slice %248 {offsets = [0, 128], sizes = [16, 64], strides = [1, 1]} : vector<16x192xf32> to vector<16x64xf32>
      %254 = arith.mulf %252, %221 : vector<16x64xf32>
      %255 = arith.mulf %251, %250 : vector<16x64xf32>
      %256 = arith.addf %254, %255 : vector<16x64xf32>
      %257 = math.tanh %256 : vector<16x64xf32>
      %258 = arith.mulf %253, %257 : vector<16x64xf32>
      %259 = vector.broadcast %235 : i32 to vector<16x1xi32>
      %260 = arith.cmpi slt, %259, %19 : vector<16x1xi32>
      %cst_65 = arith.constant 0.000000e+00 : f32
      %261 = vector.shape_cast %260 : vector<16x1xi1> to vector<16x1xi1>
      %262 = vector.broadcast %261 : vector<16x1xi1> to vector<16x64xi1>
      %263 = vector.broadcast %cst_65 : f32 to vector<16x64xf32>
      %264 = arith.select %262, %258, %263 : vector<16x64xi1>, vector<16x64xf32>
      %265 = arith.addf %230, %264 : vector<16x64xf32>
      %266 = arith.cmpi slt, %235, %0 : i32
      %cst_66 = arith.constant 0xFF800000 : f32
      %267 = vector.broadcast %cst_66 : f32 to vector<16x64xf32>
      %268 = arith.select %266, %264, %267 : vector<16x64xf32>
      %269 = arith.maximumf %234, %268 : vector<16x64xf32>
      %c7_i32 = arith.constant 7 : i32
      %270 = arith.addi %1, %c7_i32 : i32
      %c16_i32_67 = arith.constant 16 : i32
      %271 = arith.muli %c7_i32, %c16_i32_67 : i32
      %272 = tpu.assume_multiple %271, 16 : i32
      %273 = arith.index_cast %272 : i32 to index
      %c0_68 = arith.constant 0 : index
      %274 = vector.load %arg9[%273, %c0_68] : memref<128x256xf32, #tpu.memory_space<vmem>>, vector<16x256xf32>
      %275 = arith.truncf %258 : vector<16x64xf32> to vector<16x64xbf16>
      %cst_69 = arith.constant dense<0.000000e+00> : vector<16x256xf32>
      %276 = tpu.matmul %275, %20, %cst_69 {dimension_numbers = #tpu.dot_dimension_numbers<[1], [0], [0], [1], [0, 0, 1, 1], [], []>} : vector<16x64xbf16>, vector<64x256xbf16>, vector<16x256xf32> -> vector<16x256xf32>
      %277 = arith.addf %274, %276 : vector<16x256xf32>
      %278 = vector.extract_strided_slice %277 {offsets = [0, 0], sizes = [16, 192], strides = [1, 1]} : vector<16x256xf32> to vector<16x192xf32>
      %279 = arith.negf %278 : vector<16x192xf32>
      %280 = math.exp %279 : vector<16x192xf32>
      %cst_70 = arith.constant 1.000000e+00 : f32
      %281 = vector.broadcast %cst_70 : f32 to vector<16x192xf32>
      %282 = arith.addf %281, %280 : vector<16x192xf32>
      %283 = arith.divf %281, %282 : vector<16x192xf32>
      %284 = vector.extract_strided_slice %277 {offsets = [0, 192], sizes = [16, 64], strides = [1, 1]} : vector<16x256xf32> to vector<16x64xf32>
      %285 = math.tanh %284 : vector<16x64xf32>
      %286 = vector.extract_strided_slice %283 {offsets = [0, 0], sizes = [16, 64], strides = [1, 1]} : vector<16x192xf32> to vector<16x64xf32>
      %287 = vector.extract_strided_slice %283 {offsets = [0, 64], sizes = [16, 64], strides = [1, 1]} : vector<16x192xf32> to vector<16x64xf32>
      %288 = vector.extract_strided_slice %283 {offsets = [0, 128], sizes = [16, 64], strides = [1, 1]} : vector<16x192xf32> to vector<16x64xf32>
      %289 = arith.mulf %287, %256 : vector<16x64xf32>
      %290 = arith.mulf %286, %285 : vector<16x64xf32>
      %291 = arith.addf %289, %290 : vector<16x64xf32>
      %292 = math.tanh %291 : vector<16x64xf32>
      %293 = arith.mulf %288, %292 : vector<16x64xf32>
      %294 = vector.broadcast %270 : i32 to vector<16x1xi32>
      %295 = arith.cmpi slt, %294, %19 : vector<16x1xi32>
      %cst_71 = arith.constant 0.000000e+00 : f32
      %296 = vector.shape_cast %295 : vector<16x1xi1> to vector<16x1xi1>
      %297 = vector.broadcast %296 : vector<16x1xi1> to vector<16x64xi1>
      %298 = vector.broadcast %cst_71 : f32 to vector<16x64xf32>
      %299 = arith.select %297, %293, %298 : vector<16x64xi1>, vector<16x64xf32>
      %300 = arith.addf %265, %299 : vector<16x64xf32>
      %301 = arith.cmpi slt, %270, %0 : i32
      %cst_72 = arith.constant 0xFF800000 : f32
      %302 = vector.broadcast %cst_72 : f32 to vector<16x64xf32>
      %303 = arith.select %301, %299, %302 : vector<16x64xf32>
      %304 = arith.maximumf %269, %303 : vector<16x64xf32>
      %c8_i32_73 = arith.constant 8 : i32
      %c0_74 = arith.constant 0 : index
      %c0_75 = arith.constant 0 : index
      %305 = vector.load %arg10[%c0_74, %c0_75] : memref<16x64xf32, #tpu.memory_space<vmem>>, vector<16x64xf32>
      tpu.vector_store %arg10[%c0_74, %c0_75], %293 {strides = array<i32>} : memref<16x64xf32, #tpu.memory_space<vmem>>, vector<16x64xf32>,
      %c0_76 = arith.constant 0 : index
      %c0_77 = arith.constant 0 : index
      %306 = vector.load %arg11[%c0_76, %c0_77] : memref<16x64xf32, #tpu.memory_space<vmem>>, vector<16x64xf32>
      tpu.vector_store %arg11[%c0_76, %c0_77], %291 {strides = array<i32>} : memref<16x64xf32, #tpu.memory_space<vmem>>, vector<16x64xf32>,
      %c0_78 = arith.constant 0 : index
      %c0_79 = arith.constant 0 : index
      %307 = vector.load %arg12[%c0_78, %c0_79] : memref<16x64xf32, #tpu.memory_space<vmem>>, vector<16x64xf32>
      tpu.vector_store %arg12[%c0_78, %c0_79], %300 {strides = array<i32>} : memref<16x64xf32, #tpu.memory_space<vmem>>, vector<16x64xf32>,
      %c0_80 = arith.constant 0 : index
      %c0_81 = arith.constant 0 : index
      %308 = vector.load %arg13[%c0_80, %c0_81] : memref<16x64xf32, #tpu.memory_space<vmem>>, vector<16x64xf32>
      tpu.vector_store %arg13[%c0_80, %c0_81], %304 {strides = array<i32>} : memref<16x64xf32, #tpu.memory_space<vmem>>, vector<16x64xf32>,
    } else {
    }
    %c1_i32 = arith.constant 1 : i32
    %8 = arith.cmpi eq, %arg1, %c1_i32 : i32
    %9 = arith.extui %8 : i1 to i32
    %c0_i32_2 = arith.constant 0 : i32
    %10 = arith.cmpi ne, %9, %c0_i32_2 : i32
    scf.if %10 {
      %c1_i32_3 = arith.constant 1 : i32
      %11 = arith.maxsi %0, %c1_i32_3 : i32
      %12 = arith.sitofp %11 : i32 to f32
      %cst = arith.constant 1.000000e+00 : f32
      %13 = arith.divf %cst, %12 : f32
      %c0_4 = arith.constant 0 : index
      %c0_5 = arith.constant 0 : index
      %14 = vector.load %arg13[%c0_4, %c0_5] : memref<16x64xf32, #tpu.memory_space<vmem>>, vector<16x64xf32>
      %cst_6 = arith.constant 0xFF800000 : f32
      %15 = vector.broadcast %cst_6 : f32 to vector<16x64xf32>
      %16 = arith.cmpf ogt, %14, %15 : vector<16x64xf32>
      %cst_7 = arith.constant 0.000000e+00 : f32
      %17 = vector.broadcast %cst_7 : f32 to vector<16x64xf32>
      %18 = arith.select %16, %14, %17 : vector<16x64xi1>, vector<16x64xf32>
      %c0_8 = arith.constant 0 : index
      %c0_9 = arith.constant 0 : index
      %19 = vector.load %arg12[%c0_8, %c0_9] : memref<16x64xf32, #tpu.memory_space<vmem>>, vector<16x64xf32>
      %20 = vector.broadcast %13 : f32 to vector<16x64xf32>
      %21 = arith.mulf %19, %20 : vector<16x64xf32>
      %22 = tpu.concatenate %21, %18 in 1 : vector<16x64xf32>, vector<16x64xf32> -> vector<16x128xf32>
      %c0_10 = arith.constant 0 : index
      %c0_11 = arith.constant 0 : index
      %23 = vector.load %arg8[%c0_10, %c0_11] : memref<16x128xf32, #tpu.memory_space<vmem>>, vector<16x128xf32>
      tpu.vector_store %arg8[%c0_10, %c0_11], %22 {strides = array<i32>} : memref<16x128xf32, #tpu.memory_space<vmem>>, vector<16x128xf32>,
    } else {
    }
    return
  }
  func.func @transform_0(%arg0: i32, %arg1: i32, %arg2: memref<1xi32, #tpu.memory_space<smem>>) -> (i32, i32, i32) {
    %c0_i32 = arith.constant 0 : i32
    %c0_i32_0 = arith.constant 0 : i32
    return %arg1, %arg0, %c0_i32 : i32, i32, i32
  }
  func.func @transform_1(%arg0: i32, %arg1: i32, %arg2: memref<1xi32, #tpu.memory_space<smem>>) -> (i32, i32) {
    %c0_i32 = arith.constant 0 : i32
    %c0_i32_0 = arith.constant 0 : i32
    return %arg0, %c0_i32 : i32, i32
  }
  func.func @transform_2(%arg0: i32, %arg1: i32, %arg2: memref<1xi32, #tpu.memory_space<smem>>) -> (i32, i32) {
    %c0_i32 = arith.constant 0 : i32
    %c0_i32_0 = arith.constant 0 : i32
    %c0_i32_1 = arith.constant 0 : i32
    return %c0_i32, %c0_i32_0 : i32, i32
  }
  func.func @transform_3(%arg0: i32, %arg1: i32, %arg2: memref<1xi32, #tpu.memory_space<smem>>) -> (i32, i32) {
    %c0_i32 = arith.constant 0 : i32
    %c0_i32_0 = arith.constant 0 : i32
    %c0_i32_1 = arith.constant 0 : i32
    return %c0_i32, %c0_i32_0 : i32, i32
  }
  func.func @transform_4(%arg0: i32, %arg1: i32, %arg2: memref<1xi32, #tpu.memory_space<smem>>) -> (i32, i32) {
    %c0_i32 = arith.constant 0 : i32
    %c0_i32_0 = arith.constant 0 : i32
    %c0_i32_1 = arith.constant 0 : i32
    return %c0_i32, %c0_i32_0 : i32, i32
  }
  func.func @transform_5(%arg0: i32, %arg1: i32, %arg2: memref<1xi32, #tpu.memory_space<smem>>) -> (i32, i32) {
    %c0_i32 = arith.constant 0 : i32
    %c0_i32_0 = arith.constant 0 : i32
    return %arg0, %c0_i32 : i32, i32
  }
}

module attributes {stable_mosaic.version = 11 : i64} {
  func.func @lstm_pool_kernel(%arg0: i32, %arg1: i32, %arg2: memref<1xi32, #tpu.memory_space<smem>>, %arg3: memref<8x16x32xbf16, #tpu.memory_space<vmem>>, %arg4: memref<16x1xi32, #tpu.memory_space<vmem>>, %arg5: memref<32x256xbf16, #tpu.memory_space<vmem>>, %arg6: memref<64x256xbf16, #tpu.memory_space<vmem>>, %arg7: memref<1x256xf32, #tpu.memory_space<vmem>>, %arg8: memref<16x128xf32, #tpu.memory_space<vmem>>, %arg9: memref<128x256xf32, #tpu.memory_space<vmem>>, %arg10: memref<16x64xf32, #tpu.memory_space<vmem>>, %arg11: memref<16x64xf32, #tpu.memory_space<vmem>>, %arg12: memref<16x64xf32, #tpu.memory_space<vmem>>, %arg13: memref<16x64xf32, #tpu.memory_space<vmem>>) attributes {dimension_semantics = [#tpu.dimension_semantics<parallel>, #tpu.dimension_semantics<arbitrary>], iteration_bounds = array<i64: 2, 2>, scalar_prefetch = 1 : i64, scratch_operands = 5 : i64, tpu.core_type = #tpu.core_type<tc>, window_params = [{transform_indices = @transform_0, window_bounds = array<i64: 8, 16, 32>}, {transform_indices = @transform_1, window_bounds = array<i64: 16, 1>}, {pipeline_mode = #tpu.pipeline_mode<synchronous>, transform_indices = @transform_2, window_bounds = array<i64: 32, 256>}, {pipeline_mode = #tpu.pipeline_mode<synchronous>, transform_indices = @transform_3, window_bounds = array<i64: 64, 256>}, {pipeline_mode = #tpu.pipeline_mode<synchronous>, transform_indices = @transform_4, window_bounds = array<i64: 1, 256>}, {transform_indices = @transform_5, window_bounds = array<i64: 16, 128>}]} {
    %c0 = arith.constant 0 : index
    %0 = memref.load %arg2[%c0] : memref<1xi32, #tpu.memory_space<smem>>
    %c8_i32 = arith.constant 8 : i32
    %1 = arith.muli %arg1, %c8_i32 : i32
    %c0_i32 = arith.constant 0 : i32
    %2 = arith.cmpi eq, %arg1, %c0_i32 : i32
    %3 = arith.extui %2 : i1 to i32
    %c0_i32_0 = arith.constant 0 : i32
    %4 = arith.cmpi ne, %3, %c0_i32_0 : i32
    scf.if %4 {
      %cst = arith.constant 0.000000e+00 : f32
      %11 = vector.broadcast %cst : f32 to vector<16x64xf32>
      %c0_3 = arith.constant 0 : index
      %c0_4 = arith.constant 0 : index
      %12 = vector.load %arg10[%c0_3, %c0_4] : memref<16x64xf32, #tpu.memory_space<vmem>>, vector<16x64xf32>
      tpu.vector_store %arg10[%c0_3, %c0_4], %11 {strides = array<i32>} : memref<16x64xf32, #tpu.memory_space<vmem>>, vector<16x64xf32>,
      %cst_5 = arith.constant 0.000000e+00 : f32
      %13 = vector.broadcast %cst_5 : f32 to vector<16x64xf32>
      %c0_6 = arith.constant 0 : index
      %c0_7 = arith.constant 0 : index
      %14 = vector.load %arg11[%c0_6, %c0_7] : memref<16x64xf32, #tpu.memory_space<vmem>>, vector<16x64xf32>
      tpu.vector_store %arg11[%c0_6, %c0_7], %13 {strides = array<i32>} : memref<16x64xf32, #tpu.memory_space<vmem>>, vector<16x64xf32>,
      %cst_8 = arith.constant 0.000000e+00 : f32
      %15 = vector.broadcast %cst_8 : f32 to vector<16x64xf32>
      %c0_9 = arith.constant 0 : index
      %c0_10 = arith.constant 0 : index
      %16 = vector.load %arg12[%c0_9, %c0_10] : memref<16x64xf32, #tpu.memory_space<vmem>>, vector<16x64xf32>
      tpu.vector_store %arg12[%c0_9, %c0_10], %15 {strides = array<i32>} : memref<16x64xf32, #tpu.memory_space<vmem>>, vector<16x64xf32>,
      %cst_11 = arith.constant 0xFF800000 : f32
      %17 = vector.broadcast %cst_11 : f32 to vector<16x64xf32>
      %c0_12 = arith.constant 0 : index
      %c0_13 = arith.constant 0 : index
      %18 = vector.load %arg13[%c0_12, %c0_13] : memref<16x64xf32, #tpu.memory_space<vmem>>, vector<16x64xf32>
      tpu.vector_store %arg13[%c0_12, %c0_13], %17 {strides = array<i32>} : memref<16x64xf32, #tpu.memory_space<vmem>>, vector<16x64xf32>,
    } else {
    }
    %5 = arith.cmpi slt, %1, %0 : i32
    %6 = arith.extui %5 : i1 to i32
    %c0_i32_1 = arith.constant 0 : i32
    %7 = arith.cmpi ne, %6, %c0_i32_1 : i32
    scf.if %7 {
      %c0_3 = arith.constant 0 : index
      %c0_4 = arith.constant 0 : index
      %c0_5 = arith.constant 0 : index
      %11 = vector.load %arg3[%c0_3, %c0_4, %c0_5] : memref<8x16x32xbf16, #tpu.memory_space<vmem>>, vector<8x16x32xbf16>
      %12 = vector.shape_cast %11 : vector<8x16x32xbf16> to vector<128x32xbf16>
      %c0_6 = arith.constant 0 : index
      %c0_7 = arith.constant 0 : index
      %13 = vector.load %arg5[%c0_6, %c0_7] : memref<32x256xbf16, #tpu.memory_space<vmem>>, vector<32x256xbf16>
      %cst = arith.constant dense<0.000000e+00> : vector<128x256xf32>
      %14 = tpu.matmul %12, %13, %cst {dimension_numbers = #tpu.dot_dimension_numbers<[1], [0], [0], [1], [0, 0, 1, 1], [], []>} : vector<128x32xbf16>, vector<32x256xbf16>, vector<128x256xf32> -> vector<128x256xf32>
      %c0_8 = arith.constant 0 : index
      %c0_9 = arith.constant 0 : index
      %15 = vector.load %arg7[%c0_8, %c0_9] : memref<1x256xf32, #tpu.memory_space<vmem>>, vector<1x256xf32>
      %16 = vector.broadcast %15 : vector<1x256xf32> to vector<128x256xf32>
      %17 = arith.addf %14, %16 : vector<128x256xf32>
      %c0_10 = arith.constant 0 : index
      %c0_11 = arith.constant 0 : index
      %18 = vector.load %arg9[%c0_10, %c0_11] : memref<128x256xf32, #tpu.memory_space<vmem>>, vector<128x256xf32>
      tpu.vector_store %arg9[%c0_10, %c0_11], %17 {strides = array<i32>} : memref<128x256xf32, #tpu.memory_space<vmem>>, vector<128x256xf32>,
      %c0_12 = arith.constant 0 : index
      %c0_13 = arith.constant 0 : index
      %19 = vector.load %arg4[%c0_12, %c0_13] : memref<16x1xi32, #tpu.memory_space<vmem>>, vector<16x1xi32>
      %c0_14 = arith.constant 0 : index
      %c0_15 = arith.constant 0 : index
      %20 = vector.load %arg6[%c0_14, %c0_15] : memref<64x256xbf16, #tpu.memory_space<vmem>>, vector<64x256xbf16>
      %c0_16 = arith.constant 0 : index
      %c0_17 = arith.constant 0 : index
      %21 = vector.load %arg10[%c0_16, %c0_17] : memref<16x64xf32, #tpu.memory_space<vmem>>, vector<16x64xf32>
      %c0_18 = arith.constant 0 : index
      %c0_19 = arith.constant 0 : index
      %22 = vector.load %arg11[%c0_18, %c0_19] : memref<16x64xf32, #tpu.memory_space<vmem>>, vector<16x64xf32>
      %c0_20 = arith.constant 0 : index
      %c0_21 = arith.constant 0 : index
      %23 = vector.load %arg12[%c0_20, %c0_21] : memref<16x64xf32, #tpu.memory_space<vmem>>, vector<16x64xf32>
      %c0_22 = arith.constant 0 : index
      %c0_23 = arith.constant 0 : index
      %24 = vector.load %arg13[%c0_22, %c0_23] : memref<16x64xf32, #tpu.memory_space<vmem>>, vector<16x64xf32>
      %c0_i32_24 = arith.constant 0 : i32
      %25 = arith.addi %1, %c0_i32_24 : i32
      %c16_i32 = arith.constant 16 : i32
      %26 = arith.muli %c0_i32_24, %c16_i32 : i32
      %27 = tpu.assume_multiple %26, 16 : i32
      %28 = arith.index_cast %27 : i32 to index
      %c0_25 = arith.constant 0 : index
      %29 = vector.load %arg9[%28, %c0_25] : memref<128x256xf32, #tpu.memory_space<vmem>>, vector<16x256xf32>
      %30 = arith.truncf %21 : vector<16x64xf32> to vector<16x64xbf16>
      %cst_26 = arith.constant dense<0.000000e+00> : vector<16x256xf32>
      %31 = tpu.matmul %30, %20, %cst_26 {dimension_numbers = #tpu.dot_dimension_numbers<[1], [0], [0], [1], [0, 0, 1, 1], [], []>} : vector<16x64xbf16>, vector<64x256xbf16>, vector<16x256xf32> -> vector<16x256xf32>
      %32 = arith.addf %29, %31 : vector<16x256xf32>
      %33 = vector.extract_strided_slice %32 {offsets = [0, 0], sizes = [16, 192], strides = [1, 1]} : vector<16x256xf32> to vector<16x192xf32>
      %34 = arith.negf %33 : vector<16x192xf32>
      %35 = math.exp %34 : vector<16x192xf32>
      %cst_27 = arith.constant 1.000000e+00 : f32
      %36 = vector.broadcast %cst_27 : f32 to vector<16x192xf32>
      %37 = arith.addf %36, %35 : vector<16x192xf32>
      %38 = arith.divf %36, %37 : vector<16x192xf32>
      %39 = vector.extract_strided_slice %32 {offsets = [0, 192], sizes = [16, 64], strides = [1, 1]} : vector<16x256xf32> to vector<16x64xf32>
      %40 = math.tanh %39 : vector<16x64xf32>
      %41 = vector.extract_strided_slice %38 {offsets = [0, 0], sizes = [16, 64], strides = [1, 1]} : vector<16x192xf32> to vector<16x64xf32>
      %42 = vector.extract_strided_slice %38 {offsets = [0, 64], sizes = [16, 64], strides = [1, 1]} : vector<16x192xf32> to vector<16x64xf32>
      %43 = vector.extract_strided_slice %38 {offsets = [0, 128], sizes = [16, 64], strides = [1, 1]} : vector<16x192xf32> to vector<16x64xf32>
      %44 = arith.mulf %42, %22 : vector<16x64xf32>
      %45 = arith.mulf %41, %40 : vector<16x64xf32>
      %46 = arith.addf %44, %45 : vector<16x64xf32>
      %47 = math.tanh %46 : vector<16x64xf32>
      %48 = arith.mulf %43, %47 : vector<16x64xf32>
      %49 = vector.broadcast %25 : i32 to vector<16x1xi32>
      %50 = arith.cmpi slt, %49, %19 : vector<16x1xi32>
      %cst_28 = arith.constant 0.000000e+00 : f32
      %51 = vector.shape_cast %50 : vector<16x1xi1> to vector<16x1xi1>
      %52 = vector.broadcast %51 : vector<16x1xi1> to vector<16x64xi1>
      %53 = vector.broadcast %cst_28 : f32 to vector<16x64xf32>
      %54 = arith.select %52, %48, %53 : vector<16x64xi1>, vector<16x64xf32>
      %55 = arith.addf %23, %54 : vector<16x64xf32>
      %56 = arith.cmpi slt, %25, %0 : i32
      %cst_29 = arith.constant 0xFF800000 : f32
      %57 = vector.broadcast %cst_29 : f32 to vector<16x64xf32>
      %58 = arith.select %56, %54, %57 : vector<16x64xf32>
      %59 = arith.maximumf %24, %58 : vector<16x64xf32>
      %c1_i32_30 = arith.constant 1 : i32
      %60 = arith.addi %1, %c1_i32_30 : i32
      %c16_i32_31 = arith.constant 16 : i32
      %61 = arith.muli %c1_i32_30, %c16_i32_31 : i32
      %62 = tpu.assume_multiple %61, 16 : i32
      %63 = arith.index_cast %62 : i32 to index
      %c0_32 = arith.constant 0 : index
      %64 = vector.load %arg9[%63, %c0_32] : memref<128x256xf32, #tpu.memory_space<vmem>>, vector<16x256xf32>
      %65 = arith.truncf %48 : vector<16x64xf32> to vector<16x64xbf16>
      %cst_33 = arith.constant dense<0.000000e+00> : vector<16x256xf32>
      %66 = tpu.matmul %65, %20, %cst_33 {dimension_numbers = #tpu.dot_dimension_numbers<[1], [0], [0], [1], [0, 0, 1, 1], [], []>} : vector<16x64xbf16>, vector<64x256xbf16>, vector<16x256xf32> -> vector<16x256xf32>
      %67 = arith.addf %64, %66 : vector<16x256xf32>
      %68 = vector.extract_strided_slice %67 {offsets = [0, 0], sizes = [16, 192], strides = [1, 1]} : vector<16x256xf32> to vector<16x192xf32>
      %69 = arith.negf %68 : vector<16x192xf32>
      %70 = math.exp %69 : vector<16x192xf32>
      %cst_34 = arith.constant 1.000000e+00 : f32
      %71 = vector.broadcast %cst_34 : f32 to vector<16x192xf32>
      %72 = arith.addf %71, %70 : vector<16x192xf32>
      %73 = arith.divf %71, %72 : vector<16x192xf32>
      %74 = vector.extract_strided_slice %67 {offsets = [0, 192], sizes = [16, 64], strides = [1, 1]} : vector<16x256xf32> to vector<16x64xf32>
      %75 = math.tanh %74 : vector<16x64xf32>
      %76 = vector.extract_strided_slice %73 {offsets = [0, 0], sizes = [16, 64], strides = [1, 1]} : vector<16x192xf32> to vector<16x64xf32>
      %77 = vector.extract_strided_slice %73 {offsets = [0, 64], sizes = [16, 64], strides = [1, 1]} : vector<16x192xf32> to vector<16x64xf32>
      %78 = vector.extract_strided_slice %73 {offsets = [0, 128], sizes = [16, 64], strides = [1, 1]} : vector<16x192xf32> to vector<16x64xf32>
      %79 = arith.mulf %77, %46 : vector<16x64xf32>
      %80 = arith.mulf %76, %75 : vector<16x64xf32>
      %81 = arith.addf %79, %80 : vector<16x64xf32>
      %82 = math.tanh %81 : vector<16x64xf32>
      %83 = arith.mulf %78, %82 : vector<16x64xf32>
      %84 = vector.broadcast %60 : i32 to vector<16x1xi32>
      %85 = arith.cmpi slt, %84, %19 : vector<16x1xi32>
      %cst_35 = arith.constant 0.000000e+00 : f32
      %86 = vector.shape_cast %85 : vector<16x1xi1> to vector<16x1xi1>
      %87 = vector.broadcast %86 : vector<16x1xi1> to vector<16x64xi1>
      %88 = vector.broadcast %cst_35 : f32 to vector<16x64xf32>
      %89 = arith.select %87, %83, %88 : vector<16x64xi1>, vector<16x64xf32>
      %90 = arith.addf %55, %89 : vector<16x64xf32>
      %91 = arith.cmpi slt, %60, %0 : i32
      %cst_36 = arith.constant 0xFF800000 : f32
      %92 = vector.broadcast %cst_36 : f32 to vector<16x64xf32>
      %93 = arith.select %91, %89, %92 : vector<16x64xf32>
      %94 = arith.maximumf %59, %93 : vector<16x64xf32>
      %c2_i32 = arith.constant 2 : i32
      %95 = arith.addi %1, %c2_i32 : i32
      %c16_i32_37 = arith.constant 16 : i32
      %96 = arith.muli %c2_i32, %c16_i32_37 : i32
      %97 = tpu.assume_multiple %96, 16 : i32
      %98 = arith.index_cast %97 : i32 to index
      %c0_38 = arith.constant 0 : index
      %99 = vector.load %arg9[%98, %c0_38] : memref<128x256xf32, #tpu.memory_space<vmem>>, vector<16x256xf32>
      %100 = arith.truncf %83 : vector<16x64xf32> to vector<16x64xbf16>
      %cst_39 = arith.constant dense<0.000000e+00> : vector<16x256xf32>
      %101 = tpu.matmul %100, %20, %cst_39 {dimension_numbers = #tpu.dot_dimension_numbers<[1], [0], [0], [1], [0, 0, 1, 1], [], []>} : vector<16x64xbf16>, vector<64x256xbf16>, vector<16x256xf32> -> vector<16x256xf32>
      %102 = arith.addf %99, %101 : vector<16x256xf32>
      %103 = vector.extract_strided_slice %102 {offsets = [0, 0], sizes = [16, 192], strides = [1, 1]} : vector<16x256xf32> to vector<16x192xf32>
      %104 = arith.negf %103 : vector<16x192xf32>
      %105 = math.exp %104 : vector<16x192xf32>
      %cst_40 = arith.constant 1.000000e+00 : f32
      %106 = vector.broadcast %cst_40 : f32 to vector<16x192xf32>
      %107 = arith.addf %106, %105 : vector<16x192xf32>
      %108 = arith.divf %106, %107 : vector<16x192xf32>
      %109 = vector.extract_strided_slice %102 {offsets = [0, 192], sizes = [16, 64], strides = [1, 1]} : vector<16x256xf32> to vector<16x64xf32>
      %110 = math.tanh %109 : vector<16x64xf32>
      %111 = vector.extract_strided_slice %108 {offsets = [0, 0], sizes = [16, 64], strides = [1, 1]} : vector<16x192xf32> to vector<16x64xf32>
      %112 = vector.extract_strided_slice %108 {offsets = [0, 64], sizes = [16, 64], strides = [1, 1]} : vector<16x192xf32> to vector<16x64xf32>
      %113 = vector.extract_strided_slice %108 {offsets = [0, 128], sizes = [16, 64], strides = [1, 1]} : vector<16x192xf32> to vector<16x64xf32>
      %114 = arith.mulf %112, %81 : vector<16x64xf32>
      %115 = arith.mulf %111, %110 : vector<16x64xf32>
      %116 = arith.addf %114, %115 : vector<16x64xf32>
      %117 = math.tanh %116 : vector<16x64xf32>
      %118 = arith.mulf %113, %117 : vector<16x64xf32>
      %119 = vector.broadcast %95 : i32 to vector<16x1xi32>
      %120 = arith.cmpi slt, %119, %19 : vector<16x1xi32>
      %cst_41 = arith.constant 0.000000e+00 : f32
      %121 = vector.shape_cast %120 : vector<16x1xi1> to vector<16x1xi1>
      %122 = vector.broadcast %121 : vector<16x1xi1> to vector<16x64xi1>
      %123 = vector.broadcast %cst_41 : f32 to vector<16x64xf32>
      %124 = arith.select %122, %118, %123 : vector<16x64xi1>, vector<16x64xf32>
      %125 = arith.addf %90, %124 : vector<16x64xf32>
      %126 = arith.cmpi slt, %95, %0 : i32
      %cst_42 = arith.constant 0xFF800000 : f32
      %127 = vector.broadcast %cst_42 : f32 to vector<16x64xf32>
      %128 = arith.select %126, %124, %127 : vector<16x64xf32>
      %129 = arith.maximumf %94, %128 : vector<16x64xf32>
      %c3_i32 = arith.constant 3 : i32
      %130 = arith.addi %1, %c3_i32 : i32
      %c16_i32_43 = arith.constant 16 : i32
      %131 = arith.muli %c3_i32, %c16_i32_43 : i32
      %132 = tpu.assume_multiple %131, 16 : i32
      %133 = arith.index_cast %132 : i32 to index
      %c0_44 = arith.constant 0 : index
      %134 = vector.load %arg9[%133, %c0_44] : memref<128x256xf32, #tpu.memory_space<vmem>>, vector<16x256xf32>
      %135 = arith.truncf %118 : vector<16x64xf32> to vector<16x64xbf16>
      %cst_45 = arith.constant dense<0.000000e+00> : vector<16x256xf32>
      %136 = tpu.matmul %135, %20, %cst_45 {dimension_numbers = #tpu.dot_dimension_numbers<[1], [0], [0], [1], [0, 0, 1, 1], [], []>} : vector<16x64xbf16>, vector<64x256xbf16>, vector<16x256xf32> -> vector<16x256xf32>
      %137 = arith.addf %134, %136 : vector<16x256xf32>
      %138 = vector.extract_strided_slice %137 {offsets = [0, 0], sizes = [16, 192], strides = [1, 1]} : vector<16x256xf32> to vector<16x192xf32>
      %139 = arith.negf %138 : vector<16x192xf32>
      %140 = math.exp %139 : vector<16x192xf32>
      %cst_46 = arith.constant 1.000000e+00 : f32
      %141 = vector.broadcast %cst_46 : f32 to vector<16x192xf32>
      %142 = arith.addf %141, %140 : vector<16x192xf32>
      %143 = arith.divf %141, %142 : vector<16x192xf32>
      %144 = vector.extract_strided_slice %137 {offsets = [0, 192], sizes = [16, 64], strides = [1, 1]} : vector<16x256xf32> to vector<16x64xf32>
      %145 = math.tanh %144 : vector<16x64xf32>
      %146 = vector.extract_strided_slice %143 {offsets = [0, 0], sizes = [16, 64], strides = [1, 1]} : vector<16x192xf32> to vector<16x64xf32>
      %147 = vector.extract_strided_slice %143 {offsets = [0, 64], sizes = [16, 64], strides = [1, 1]} : vector<16x192xf32> to vector<16x64xf32>
      %148 = vector.extract_strided_slice %143 {offsets = [0, 128], sizes = [16, 64], strides = [1, 1]} : vector<16x192xf32> to vector<16x64xf32>
      %149 = arith.mulf %147, %116 : vector<16x64xf32>
      %150 = arith.mulf %146, %145 : vector<16x64xf32>
      %151 = arith.addf %149, %150 : vector<16x64xf32>
      %152 = math.tanh %151 : vector<16x64xf32>
      %153 = arith.mulf %148, %152 : vector<16x64xf32>
      %154 = vector.broadcast %130 : i32 to vector<16x1xi32>
      %155 = arith.cmpi slt, %154, %19 : vector<16x1xi32>
      %cst_47 = arith.constant 0.000000e+00 : f32
      %156 = vector.shape_cast %155 : vector<16x1xi1> to vector<16x1xi1>
      %157 = vector.broadcast %156 : vector<16x1xi1> to vector<16x64xi1>
      %158 = vector.broadcast %cst_47 : f32 to vector<16x64xf32>
      %159 = arith.select %157, %153, %158 : vector<16x64xi1>, vector<16x64xf32>
      %160 = arith.addf %125, %159 : vector<16x64xf32>
      %161 = arith.cmpi slt, %130, %0 : i32
      %cst_48 = arith.constant 0xFF800000 : f32
      %162 = vector.broadcast %cst_48 : f32 to vector<16x64xf32>
      %163 = arith.select %161, %159, %162 : vector<16x64xf32>
      %164 = arith.maximumf %129, %163 : vector<16x64xf32>
      %c4_i32 = arith.constant 4 : i32
      %165 = arith.addi %1, %c4_i32 : i32
      %c16_i32_49 = arith.constant 16 : i32
      %166 = arith.muli %c4_i32, %c16_i32_49 : i32
      %167 = tpu.assume_multiple %166, 16 : i32
      %168 = arith.index_cast %167 : i32 to index
      %c0_50 = arith.constant 0 : index
      %169 = vector.load %arg9[%168, %c0_50] : memref<128x256xf32, #tpu.memory_space<vmem>>, vector<16x256xf32>
      %170 = arith.truncf %153 : vector<16x64xf32> to vector<16x64xbf16>
      %cst_51 = arith.constant dense<0.000000e+00> : vector<16x256xf32>
      %171 = tpu.matmul %170, %20, %cst_51 {dimension_numbers = #tpu.dot_dimension_numbers<[1], [0], [0], [1], [0, 0, 1, 1], [], []>} : vector<16x64xbf16>, vector<64x256xbf16>, vector<16x256xf32> -> vector<16x256xf32>
      %172 = arith.addf %169, %171 : vector<16x256xf32>
      %173 = vector.extract_strided_slice %172 {offsets = [0, 0], sizes = [16, 192], strides = [1, 1]} : vector<16x256xf32> to vector<16x192xf32>
      %174 = arith.negf %173 : vector<16x192xf32>
      %175 = math.exp %174 : vector<16x192xf32>
      %cst_52 = arith.constant 1.000000e+00 : f32
      %176 = vector.broadcast %cst_52 : f32 to vector<16x192xf32>
      %177 = arith.addf %176, %175 : vector<16x192xf32>
      %178 = arith.divf %176, %177 : vector<16x192xf32>
      %179 = vector.extract_strided_slice %172 {offsets = [0, 192], sizes = [16, 64], strides = [1, 1]} : vector<16x256xf32> to vector<16x64xf32>
      %180 = math.tanh %179 : vector<16x64xf32>
      %181 = vector.extract_strided_slice %178 {offsets = [0, 0], sizes = [16, 64], strides = [1, 1]} : vector<16x192xf32> to vector<16x64xf32>
      %182 = vector.extract_strided_slice %178 {offsets = [0, 64], sizes = [16, 64], strides = [1, 1]} : vector<16x192xf32> to vector<16x64xf32>
      %183 = vector.extract_strided_slice %178 {offsets = [0, 128], sizes = [16, 64], strides = [1, 1]} : vector<16x192xf32> to vector<16x64xf32>
      %184 = arith.mulf %182, %151 : vector<16x64xf32>
      %185 = arith.mulf %181, %180 : vector<16x64xf32>
      %186 = arith.addf %184, %185 : vector<16x64xf32>
      %187 = math.tanh %186 : vector<16x64xf32>
      %188 = arith.mulf %183, %187 : vector<16x64xf32>
      %189 = vector.broadcast %165 : i32 to vector<16x1xi32>
      %190 = arith.cmpi slt, %189, %19 : vector<16x1xi32>
      %cst_53 = arith.constant 0.000000e+00 : f32
      %191 = vector.shape_cast %190 : vector<16x1xi1> to vector<16x1xi1>
      %192 = vector.broadcast %191 : vector<16x1xi1> to vector<16x64xi1>
      %193 = vector.broadcast %cst_53 : f32 to vector<16x64xf32>
      %194 = arith.select %192, %188, %193 : vector<16x64xi1>, vector<16x64xf32>
      %195 = arith.addf %160, %194 : vector<16x64xf32>
      %196 = arith.cmpi slt, %165, %0 : i32
      %cst_54 = arith.constant 0xFF800000 : f32
      %197 = vector.broadcast %cst_54 : f32 to vector<16x64xf32>
      %198 = arith.select %196, %194, %197 : vector<16x64xf32>
      %199 = arith.maximumf %164, %198 : vector<16x64xf32>
      %c5_i32 = arith.constant 5 : i32
      %200 = arith.addi %1, %c5_i32 : i32
      %c16_i32_55 = arith.constant 16 : i32
      %201 = arith.muli %c5_i32, %c16_i32_55 : i32
      %202 = tpu.assume_multiple %201, 16 : i32
      %203 = arith.index_cast %202 : i32 to index
      %c0_56 = arith.constant 0 : index
      %204 = vector.load %arg9[%203, %c0_56] : memref<128x256xf32, #tpu.memory_space<vmem>>, vector<16x256xf32>
      %205 = arith.truncf %188 : vector<16x64xf32> to vector<16x64xbf16>
      %cst_57 = arith.constant dense<0.000000e+00> : vector<16x256xf32>
      %206 = tpu.matmul %205, %20, %cst_57 {dimension_numbers = #tpu.dot_dimension_numbers<[1], [0], [0], [1], [0, 0, 1, 1], [], []>} : vector<16x64xbf16>, vector<64x256xbf16>, vector<16x256xf32> -> vector<16x256xf32>
      %207 = arith.addf %204, %206 : vector<16x256xf32>
      %208 = vector.extract_strided_slice %207 {offsets = [0, 0], sizes = [16, 192], strides = [1, 1]} : vector<16x256xf32> to vector<16x192xf32>
      %209 = arith.negf %208 : vector<16x192xf32>
      %210 = math.exp %209 : vector<16x192xf32>
      %cst_58 = arith.constant 1.000000e+00 : f32
      %211 = vector.broadcast %cst_58 : f32 to vector<16x192xf32>
      %212 = arith.addf %211, %210 : vector<16x192xf32>
      %213 = arith.divf %211, %212 : vector<16x192xf32>
      %214 = vector.extract_strided_slice %207 {offsets = [0, 192], sizes = [16, 64], strides = [1, 1]} : vector<16x256xf32> to vector<16x64xf32>
      %215 = math.tanh %214 : vector<16x64xf32>
      %216 = vector.extract_strided_slice %213 {offsets = [0, 0], sizes = [16, 64], strides = [1, 1]} : vector<16x192xf32> to vector<16x64xf32>
      %217 = vector.extract_strided_slice %213 {offsets = [0, 64], sizes = [16, 64], strides = [1, 1]} : vector<16x192xf32> to vector<16x64xf32>
      %218 = vector.extract_strided_slice %213 {offsets = [0, 128], sizes = [16, 64], strides = [1, 1]} : vector<16x192xf32> to vector<16x64xf32>
      %219 = arith.mulf %217, %186 : vector<16x64xf32>
      %220 = arith.mulf %216, %215 : vector<16x64xf32>
      %221 = arith.addf %219, %220 : vector<16x64xf32>
      %222 = math.tanh %221 : vector<16x64xf32>
      %223 = arith.mulf %218, %222 : vector<16x64xf32>
      %224 = vector.broadcast %200 : i32 to vector<16x1xi32>
      %225 = arith.cmpi slt, %224, %19 : vector<16x1xi32>
      %cst_59 = arith.constant 0.000000e+00 : f32
      %226 = vector.shape_cast %225 : vector<16x1xi1> to vector<16x1xi1>
      %227 = vector.broadcast %226 : vector<16x1xi1> to vector<16x64xi1>
      %228 = vector.broadcast %cst_59 : f32 to vector<16x64xf32>
      %229 = arith.select %227, %223, %228 : vector<16x64xi1>, vector<16x64xf32>
      %230 = arith.addf %195, %229 : vector<16x64xf32>
      %231 = arith.cmpi slt, %200, %0 : i32
      %cst_60 = arith.constant 0xFF800000 : f32
      %232 = vector.broadcast %cst_60 : f32 to vector<16x64xf32>
      %233 = arith.select %231, %229, %232 : vector<16x64xf32>
      %234 = arith.maximumf %199, %233 : vector<16x64xf32>
      %c6_i32 = arith.constant 6 : i32
      %235 = arith.addi %1, %c6_i32 : i32
      %c16_i32_61 = arith.constant 16 : i32
      %236 = arith.muli %c6_i32, %c16_i32_61 : i32
      %237 = tpu.assume_multiple %236, 16 : i32
      %238 = arith.index_cast %237 : i32 to index
      %c0_62 = arith.constant 0 : index
      %239 = vector.load %arg9[%238, %c0_62] : memref<128x256xf32, #tpu.memory_space<vmem>>, vector<16x256xf32>
      %240 = arith.truncf %223 : vector<16x64xf32> to vector<16x64xbf16>
      %cst_63 = arith.constant dense<0.000000e+00> : vector<16x256xf32>
      %241 = tpu.matmul %240, %20, %cst_63 {dimension_numbers = #tpu.dot_dimension_numbers<[1], [0], [0], [1], [0, 0, 1, 1], [], []>} : vector<16x64xbf16>, vector<64x256xbf16>, vector<16x256xf32> -> vector<16x256xf32>
      %242 = arith.addf %239, %241 : vector<16x256xf32>
      %243 = vector.extract_strided_slice %242 {offsets = [0, 0], sizes = [16, 192], strides = [1, 1]} : vector<16x256xf32> to vector<16x192xf32>
      %244 = arith.negf %243 : vector<16x192xf32>
      %245 = math.exp %244 : vector<16x192xf32>
      %cst_64 = arith.constant 1.000000e+00 : f32
      %246 = vector.broadcast %cst_64 : f32 to vector<16x192xf32>
      %247 = arith.addf %246, %245 : vector<16x192xf32>
      %248 = arith.divf %246, %247 : vector<16x192xf32>
      %249 = vector.extract_strided_slice %242 {offsets = [0, 192], sizes = [16, 64], strides = [1, 1]} : vector<16x256xf32> to vector<16x64xf32>
      %250 = math.tanh %249 : vector<16x64xf32>
      %251 = vector.extract_strided_slice %248 {offsets = [0, 0], sizes = [16, 64], strides = [1, 1]} : vector<16x192xf32> to vector<16x64xf32>
      %252 = vector.extract_strided_slice %248 {offsets = [0, 64], sizes = [16, 64], strides = [1, 1]} : vector<16x192xf32> to vector<16x64xf32>
      %253 = vector.extract_strided_slice %248 {offsets = [0, 128], sizes = [16, 64], strides = [1, 1]} : vector<16x192xf32> to vector<16x64xf32>
      %254 = arith.mulf %252, %221 : vector<16x64xf32>
      %255 = arith.mulf %251, %250 : vector<16x64xf32>
      %256 = arith.addf %254, %255 : vector<16x64xf32>
      %257 = math.tanh %256 : vector<16x64xf32>
      %258 = arith.mulf %253, %257 : vector<16x64xf32>
      %259 = vector.broadcast %235 : i32 to vector<16x1xi32>
      %260 = arith.cmpi slt, %259, %19 : vector<16x1xi32>
      %cst_65 = arith.constant 0.000000e+00 : f32
      %261 = vector.shape_cast %260 : vector<16x1xi1> to vector<16x1xi1>
      %262 = vector.broadcast %261 : vector<16x1xi1> to vector<16x64xi1>
      %263 = vector.broadcast %cst_65 : f32 to vector<16x64xf32>
      %264 = arith.select %262, %258, %263 : vector<16x64xi1>, vector<16x64xf32>
      %265 = arith.addf %230, %264 : vector<16x64xf32>
      %266 = arith.cmpi slt, %235, %0 : i32
      %cst_66 = arith.constant 0xFF800000 : f32
      %267 = vector.broadcast %cst_66 : f32 to vector<16x64xf32>
      %268 = arith.select %266, %264, %267 : vector<16x64xf32>
      %269 = arith.maximumf %234, %268 : vector<16x64xf32>
      %c7_i32 = arith.constant 7 : i32
      %270 = arith.addi %1, %c7_i32 : i32
      %c16_i32_67 = arith.constant 16 : i32
      %271 = arith.muli %c7_i32, %c16_i32_67 : i32
      %272 = tpu.assume_multiple %271, 16 : i32
      %273 = arith.index_cast %272 : i32 to index
      %c0_68 = arith.constant 0 : index
      %274 = vector.load %arg9[%273, %c0_68] : memref<128x256xf32, #tpu.memory_space<vmem>>, vector<16x256xf32>
      %275 = arith.truncf %258 : vector<16x64xf32> to vector<16x64xbf16>
      %cst_69 = arith.constant dense<0.000000e+00> : vector<16x256xf32>
      %276 = tpu.matmul %275, %20, %cst_69 {dimension_numbers = #tpu.dot_dimension_numbers<[1], [0], [0], [1], [0, 0, 1, 1], [], []>} : vector<16x64xbf16>, vector<64x256xbf16>, vector<16x256xf32> -> vector<16x256xf32>
      %277 = arith.addf %274, %276 : vector<16x256xf32>
      %278 = vector.extract_strided_slice %277 {offsets = [0, 0], sizes = [16, 192], strides = [1, 1]} : vector<16x256xf32> to vector<16x192xf32>
      %279 = arith.negf %278 : vector<16x192xf32>
      %280 = math.exp %279 : vector<16x192xf32>
      %cst_70 = arith.constant 1.000000e+00 : f32
      %281 = vector.broadcast %cst_70 : f32 to vector<16x192xf32>
      %282 = arith.addf %281, %280 : vector<16x192xf32>
      %283 = arith.divf %281, %282 : vector<16x192xf32>
      %284 = vector.extract_strided_slice %277 {offsets = [0, 192], sizes = [16, 64], strides = [1, 1]} : vector<16x256xf32> to vector<16x64xf32>
      %285 = math.tanh %284 : vector<16x64xf32>
      %286 = vector.extract_strided_slice %283 {offsets = [0, 0], sizes = [16, 64], strides = [1, 1]} : vector<16x192xf32> to vector<16x64xf32>
      %287 = vector.extract_strided_slice %283 {offsets = [0, 64], sizes = [16, 64], strides = [1, 1]} : vector<16x192xf32> to vector<16x64xf32>
      %288 = vector.extract_strided_slice %283 {offsets = [0, 128], sizes = [16, 64], strides = [1, 1]} : vector<16x192xf32> to vector<16x64xf32>
      %289 = arith.mulf %287, %256 : vector<16x64xf32>
      %290 = arith.mulf %286, %285 : vector<16x64xf32>
      %291 = arith.addf %289, %290 : vector<16x64xf32>
      %292 = math.tanh %291 : vector<16x64xf32>
      %293 = arith.mulf %288, %292 : vector<16x64xf32>
      %294 = vector.broadcast %270 : i32 to vector<16x1xi32>
      %295 = arith.cmpi slt, %294, %19 : vector<16x1xi32>
      %cst_71 = arith.constant 0.000000e+00 : f32
      %296 = vector.shape_cast %295 : vector<16x1xi1> to vector<16x1xi1>
      %297 = vector.broadcast %296 : vector<16x1xi1> to vector<16x64xi1>
      %298 = vector.broadcast %cst_71 : f32 to vector<16x64xf32>
      %299 = arith.select %297, %293, %298 : vector<16x64xi1>, vector<16x64xf32>
      %300 = arith.addf %265, %299 : vector<16x64xf32>
      %301 = arith.cmpi slt, %270, %0 : i32
      %cst_72 = arith.constant 0xFF800000 : f32
      %302 = vector.broadcast %cst_72 : f32 to vector<16x64xf32>
      %303 = arith.select %301, %299, %302 : vector<16x64xf32>
      %304 = arith.maximumf %269, %303 : vector<16x64xf32>
      %c8_i32_73 = arith.constant 8 : i32
      %c0_74 = arith.constant 0 : index
      %c0_75 = arith.constant 0 : index
      %305 = vector.load %arg10[%c0_74, %c0_75] : memref<16x64xf32, #tpu.memory_space<vmem>>, vector<16x64xf32>
      tpu.vector_store %arg10[%c0_74, %c0_75], %293 {strides = array<i32>} : memref<16x64xf32, #tpu.memory_space<vmem>>, vector<16x64xf32>,
      %c0_76 = arith.constant 0 : index
      %c0_77 = arith.constant 0 : index
      %306 = vector.load %arg11[%c0_76, %c0_77] : memref<16x64xf32, #tpu.memory_space<vmem>>, vector<16x64xf32>
      tpu.vector_store %arg11[%c0_76, %c0_77], %291 {strides = array<i32>} : memref<16x64xf32, #tpu.memory_space<vmem>>, vector<16x64xf32>,
      %c0_78 = arith.constant 0 : index
      %c0_79 = arith.constant 0 : index
      %307 = vector.load %arg12[%c0_78, %c0_79] : memref<16x64xf32, #tpu.memory_space<vmem>>, vector<16x64xf32>
      tpu.vector_store %arg12[%c0_78, %c0_79], %300 {strides = array<i32>} : memref<16x64xf32, #tpu.memory_space<vmem>>, vector<16x64xf32>,
      %c0_80 = arith.constant 0 : index
      %c0_81 = arith.constant 0 : index
      %308 = vector.load %arg13[%c0_80, %c0_81] : memref<16x64xf32, #tpu.memory_space<vmem>>, vector<16x64xf32>
      tpu.vector_store %arg13[%c0_80, %c0_81], %304 {strides = array<i32>} : memref<16x64xf32, #tpu.memory_space<vmem>>, vector<16x64xf32>,
    } else {
    }
    %c1_i32 = arith.constant 1 : i32
    %8 = arith.cmpi eq, %arg1, %c1_i32 : i32
    %9 = arith.extui %8 : i1 to i32
    %c0_i32_2 = arith.constant 0 : i32
    %10 = arith.cmpi ne, %9, %c0_i32_2 : i32
    scf.if %10 {
      %c1_i32_3 = arith.constant 1 : i32
      %11 = arith.maxsi %0, %c1_i32_3 : i32
      %12 = arith.sitofp %11 : i32 to f32
      %cst = arith.constant 1.000000e+00 : f32
      %13 = arith.divf %cst, %12 : f32
      %c0_4 = arith.constant 0 : index
      %c0_5 = arith.constant 0 : index
      %14 = vector.load %arg13[%c0_4, %c0_5] : memref<16x64xf32, #tpu.memory_space<vmem>>, vector<16x64xf32>
      %cst_6 = arith.constant 0xFF800000 : f32
      %15 = vector.broadcast %cst_6 : f32 to vector<16x64xf32>
      %16 = arith.cmpf ogt, %14, %15 : vector<16x64xf32>
      %cst_7 = arith.constant 0.000000e+00 : f32
      %17 = vector.broadcast %cst_7 : f32 to vector<16x64xf32>
      %18 = arith.select %16, %14, %17 : vector<16x64xi1>, vector<16x64xf32>
      %c0_8 = arith.constant 0 : index
      %c0_9 = arith.constant 0 : index
      %19 = vector.load %arg12[%c0_8, %c0_9] : memref<16x64xf32, #tpu.memory_space<vmem>>, vector<16x64xf32>
      %20 = vector.broadcast %13 : f32 to vector<16x64xf32>
      %21 = arith.mulf %19, %20 : vector<16x64xf32>
      %22 = tpu.concatenate %21, %18 in 1 : vector<16x64xf32>, vector<16x64xf32> -> vector<16x128xf32>
      %c0_10 = arith.constant 0 : index
      %c0_11 = arith.constant 0 : index
      %23 = vector.load %arg8[%c0_10, %c0_11] : memref<16x128xf32, #tpu.memory_space<vmem>>, vector<16x128xf32>
      tpu.vector_store %arg8[%c0_10, %c0_11], %22 {strides = array<i32>} : memref<16x128xf32, #tpu.memory_space<vmem>>, vector<16x128xf32>,
    } else {
    }
    return
  }
  func.func @transform_0(%arg0: i32, %arg1: i32, %arg2: memref<1xi32, #tpu.memory_space<smem>>) -> (i32, i32, i32) {
    %c0_i32 = arith.constant 0 : i32
    %c0_i32_0 = arith.constant 0 : i32
    return %arg1, %arg0, %c0_i32 : i32, i32, i32
  }
  func.func @transform_1(%arg0: i32, %arg1: i32, %arg2: memref<1xi32, #tpu.memory_space<smem>>) -> (i32, i32) {
    %c0_i32 = arith.constant 0 : i32
    %c0_i32_0 = arith.constant 0 : i32
    return %arg0, %c0_i32 : i32, i32
  }
  func.func @transform_2(%arg0: i32, %arg1: i32, %arg2: memref<1xi32, #tpu.memory_space<smem>>) -> (i32, i32) {
    %c0_i32 = arith.constant 0 : i32
    %c0_i32_0 = arith.constant 0 : i32
    %c0_i32_1 = arith.constant 0 : i32
    return %c0_i32, %c0_i32_0 : i32, i32
  }
  func.func @transform_3(%arg0: i32, %arg1: i32, %arg2: memref<1xi32, #tpu.memory_space<smem>>) -> (i32, i32) {
    %c0_i32 = arith.constant 0 : i32
    %c0_i32_0 = arith.constant 0 : i32
    %c0_i32_1 = arith.constant 0 : i32
    return %c0_i32, %c0_i32_0 : i32, i32
  }
  func.func @transform_4(%arg0: i32, %arg1: i32, %arg2: memref<1xi32, #tpu.memory_space<smem>>) -> (i32, i32) {
    %c0_i32 = arith.constant 0 : i32
    %c0_i32_0 = arith.constant 0 : i32
    %c0_i32_1 = arith.constant 0 : i32
    return %c0_i32, %c0_i32_0 : i32, i32
  }
  func.func @transform_5(%arg0: i32, %arg1: i32, %arg2: memref<1xi32, #tpu.memory_space<smem>>) -> (i32, i32) {
    %c0_i32 = arith.constant 0 : i32
    %c0_i32_0 = arith.constant 0 : i32
    return %arg0, %c0_i32 : i32, i32
  }
}

</mosaic_0001>

<bundles_post_ra>
// kernel: tpu_custom_call.1
= control target key start
LH: loop header
LB: loop body
LE: loop exit
PB: predicated region body
PF: predicated region fallthrough
CT: control target
= control target key end

     0   :  { %s3589_s0 = inlined_call_operand.<no memory space> [shape: s32[1], index: 0, kind: input, shape index: {}]   ;;  %s3590_s1 = inlined_call_operand.hbm [shape: bf16[16,32,32], index: 1, kind: input, shape index: {}]   ;;  %s3591_s2 = inlined_call_operand.vmem [shape: s32[32,1], index: 2, kind: input, shape index: {}]   ;;  %s3592_s3 = inlined_call_operand.vmem [shape: bf16[32,256], index: 3, kind: input, shape index: {}]   ;;  %s3593_s4 = inlined_call_operand.hbm [shape: bf16[64,256], index: 4, kind: input, shape index: {}]   ;;  %s3594_s5 = inlined_call_operand.vmem [shape: f32[1,256], index: 5, kind: input, shape index: {}]   ;;  %s3595_s6 = inlined_call_operand.hbm [shape: f32[32,128], index: 6, kind: output, shape index: {}]  }
   0x1   :  { %3608 = sst [smem:[#allocation29_spill]] %s3593_s4 }
   0x2   :  { %11 = sst [smem:[#allocation8]] %s3589_s0 }
   0x3   :  { %12 = vsyncpa [#allocation10], 0 }
   0x4   :  { %14 = vsyncpa [#allocation10 + $0x1], 0 }
   0x5   :  { %15 = vsyncpa [#allocation13], 0 }
   0x6   :  { %16 = vsyncpa [#allocation11], 0 }
   0x7   :  { %18 = vsyncpa [#allocation11 + $0x1], 0  ;;  %s2733_s23 = smov 0   ;;  %s2735_s24 = smov 0  }
   0x8   :  { %s2737_s25 = smov 0   ;;  %s2739_s26 = smov 0  }
   0x9   :  { %s2741_s27 = smov 0   ;;  %s2743_s28 = smov 0  }
   0xa   :  { %s2745_s29 = smov 0   ;;  %s2747_s0 = smov 0  }
   0xb   :  { %s2749_s30 = smov 0   ;;  %s2751_s7 = smov 0  }
   0xc   :  { %s2753_s8 = smov 0  }
   0xd LB: > { %3609 = sst [smem:[#allocation21_spill]] %s2644_s25  ;;  %s2001_s9 = sadd.s32 4294967295, %s2676_s8   ;;  %s2676_s8 = sphi %s2753_s8, %s24_s8   ;;  %s2672_s7 = sphi %s2751_s7, %s3645_s7   ;;  %s2668_s30 = sphi %s2749_s30, %s3644_s30   ;;  %s2664_s0 = sphi %s2747_s0, %s3643_s0   ;;  %s2660_s29 = sphi %s2745_s29, %s3642_s29   ;;  %s2656_s28 = sphi %s2743_s28, %s3650_s28   ;;  %s2652_s27 = sphi %s2741_s27, %s3649_s27   ;;  %s2648_s26 = sphi %s2739_s26, %s3648_s26   ;;  %s2644_s25 = sphi %s2737_s25, %s3640_s25   ;;  %s2640_s24 = sphi %s2735_s24, %s3647_s24   ;;  %s2636_s23 = sphi %s2733_s23, %s3646_s23  }
   0xe   : > { %3610 = sst [smem:[#allocation22_spill]] %s2668_s30  ;;  %s2002_s10 = sadd.s32 4294967294, %s2676_s8  }
   0xf   : > { %3611 = sst [smem:[#allocation23_spill]] %s2672_s7  ;;  %s33_s11 = sadd.s32 1, %s2668_s30 }
  0x10   : > { %s36_s12 = sadd.s32 1, %s2672_s7  ;;  %p34_p0 = scmp.ge.s32.totalorder %s33_s11, 2 }
  0x11   : > { %s45_s13 = sadd.s32 1, %s2656_s28  ;;  %p52_p1 = scmp.ne.s32.totalorder %s2656_s28, %s2652_s27 }
  0x12   : > { %p53_p2 = scmp.eq.s32.totalorder %s2676_s8, 0  ;;  %s3652_s11 = smov (%p34_p0, %s33_s11), 0 }
  0x13   : > { %3612 = sst [smem:[#allocation24_spill]] %s3652_s11  ;;  %s3654_s12 = smov (!%p34_p0, %s36_s12), %s2672_s7 }
  0x14   : > { %s40_s14 = ssub.s32 %s2668_s30, %s3652_s11  ;;  %p2799_p3 = por %p53_p2, %p52_p1 }
  0x15   : > { %p38_p4 = scmp.ge.s32.totalorder %s3654_s12, 2  ;;  %p58_p5 = scmp.ne.s32.totalorder %s2652_s27, %s2648_s26 }
  0x16   : > { %s3613_s15 = scalar_select %p2799_p3, 1, 0 }
  0x17   : > { %p2804_p6 = scmp.eq.s32.totalorder %s2001_s9, 0  ;;  %s160_s17 = sadd.s32 1, %s2644_s25 }
  0x18   : > { %s3656_s12 = smov (%p38_p4, %s3654_s12), 0  ;;  %p170_p8 = scmp.ne.s32.totalorder %s2644_s25, %s2640_s24 }
  0x19   : > { %s3614_s16 = scalar_select %p2804_p6, 1, 0 }
  0x1a   : > { %3615 = sst [smem:[#allocation25_spill]] %s3656_s12  ;;  %p2813_p7 = por %p2804_p6, %p58_p5 }
  0x1b   : > { %s41_s19 = ssub.s32 %s2672_s7, %s3656_s12  ;;  %p171_p9 = scmp.eq.s32.totalorder %s2001_s9, 3 }
  0x1c   : > { %s3616_s18 = scalar_select %p2813_p7, 1, 0 }
  0x1d   : > { %s42_s20 = sor.u32 %s41_s19, %s40_s14  ;;  %p158_p10 = scmp.eq.s32.totalorder %s41_s19, 0 }
  0x1e   : > { %p43_p11 = scmp.eq.s32.totalorder %s42_s20, 0  ;;  %p2821_p12 = por %p171_p9, %p170_p8 }
  0x1f   : > { %s2826_s22 = scalar_select %p158_p10, %s2644_s25, %s160_s17  }
  0x20   : > { %s3617_s21 = scalar_select %p2821_p12, 1, 0 }
  0x21   : > { %3618 = sst [smem:[#allocation26_spill]] %s2826_s22  ;;  %p176_p13 = scmp.ne.s32.totalorder %s2640_s24, %s2636_s23 }
  0x22   : > { %s2829_s26 = scalar_select %p43_p11, %s2656_s28, %s45_s13  }
  0x23   : > { %p177_p0 = scmp.eq.s32.totalorder %s2002_s10, 3  ;;  %p2003_p1 = scmp.ge.s32.totalorder %s2676_s8, 1 }
  0x24   : > { %3619 = sst [smem:[#allocation27_spill]] %s2829_s26  ;;  %p184_p2 = scmp.lt.s32.totalorder %s2676_s8, 5 }
  0x25   : > { %p2835_p4 = por %p177_p0, %p176_p13  ;;  %s2678_s14 = smov [#allocation12]  }
  0x26   : > { %p2839_p5 = pnand %p2003_p1, %p184_p2  ;;  %s199_s19 = sshll.u32 %s2678_s14, 4  ;;  %s200_s19 = int_to_ptr.vmem [resolvable:$true] %s199_s19 }
  0x27   : > { %s3620_s11 = scalar_select %p2835_p4, 1, 0 }
  0x28   : > { %s3622_s9 = scalar_select %p2839_p5, 1, 0 }
  0x29   : > { %3621 = sst [smem:[#allocation28_spill]] %s3620_s11  ;;  %p2179_p8 = pneg %p2839_p5 }
  0x2a   : > { %s3624_s4 = sld [smem:[#allocation29_spill]] }
  0x2b   : > { %p2847_p9 = pnand %p2179_p8, %p2804_p6 }
  0x2d   : > { %p2524_p11 = pneg %p2847_p9 }
  0x30   : > { %s2522_s20 = scalar_lea.hbm %s3624_s4, 1024 }
  0x31   : > { %p2523_p10 = scmp.ne.s32.totalorder %s3624_s4, %s2522_s20  ;;  %p2529_p1 = scmp.lt.u32.totalorder %s2522_s20, %s3624_s4 }
  0x33   : > { %p2525_p13 = pnand %p2524_p11, %p2523_p10 }
  0x35   : > { %p2526_p0 = pneg %p2525_p13 }
  0x37   : > { %p2531_p2 = pnand %p2529_p1, %p2526_p0 }
  0x39   : > { %2534 = shalt.err (!%p2531_p2)
}
  0x3a   : > { %s2535_s25 = scalar_lea.vmem %s200_s19, 1024  ;;  %p2543_p6 = scmp.lt.s32.totalorder %s200_s19, %s200_s19 }
  0x3b   : > { %p2536_p8 = scmp.ne.s32.totalorder %s200_s19, %s2535_s25  ;;  %p2544_p7 = scmp.lt.s32.totalorder %s2535_s25, %s2535_s25 }
  0x3d   : > { %p2538_p4 = pnand %p2536_p8, %p2524_p11  ;;  %p2545_p5 = por %p2544_p7, %p2543_p6 }
  0x3f   : > { %p2539_p12 = pneg %p2538_p4 }
  0x41   : > { %p2546_p3 = pnand %p2545_p5, %p2539_p12 }
  0x43   : > { %2549 = shalt.err (!%p2546_p3)
}
  0x44   : > { %s2679_s12 = smov 128   ;;  %s2680_s26 = smov 8  }
  0x45   : > { %2182 = dma.hbm_to_vmem [thread:$0]  (!%p2847_p9), %s3624_s4, 1024, %s200_s19, [#allocation13], %s2679_s12, %s2679_s12, %s2680_s26  }
  0x46   : > { %p2005_p10 = scmp.ge.s32.totalorder %s2676_s8, 4 }
  0x48   : > { %212 = sbr.rel (%p2005_p10) target bundleno = 96 (0x60), region = 28 }
  0x4f   : > { %s216_s25 = sand.u32 1, %s2656_s28   ;;  %s2008_s22 = sshll.u32 %s2672_s7, 1 }
  0x50   : > { %s2006_s20 = sshll.u32 %s216_s25, 6  ;;  %s2096_s14 = sshll.u32 %s2668_s30, 5 }
  0x51   : > { %s227_s13 = sadd.s32 %s2096_s14, %s2008_s22  ;;  %s220_s11 = scalar_lea.vmem [#allocation9], %s2006_s20 }
  0x52   : > { %s242_s10 = sshll.u32 %s220_s11, 4  ;;  %s2010_s19 = sshll.u32 %s227_s13, 6  ;;  %s243_s10 = int_to_ptr.vmem [resolvable:$true] %s242_s10 }
  0x53   : > { %p3625_p3 = scmp.ne.s32.totalorder %s3613_s15, 0  ;;  %s2681_s26 = smov 256  }
  0x54   : > { %s2682_s4 = smov 128   ;;  %s2683_s7 = smov 2  }
  0x55   : > { %s2166_s12 = scalar_select %p3625_p3, [#allocation0], [#allocation17] }
  0x56   : > { %2167 = sst [smem:[#allocation16]] (%p3625_p3), %s2681_s26  ;;  %s2684_s22 = smov 64  }
  0x57   : > { %s234_s17 = sld [smem:[%s2166_s12]]   ;;  %s229_s14 = scalar_lea.hbm %s3590_s1, %s2010_s19 }
  0x58   : > { %2168 = sst [smem:[#allocation16 + $0x1]] (%p3625_p3), %s2682_s4  ;;  %s2685_s13 = smov 4  }
  0x59   : > { %2169 = sst [smem:[#allocation16 + $0x2]] (%p3625_p3), %s2683_s7  ;;  %s217_s30 = scalar_lea.sflag [#allocation10], %s216_s25 }
  0x5a   : > { %2170 = sst [smem:[#allocation16 + $0x3]] (%p3625_p3), %s2684_s22  ;;  %s2686_s4 = smov [#allocation15]  }
  0x5b   : > { %2171 = sst [smem:[#allocation16 + $0x4]] (%p3625_p3), %s2684_s22 }
  0x5c   : > { %2172 = sst [smem:[#allocation16 + $0x5]] (%p3625_p3), %s2685_s13 }
  0x5d   : > { %s2011_s12 = sshll.u32 %s234_s17, 26 }
  0x5e   : > { %s2012_s26 = sadd.s32 134217728, %s2011_s12 }
  0x5f   : > { %2173 = dma.general (%p3625_p3), %s229_s14, 1024, %s243_s10, %s217_s30, %s2686_s4, [#allocation16], %s2012_s26, 0  }
  0x60 PF: > { %p3626_p6 = scmp.ne.s32.totalorder %s3622_s9, 0 }
  0x61   : > { %s278_s7 = sand.u32 (!%p3626_p6), 1, %s2652_s27   ;;  %p3627_p7 = scmp.ne.s32.totalorder (!%p3626_p6), %s3616_s18, 0 }
  0x62   : > { %276 = sbr.rel (%p3626_p6) target bundleno = 5091 (0x13e3), region = 40  ;;  %s2014_s11 = sshll.u32 (!%p3626_p6), %s278_s7, 6 }
  0x63   : > { %s279_s19 = scalar_lea.sflag (!%p3626_p6), [#allocation10], %s278_s7  ;;  %s2893_s20 = scalar_lea.vmem (!%p3626_p6), [#allocation9], %s2014_s11 }
  0x69   : > { %2623 = dma.done.wait (%p3627_p7), %s279_s19, 1024  }
  0x6a   : > { %2625 = vsyncadd (%p3627_p7), %s279_s19, 4294966272  ;;  %p3628_p12 = scmp.ne.s32.totalorder %s3614_s16, 0 }
  0x6c   : > { %2627 = dma.done.wait (%p3628_p12), [#allocation13], 1024  }
  0x6d   : > { %2629 = vsyncadd (%p3628_p12), [#allocation13], 4294966272  ;;  %s315_s30 = sand.u32 1, %s2640_s24   ;;  %s2017_s15 = sshll.u32 %s2664_s0, 1 }
  0x6e   : > { %s2905_s9 = sld [smem:[#allocation8]]  ;;  %s2016_s25 = sshll.u32 %s315_s30, 4 }
  0x6f   : > { %p321_p4 = scmp.lt.s32.totalorder %s2017_s15, 3  ;;  %s2910_s10 = sshll.u32 %s2660_s29, 3 }
  0x70   : > { %s2917_s14 = scalar_lea.vmem [#allocation14], %s2016_s25  ;;  %p2020_p5 = scmp.ne.s32.totalorder %s2660_s29, 0 }
  0x71   : > { %s3658_s15 = smov (!%p321_p4, %s2017_s15), 3  ;;  %vm334_vm0 = vcmask (!%p2020_p5), 523264   ;;  %v2687_v0 = vmov (!%p2020_p5), 0.0   ;;  %v2688_v1 = vmov (!%p2020_p5), -inf  }
  0x72   : > { %s2018_s18 = sshll.u32 %s3658_s15, 3  ;;  %333 = sbr.rel (%p2020_p5) target bundleno = 121 (0x79), region = 52  ;;  %335 = vst.msk [vmem:[#allocation3] sm:$0xff] (!%p2020_p5), %vm334_vm0, %v2687_v0  ;;  %336 = vst.msk [vmem:[#allocation3 + $0x8] sm:$0xff] (!%p2020_p5), %vm334_vm0, %v2687_v0 }
  0x73   : > { %s2915_s16 = scalar_lea.vmem %s3591_s2, %s2018_s18  ;;  %337 = vst.msk [vmem:[#allocation4] sm:$0xff] (!%p2020_p5), %vm334_vm0, %v2687_v0  ;;  %338 = vst.msk [vmem:[#allocation4 + $0x8] sm:$0xff] (!%p2020_p5), %vm334_vm0, %v2687_v0 }
  0x74   : > { %339 = vst.msk [vmem:[#allocation5] sm:$0xff] (!%p2020_p5), %vm334_vm0, %v2687_v0  ;;  %340 = vst.msk [vmem:[#allocation5 + $0x8] sm:$0xff] (!%p2020_p5), %vm334_vm0, %v2687_v0 }
  0x75   : > { %341 = vst.msk [vmem:[#allocation6] sm:$0xff] (!%p2020_p5), %vm334_vm0, %v2688_v1  ;;  %342 = vst.msk [vmem:[#allocation6 + $0x8] sm:$0xff] (!%p2020_p5), %vm334_vm0, %v2688_v1 }
  0x79 PF: > { %p2021_p9 = scmp.ge.s32.totalorder %s2910_s10, %s2905_s9 }
  0x7a   : > { %v2296_v2 = vld [vmem:[%s3592_s3 + $0x4] ss:$8 sps:$4 sm:$0xff] (!%p2021_p9)   ;;  %v2298_v3 = vld [vmem:[%s3592_s3] ss:$8 sps:$4 sm:$0xff] (!%p2021_p9)   ;;  %v2689_v4 = vmov (!%p2021_p9), 0   ;;  %vm439_vm1 = vcmask (!%p2021_p9), 261120   ;;  %v369_v48 = vlaneseq (!%p2021_p9) }
  0x7b   : > { %346 = sbr.rel (%p2021_p9) target bundleno = 4937 (0x1349), region = 56  ;;  %496 = vmatprep.mubr.bf16.mxu1 (!%p2021_p9), %v2689_v4  ;;  %1001 = vmatprep.mubr.bf16.mxu0 (!%p2021_p9), %v2689_v4  ;;  %v2299_v5 = vld [vmem:[%s3592_s3 + $0x14] ss:$8 sps:$4 sm:$0xff] (!%p2021_p9)   ;;  %v2301_v6 = vld [vmem:[%s3592_s3 + $0x10] ss:$8 sps:$4 sm:$0xff] (!%p2021_p9)   ;;  %v2302_v9 = vld [vmem:[%s2893_s20] sm:$0xff] (!%p2021_p9)  }
  0x7c   : > { %464 = vmatprep.subr.bf16.mxu1 (!%p2021_p9), %v2296_v2  ;;  %2294 = vset.pattern.permute.xlu0 (!%p2021_p9), %v2689_v4  ;;  %v2938_v7 = vld [vmem:[#allocation12 + $0x4] ss:$8 sps:$4 sm:$0xff] (!%p2021_p9)   ;;  %v2940_v8 = vld [vmem:[#allocation12] ss:$8 sps:$4 sm:$0xff] (!%p2021_p9)   ;;  %v2944_v10 = vld [vmem:[#allocation12 + $0x14] ss:$8 sps:$4 sm:$0xff] (!%p2021_p9)  }
  0x7d   : > { %465 = vmatpush1.bf16.msra.mxu1 (!%p2021_p9), %v2298_v3  ;;  %2295 = vset.pattern.permute.xlu1 (!%p2021_p9), %v2689_v4  ;;  %v2950_v11 = vld [vmem:[#allocation12 + $0x10] ss:$8 sps:$4 sm:$0xff] (!%p2021_p9)   ;;  %v2954_v12 = vld [vmem:[#allocation12 + $0x24] ss:$8 sps:$4 sm:$0xff] (!%p2021_p9)   ;;  %v2960_v14 = vld [vmem:[#allocation12 + $0x20] ss:$8 sps:$4 sm:$0xff] (!%p2021_p9)  }
  0x7e   : > { %466 = vmatprep.subr.bf16.mxu1 (!%p2021_p9), %v2299_v5  ;;  %969 = vmatprep.subr.bf16.mxu0 (!%p2021_p9), %v2938_v7  ;;  %v2306_v13 = vld [vmem:[%s2893_s20 + $0x8] sm:$0xff] (!%p2021_p9)   ;;  %v2963_v15 = vld [vmem:[#allocation12 + $0x34] ss:$8 sps:$4 sm:$0xff] (!%p2021_p9)   ;;  %s2690_s25 = smov (!%p2021_p9), 64   ;;  %v2970_v17 = vld [vmem:[#allocation12 + $0x30] ss:$8 sps:$4 sm:$0xff] (!%p2021_p9)  }
  0x7f   : > { %970 = vmatpush1.bf16.msra.mxu0 (!%p2021_p9), %v2940_v8  ;;  %v621_v16 = vld [vmem:[#allocation4] sm:$0xff] (!%p2021_p9)  ;;  %v622_v18 = vld [vmem:[#allocation4 + $0x8] sm:$0xff] (!%p2021_p9)  ;;  %v2312_v21 = vld [vmem:[%s2893_s20 + $0x20] sm:$0xff] (!%p2021_p9)   ;;  %vm675_vm2 = vcmask (!%p2021_p9), 523264   ;;  %v370_v49 = vshrl.u32 (!%p2021_p9), %v369_v48, 7  ;;  %s813_s17 = sadd.s32 (!%p2021_p9), 1, %s2910_s10 }
  0x80   : > { %971 = vmatprep.subr.bf16.mxu0 (!%p2021_p9), %v2944_v10  ;;  %754 = vrot.lane.b32.xlu1 (!%p2021_p9), %v621_v16, %s2690_s25  ;;  %v2307_v19 = vld [vmem:[%s2893_s20 + $0x10] sm:$0xff] (!%p2021_p9)   ;;  %v2311_v20 = vld [vmem:[%s2893_s20 + $0x18] sm:$0xff] (!%p2021_p9)   ;;  %v2316_v22 = vld [vmem:[%s2893_s20 + $0x28] sm:$0xff] (!%p2021_p9)   ;;  %s957_s22 = sadd.s32 (!%p2021_p9), 2, %s2910_s10  ;;  %s1101_s13 = sadd.s32 (!%p2021_p9), 3, %s2910_s10 }
  0x81   : > { %467 = vmatpush1.bf16.msra.mxu1 (!%p2021_p9), %v2301_v6  ;;  %v2317_v23 = vld [vmem:[%s2893_s20 + $0x30] sm:$0xff] (!%p2021_p9)   ;;  %v2321_v24 = vld [vmem:[%s2893_s20 + $0x38] sm:$0xff] (!%p2021_p9)   ;;  %v619_v25 = vld [vmem:[#allocation3] sm:$0xff] (!%p2021_p9)  ;;  %v375_v54 = vsub.s32 (!%p2021_p9), 1, %v370_v49  ;;  %v371_v1 = vsub.s32 (!%p2021_p9), 0, %v370_v49  ;;  %s1389_s12 = sadd.s32 (!%p2021_p9), 5, %s2910_s10  ;;  %p3372_p11 = scmp.lt.s32.totalorder (!%p2021_p9), %s813_s17, %s2905_s9 }
  0x82   : > { %679 = vmatprep.subr.bf16.mxu1 %v2938_v7  ;;  %v620_v26 = vld [vmem:[#allocation3 + $0x8] sm:$0xff]  ;;  %v367_v55 = vld [vmem:[%s3594_s5] sm:$0x3]  ;;  %s1533_s26 = sadd.s32 6, %s2910_s10  ;;  %s1677_s4 = sadd.s32 7, %s2910_s10 }
  0x83   : > { %972 = vmatpush1.bf16.msra.mxu0 %v2950_v11  ;;  %v634_v27 = vpack.c.bf16 %v620_v26, %v619_v25  ;;  %v3058_v56 = vrot.slane %v367_v55, %v375_v54  ;;  %v3064_v2 = vrot.slane %v367_v55, %v371_v1  ;;  %p3379_p13 = scmp.lt.s32.totalorder %s957_s22, %s2905_s9  ;;  %p3390_p0 = scmp.lt.s32.totalorder %s1101_s13, %s2905_s9 }
  0x84   : > { %2034 = vmatmul.mubr.msk.bf16.vlgmr.msra.gmra.mrb[0].mxu1 %vm439_vm1, %v2302_v9  ;;  %973 = vmatprep.subr.bf16.mxu0 %v2954_v12  ;;  %s950_s19 = scalar_select %p3372_p11, 1, 0 }
  0x85   : > { %680 = vmatpush1.bf16.msra.mxu1 %v2940_v8  ;;  %506 = vmatprep.mubr.bf16.mxu1 %v2689_v4  ;;  %s1094_s20 = scalar_select %p3379_p13, 1, 0 }
  0x86   : > { %681 = vmatprep.subr.bf16.mxu1 %v2944_v10  ;;  %756 = vrot.lane.b32.xlu1 %v622_v18, %s2690_s25  ;;  %p3406_p2 = scmp.lt.s32.totalorder %s1389_s12, %s2905_s9  ;;  %p3419_p8 = scmp.lt.s32.totalorder %s1533_s26, %s2905_s9 }
  0x87   : > { %974 = vmatpush1.bf16.msra.mxu0 %v2960_v14  ;;  %p3428_p10 = scmp.lt.s32.totalorder %s1677_s4, %s2905_s9 }
  0x88   : > { %975 = vmatprep.subr.bf16.mxu0 %v2963_v15 }
  0x89   : > { %682 = vmatpush1.bf16.msra.mxu1 %v2950_v11 }
  0x8a   : > { %683 = vmatprep.subr.bf16.mxu1 %v2954_v12 }
  0x8b   : > { %976 = vmatpush1.bf16.msra.mxu0 %v2970_v17 }
  0x8c   : > { %2035 = vmatmul.mubr.msk.bf16.gmra.mrb[4].mxu1 %vm439_vm1, %v2306_v13  ;;  %1113 = vmatprep.subr.bf16.mxu0 %v2938_v7 }
  0x8d   : > { %516 = vmatprep.mubr.bf16.mxu1 %v2689_v4  ;;  %684 = vmatpush1.bf16.msra.mxu1 %v2960_v14 }
  0x8e   : > { %685 = vmatprep.subr.bf16.mxu1 %v2963_v15 }
  0x91   : > { %686 = vmatpush1.bf16.msra.mxu1 %v2970_v17 }
  0x92   : > { %825 = vmatprep.subr.bf16.mxu1 %v2938_v7 }
  0x94   : > { %2036 = vmatmul.mubr.msk.bf16.gmra.mrb[8].mxu1 %vm439_vm1, %v2307_v19 }
  0x95   : > { %526 = vmatprep.mubr.bf16.mxu1 %v2689_v4 }
  0x9c   : > { %2037 = vmatmul.mubr.msk.bf16.gmra.mrb[12].mxu1 %vm439_vm1, %v2311_v20 }
  0x9d   : > { %536 = vmatprep.mubr.bf16.mxu1 %v2689_v4 }
  0xa4   : > { %2038 = vmatmul.mubr.msk.bf16.gmra.mrb[16].mxu1 %vm439_vm1, %v2312_v21 }
  0xa5   : > { %546 = vmatprep.mubr.bf16.mxu1 %v2689_v4 }
  0xac   : > { %2039 = vmatmul.mubr.msk.bf16.gmra.mrb[20].mxu1 %vm439_vm1, %v2316_v22 }
  0xad   : > { %556 = vmatprep.mubr.bf16.mxu1 %v2689_v4 }
  0xb4   : > { %2040 = vmatmul.mubr.msk.bf16.gmra.mrb[24].mxu1 %vm439_vm1, %v2317_v23 }
  0xb5   : > { %566 = vmatprep.mubr.bf16.mxu1 %v2689_v4 }
  0xbc   : > { %2041 = vmatmul.mubr.msk.bf16.gmra.mrb[28].mxu1 %vm439_vm1, %v2321_v24 }
  0xbd   : > { %711 = vmatprep.mubr.bf16.mxu1 %v2689_v4 }
  0xc4   : > { %2050 = vmatmul.mubr.msk.bf16.vlgmr.msra.gmra.mrb[0].mxu1 %vm675_vm2, %v634_v27 }
  0xc5   : > { %826 = vmatpush1.bf16.msra.mxu1 %v2940_v8  ;;  %857 = vmatprep.mubr.bf16.mxu1 %v2689_v4 }
  0xc6   : > { %827 = vmatprep.subr.bf16.mxu1 %v2944_v10 }
  0xc9   : > { %828 = vmatpush1.bf16.msra.mxu1 %v2950_v11 }
  0xca   : > { %829 = vmatprep.subr.bf16.mxu1 %v2954_v12 }
  0xcd   : > { %830 = vmatpush1.bf16.msra.mxu1 %v2960_v14 }
  0xce   : > { %831 = vmatprep.subr.bf16.mxu1 %v2963_v15 }
  0xd1   : > { %832 = vmatpush1.bf16.msra.mxu1 %v2970_v17 }
  0xf2   : > { %v755_v26 = vpop.permute.xlu1 %754 }
  0xf8   : > { %v757_v49 = vpop.permute.xlu1 %756 }
 0x167   : > { %v3007_v28 = vpop.f32.mrb[8].mxu1 }
 0x168   : > { %v3009_v29 = vpop.f32.mrb[9].mxu1 }
 0x169   : > { %v3011_v30 = vpop.f32.mrb[10].mxu1 }
 0x16a   : > { %v3013_v31 = vpop.f32.mrb[11].mxu1 }
 0x16f   : > { %v3015_v32 = vpop.f32.mrb[12].mxu1 }
 0x170   : > { %v3017_v33 = vpop.f32.mrb[13].mxu1 }
 0x171   : > { %v3019_v34 = vpop.f32.mrb[14].mxu1 }
 0x172   : > { %v3021_v35 = vpop.f32.mrb[15].mxu1 }
 0x177   : > { %v3023_v36 = vpop.f32.mrb[16].mxu1 }
 0x178   : > { %v3025_v37 = vpop.f32.mrb[17].mxu1 }
 0x179   : > { %v3027_v38 = vpop.f32.mrb[18].mxu1 }
 0x17a   : > { %v3029_v39 = vpop.f32.mrb[19].mxu1 }
 0x17f   : > { %v3031_v40 = vpop.f32.mrb[20].mxu1 }
 0x180   : > { %v3033_v41 = vpop.f32.mrb[21].mxu1 }
 0x181   : > { %v3035_v42 = vpop.f32.mrb[22].mxu1 }
 0x182   : > { %v3037_v43 = vpop.f32.mrb[23].mxu1 }
 0x187   : > { %v3039_v44 = vpop.f32.mrb[24].mxu1 }
 0x188   : > { %v3041_v45 = vpop.f32.mrb[25].mxu1 }
 0x189   : > { %v3043_v46 = vpop.f32.mrb[26].mxu1 }
 0x18a   : > { %v3045_v47 = vpop.f32.mrb[27].mxu1 }
 0x18f   : > { %v3047_v50 = vpop.f32.mrb[28].mxu1 }
 0x190   : > { %v3049_v51 = vpop.f32.mrb[29].mxu1 }
 0x191   : > { %v3051_v52 = vpop.f32.mrb[30].mxu1 }
 0x192   : > { %v3053_v53 = vpop.f32.mrb[31].mxu1 }
 0x197   : > { %v713_v57 = vpop.f32.mrb[0].mxu1 }
 0x198   : > { %v715_v58 = vpop.f32.mrb[1].mxu1  ;;  %v2098_v3 = vadd.f32 %v713_v57, %v3064_v2 }
 0x199   : > { %v2099_v59 = vadd.f32 %v715_v58, %v3058_v56  ;;  %v717_v60 = vpop.f32.mrb[2].mxu1 }
 0x19a   : > { %v719_v61 = vpop.f32.mrb[3].mxu1  ;;  %v2051_v5 = vmul.f32 -1.442695, %v2098_v3  ;;  %v2100_v6 = vadd.f32 %v717_v60, %v3064_v2 }
 0x19b   : > { %2322 = vtanh.f32 %v2099_v59  ;;  %v2101_v62 = vadd.f32 %v719_v61, %v3058_v56 }
 0x19c   : > { %v2053_v9 = vmul.f32 -1.442695, %v2100_v6 }
 0x19d   : > { %2324 = vtanh.f32 %v2101_v62 }
 0x19e   : > { %2326 = vpow2.f32 %v2051_v5 }
 0x19f   : > { %2328 = vpow2.f32 %v2053_v9 }
 0x1a5   : > { %v2323_v63 = vpop.eup %2322 }
 0x1a6   : > { %764 = vrot.lane.b32.xlu0 %v2323_v63, %s2690_s25  ;;  %v2052_v63 = vmul.f32 -1.442695, %v2099_v59 }
 0x1a7   : > { %v2325_v0 = vpop.eup %2324 }
 0x1a8   : > { %v2327_v13 = vpop.eup %2326 }
 0x1a9   : > { %v738_v16 = vadd.f32 1.0, %v2327_v13  ;;  %v2329_v18 = vpop.eup %2328 }
 0x1aa   : > { %766 = vrot.lane.b32.xlu0 %v2325_v0, %s2690_s25  ;;  %v740_v19 = vadd.f32 1.0, %v2329_v18  ;;  %v2054_v0 = vmul.f32 -1.442695, %v2101_v62 }
 0x1ab   : > { %2330 = vrcp.f32 %v738_v16 }
 0x1ac   : > { %2332 = vrcp.f32 %v740_v19 }
 0x1b5   : > { %v2331_v20 = vpop.eup %2330 }
 0x1b6   : > { %v2333_v23 = vpop.eup %2332  ;;  %v760_v27 = vmul.f32 %v2331_v20, %v755_v26 }
 0x1b7   : > { %v761_v55 = vmul.f32 %v2333_v23, %v757_v49 }
 0x218   : > { %v765_v21 = vpop.permute.xlu0 %764 }
 0x219   : > { %v770_v22 = vmul.f32 %v2331_v20, %v765_v21 }
 0x21b   : > { %774 = vrot.lane.b32.xlu0 %v770_v22, %s2690_s25 }
 0x21c   : > { %v767_v24 = vpop.permute.xlu0 %766 }
 0x21d   : > { %v771_v25 = vmul.f32 %v2333_v23, %v767_v24 }
 0x21f   : > { %776 = vrot.lane.b32.xlu1 %v771_v25, %s2690_s25 }
 0x28d   : > { %v775_v48 = vpop.permute.xlu0 %774 }
 0x28e   : > { %v780_v54 = vadd.f32 %v775_v48, %v760_v27 }
 0x290   : > { %2334 = vtanh.f32 %v780_v54 }
 0x291   : > { %v777_v57 = vpop.permute.xlu1 %776 }
 0x292   : > { %v781_v58 = vadd.f32 %v777_v57, %v761_v55 }
 0x294   : > { %2336 = vtanh.f32 %v781_v58 }
 0x295   : > { %2338 = vpow2.f32 %v2052_v63 }
 0x296   : > { %2340 = vpow2.f32 %v2054_v0 }
 0x29a   : > { %v2335_v60 = vpop.eup %2334 }
 0x29b   : > { %786 = vrot.lane.b32.xlu0 %v2335_v60, %s2690_s25 }
 0x29e   : > { %v2337_v61 = vpop.eup %2336 }
 0x29f   : > { %788 = vrot.lane.b32.xlu1 %v2337_v61, %s2690_s25  ;;  %v2339_v1 = vpop.eup %2338 }
 0x2a0   : > { %v2341_v3 = vpop.eup %2340  ;;  %v739_v5 = vadd.f32 1.0, %v2339_v1 }
 0x2a1   : > { %v741_v6 = vadd.f32 1.0, %v2341_v3 }
 0x2a2   : > { %2342 = vrcp.f32 %v739_v5 }
 0x2a3   : > { %2344 = vrcp.f32 %v741_v6 }
 0x2ac   : > { %v2343_v13 = vpop.eup %2342 }
 0x2ad   : > { %v2345_v16 = vpop.eup %2344 }
 0x30d   : > { %v787_v9 = vpop.permute.xlu0 %786 }
 0x30e   : > { %v3072_v19 = vmul.f32 %v2343_v13, %v787_v9 }
 0x311   : > { %v789_v18 = vpop.permute.xlu1 %788 }
 0x312   : > { %v3074_v20 = vmul.f32 %v2345_v16, %v789_v18 }
 0x314   : > { %v821_v59 = vpack.c.bf16 %v3074_v20, %v3072_v19 }
 0x316   : > { %2055 = vmatmul.mubr.msk.bf16.vlgmr.msra.gmra.mrb[4].mxu1 %vm675_vm2, %v821_v59 }
 0x3e9   : > { %v859_v62 = vpop.f32.mrb[4].mxu1 }
 0x3ea   : > { %v861_v21 = vpop.f32.mrb[5].mxu1  ;;  %v2102_v48 = vadd.f32 %v859_v62, %v3064_v2 }
 0x3eb   : > { %v2103_v22 = vadd.f32 %v861_v21, %v3058_v56  ;;  %v863_v23 = vpop.f32.mrb[6].mxu1 }
 0x3ec   : > { %v865_v24 = vpop.f32.mrb[7].mxu1  ;;  %v2056_v49 = vmul.f32 -1.442695, %v2102_v48  ;;  %v2104_v55 = vadd.f32 %v863_v23, %v3064_v2 }
 0x3ed   : > { %2346 = vtanh.f32 %v2103_v22  ;;  %v2105_v25 = vadd.f32 %v865_v24, %v3058_v56 }
 0x3ee   : > { %v2058_v57 = vmul.f32 -1.442695, %v2104_v55 }
 0x3ef   : > { %2348 = vtanh.f32 %v2105_v25  ;;  %v2059_v48 = vmul.f32 -1.442695, %v2105_v25  ;;  %v519_v25 = vadd.f32 %v3007_v28, %v3064_v2 }
 0x3f0   : > { %2350 = vpow2.f32 %v2056_v49 }
 0x3f1   : > { %2352 = vpow2.f32 %v2058_v57 }
 0x3f7   : > { %v2347_v26 = vpop.eup %2346 }
 0x3f8   : > { %902 = vrot.lane.b32.xlu0 %v2347_v26, %s2690_s25 }
 0x3f9   : > { %v2349_v27 = vpop.eup %2348 }
 0x3fa   : > { %904 = vrot.lane.b32.xlu1 %v2349_v27, %s2690_s25  ;;  %v2351_v60 = vpop.eup %2350  ;;  %v2057_v27 = vmul.f32 -1.442695, %v2103_v22 }
 0x3fb   : > { %v884_v61 = vadd.f32 1.0, %v2351_v60  ;;  %v2353_v63 = vpop.eup %2352 }
 0x3fc   : > { %v886_v0 = vadd.f32 1.0, %v2353_v63 }
 0x3fd   : > { %2354 = vrcp.f32 %v884_v61 }
 0x3fe   : > { %2356 = vrcp.f32 %v886_v0 }
 0x407   : > { %v2355_v1 = vpop.eup %2354 }
 0x408   : > { %v2357_v6 = vpop.eup %2356  ;;  %v898_v16 = vmul.f32 %v2355_v1, %v780_v54 }
 0x409   : > { %v899_v62 = vmul.f32 %v2357_v6, %v781_v58 }
 0x46a   : > { %v903_v3 = vpop.permute.xlu0 %902 }
 0x46b   : > { %v908_v5 = vmul.f32 %v2355_v1, %v903_v3  ;;  %v521_v3 = vadd.f32 %v3009_v29, %v3058_v56 }
 0x46c   : > { %v905_v9 = vpop.permute.xlu1 %904 }
 0x46d   : > { %912 = vrot.lane.b32.xlu0 %v908_v5, %s2690_s25  ;;  %v909_v13 = vmul.f32 %v2357_v6, %v905_v9  ;;  %v523_v6 = vadd.f32 %v3011_v30, %v3064_v2 }
 0x46f   : > { %914 = vrot.lane.b32.xlu1 %v909_v13, %s2690_s25 }
 0x4df   : > { %v913_v18 = vpop.permute.xlu0 %912 }
 0x4e0   : > { %v3087_v59 = vadd.f32 %v913_v18, %v898_v16  ;;  %v525_v16 = vadd.f32 %v3013_v31, %v3058_v56 }
 0x4e1   : > { %v915_v21 = vpop.permute.xlu1 %914 }
 0x4e2   : > { %2358 = vtanh.f32 %v3087_v59  ;;  %v3090_v23 = vadd.f32 %v915_v21, %v899_v62 }
 0x4e4   : > { %2360 = vtanh.f32 %v3090_v23 }
 0x4e5   : > { %2362 = vpow2.f32 %v2057_v27 }
 0x4e6   : > { %2364 = vpow2.f32 %v2059_v48 }
 0x4ec   : > { %v2359_v24 = vpop.eup %2358 }
 0x4ed   : > { %924 = vrot.lane.b32.xlu0 %v2359_v24, %s2690_s25 }
 0x4ee   : > { %v2361_v26 = vpop.eup %2360 }
 0x4ef   : > { %926 = vrot.lane.b32.xlu1 %v2361_v26, %s2690_s25  ;;  %v2363_v54 = vpop.eup %2362 }
 0x4f0   : > { %v2365_v49 = vpop.eup %2364  ;;  %v885_v55 = vadd.f32 1.0, %v2363_v54 }
 0x4f1   : > { %v887_v57 = vadd.f32 1.0, %v2365_v49 }
 0x4f2   : > { %2366 = vrcp.f32 %v885_v55 }
 0x4f3   : > { %2368 = vrcp.f32 %v887_v57 }
 0x4fc   : > { %v2367_v60 = vpop.eup %2366 }
 0x4fd   : > { %v2369_v61 = vpop.eup %2368 }
 0x55f   : > { %v925_v58 = vpop.permute.xlu0 %924 }
 0x560   : > { %v3095_v0 = vmul.f32 %v2367_v60, %v925_v58 }
 0x561   : > { %v927_v63 = vpop.permute.xlu1 %926 }
 0x562   : > { %v3097_v1 = vmul.f32 %v2369_v61, %v927_v63 }
 0x564   : > { %v965_v22 = vpack.c.bf16 %v3097_v1, %v3095_v0 }
 0x566   : > { %2060 = vmatmul.mubr.msk.bf16.vlgmr.msra.gmra.mrb[0].mxu0 %vm675_vm2, %v965_v22 }
 0x567   : > { %1114 = vmatpush1.bf16.msra.mxu0 %v2940_v8  ;;  %1145 = vmatprep.mubr.bf16.mxu0 %v2689_v4 }
 0x568   : > { %1115 = vmatprep.subr.bf16.mxu0 %v2944_v10 }
 0x56b   : > { %1116 = vmatpush1.bf16.msra.mxu0 %v2950_v11 }
 0x56c   : > { %1117 = vmatprep.subr.bf16.mxu0 %v2954_v12 }
 0x56f   : > { %1118 = vmatpush1.bf16.msra.mxu0 %v2960_v14 }
 0x570   : > { %1119 = vmatprep.subr.bf16.mxu0 %v2963_v15 }
 0x573   : > { %1120 = vmatpush1.bf16.msra.mxu0 %v2970_v17 }
 0x574   : > { %1257 = vmatprep.subr.bf16.mxu0 %v2938_v7 }
 0x639   : > { %v1003_v5 = vpop.f32.mrb[0].mxu0 }
 0x63a   : > { %v1012_v9 = vadd.f32 %v1003_v5, %v519_v25  ;;  %v1005_v13 = vpop.f32.mrb[1].mxu0 }
 0x63b   : > { %v1013_v18 = vadd.f32 %v1005_v13, %v521_v3  ;;  %v1007_v62 = vpop.f32.mrb[2].mxu0 }
 0x63c   : > { %v1014_v21 = vadd.f32 %v1007_v62, %v523_v6  ;;  %v1009_v24 = vpop.f32.mrb[3].mxu0  ;;  %v2061_v27 = vmul.f32 -1.442695, %v1012_v9 }
 0x63d   : > { %2370 = vtanh.f32 %v1013_v18  ;;  %v1015_v26 = vadd.f32 %v1009_v24, %v525_v16  ;;  %v2062_v62 = vmul.f32 -1.442695, %v1013_v18 }
 0x63e   : > { %v2063_v30 = vmul.f32 -1.442695, %v1014_v21 }
 0x63f   : > { %2372 = vtanh.f32 %v1015_v26 }
 0x640   : > { %2374 = vpow2.f32 %v2061_v27 }
 0x641   : > { %2376 = vpow2.f32 %v2063_v30 }
 0x647   : > { %v2371_v28 = vpop.eup %2370 }
 0x648   : > { %1046 = vrot.lane.b32.xlu0 %v2371_v28, %s2690_s25 }
 0x649   : > { %v2373_v29 = vpop.eup %2372 }
 0x64a   : > { %1048 = vrot.lane.b32.xlu1 %v2373_v29, %s2690_s25  ;;  %v2375_v48 = vpop.eup %2374 }
 0x64b   : > { %v1028_v54 = vadd.f32 1.0, %v2375_v48  ;;  %v2377_v31 = vpop.eup %2376 }
 0x64c   : > { %v1030_v49 = vadd.f32 1.0, %v2377_v31 }
 0x64d   : > { %2378 = vrcp.f32 %v1028_v54 }
 0x64e   : > { %2380 = vrcp.f32 %v1030_v49  ;;  %v531_v49 = vadd.f32 %v3017_v33, %v3058_v56 }
 0x657   : > { %v2379_v55 = vpop.eup %2378 }
 0x658   : > { %v2381_v60 = vpop.eup %2380  ;;  %v1042_v22 = vmul.f32 %v2379_v55, %v3087_v59  ;;  %v2064_v59 = vmul.f32 -1.442695, %v1015_v26  ;;  %v529_v26 = vadd.f32 %v3015_v32, %v3064_v2 }
 0x659   : > { %v1043_v5 = vmul.f32 %v2381_v60, %v3090_v23 }
 0x6ba   : > { %v1047_v57 = vpop.permute.xlu0 %1046 }
 0x6bb   : > { %v1052_v58 = vmul.f32 %v2379_v55, %v1047_v57  ;;  %v533_v57 = vadd.f32 %v3019_v34, %v3064_v2 }
 0x6bc   : > { %v1049_v61 = vpop.permute.xlu1 %1048 }
 0x6bd   : > { %1056 = vrot.lane.b32.xlu0 %v1052_v58, %s2690_s25  ;;  %v1053_v63 = vmul.f32 %v2381_v60, %v1049_v61  ;;  %v535_v61 = vadd.f32 %v3021_v35, %v3058_v56 }
 0x6bf   : > { %1058 = vrot.lane.b32.xlu1 %v1053_v63, %s2690_s25 }
 0x72f   : > { %v1057_v25 = vpop.permute.xlu0 %1056 }
 0x730   : > { %v3124_v3 = vadd.f32 %v1057_v25, %v1042_v22 }
 0x731   : > { %v1059_v6 = vpop.permute.xlu1 %1058 }
 0x732   : > { %2382 = vtanh.f32 %v3124_v3  ;;  %v3128_v9 = vadd.f32 %v1059_v6, %v1043_v5 }
 0x734   : > { %2384 = vtanh.f32 %v3128_v9 }
 0x735   : > { %2386 = vpow2.f32 %v2062_v62 }
 0x736   : > { %2388 = vpow2.f32 %v2064_v59 }
 0x73c   : > { %v2383_v13 = vpop.eup %2382 }
 0x73d   : > { %1068 = vrot.lane.b32.xlu0 %v2383_v13, %s2690_s25 }
 0x73e   : > { %v2385_v16 = vpop.eup %2384 }
 0x73f   : > { %1070 = vrot.lane.b32.xlu1 %v2385_v16, %s2690_s25  ;;  %v2387_v21 = vpop.eup %2386 }
 0x740   : > { %v2389_v24 = vpop.eup %2388  ;;  %v1029_v28 = vadd.f32 1.0, %v2387_v21 }
 0x741   : > { %v1031_v29 = vadd.f32 1.0, %v2389_v24 }
 0x742   : > { %2390 = vrcp.f32 %v1029_v28 }
 0x743   : > { %2392 = vrcp.f32 %v1031_v29 }
 0x74c   : > { %v2391_v27 = vpop.eup %2390 }
 0x74d   : > { %v2393_v30 = vpop.eup %2392 }
 0x7af   : > { %v1069_v23 = vpop.permute.xlu0 %1068 }
 0x7b0   : > { %v3133_v54 = vmul.f32 %v2391_v27, %v1069_v23 }
 0x7b1   : > { %v1071_v48 = vpop.permute.xlu1 %1070 }
 0x7b2   : > { %v3135_v31 = vmul.f32 %v2393_v30, %v1071_v48 }
 0x7b4   : > { %v1109_v18 = vpack.c.bf16 %v3135_v31, %v3133_v54 }
 0x7b6   : > { %2065 = vmatmul.mubr.msk.bf16.vlgmr.msra.gmra.mrb[4].mxu0 %vm675_vm2, %v1109_v18 }
 0x7b7   : > { %1258 = vmatpush1.bf16.msra.mxu0 %v2940_v8  ;;  %1289 = vmatprep.mubr.bf16.mxu0 %v2689_v4 }
 0x7b8   : > { %1259 = vmatprep.subr.bf16.mxu0 %v2944_v10 }
 0x7bb   : > { %1260 = vmatpush1.bf16.msra.mxu0 %v2950_v11 }
 0x7bc   : > { %1261 = vmatprep.subr.bf16.mxu0 %v2954_v12 }
 0x7bf   : > { %1262 = vmatpush1.bf16.msra.mxu0 %v2960_v14 }
 0x7c0   : > { %1263 = vmatprep.subr.bf16.mxu0 %v2963_v15 }
 0x7c3   : > { %1264 = vmatpush1.bf16.msra.mxu0 %v2970_v17 }
 0x7c4   : > { %1401 = vmatprep.subr.bf16.mxu0 %v2938_v7 }
 0x889   : > { %v1147_v55 = vpop.f32.mrb[4].mxu0 }
 0x88a   : > { %v1156_v58 = vadd.f32 %v1147_v55, %v529_v26  ;;  %v1149_v60 = vpop.f32.mrb[5].mxu0 }
 0x88b   : > { %v1157_v63 = vadd.f32 %v1149_v60, %v531_v49  ;;  %v1151_v22 = vpop.f32.mrb[6].mxu0 }
 0x88c   : > { %v1158_v25 = vadd.f32 %v1151_v22, %v533_v57  ;;  %v1153_v5 = vpop.f32.mrb[7].mxu0  ;;  %v2066_v13 = vmul.f32 -1.442695, %v1156_v58 }
 0x88d   : > { %2394 = vtanh.f32 %v1157_v63  ;;  %v1159_v6 = vadd.f32 %v1153_v5, %v535_v61  ;;  %v2067_v60 = vmul.f32 -1.442695, %v1157_v63 }
 0x88e   : > { %v2068_v34 = vmul.f32 -1.442695, %v1158_v25 }
 0x88f   : > { %2396 = vtanh.f32 %v1159_v6 }
 0x890   : > { %2398 = vpow2.f32 %v2066_v13 }
 0x891   : > { %2400 = vpow2.f32 %v2068_v34 }
 0x897   : > { %v2395_v32 = vpop.eup %2394 }
 0x898   : > { %1190 = vrot.lane.b32.xlu0 %v2395_v32, %s2690_s25 }
 0x899   : > { %v2397_v33 = vpop.eup %2396 }
 0x89a   : > { %1192 = vrot.lane.b32.xlu1 %v2397_v33, %s2690_s25  ;;  %v2399_v16 = vpop.eup %2398 }
 0x89b   : > { %v1172_v62 = vadd.f32 1.0, %v2399_v16  ;;  %v2401_v35 = vpop.eup %2400 }
 0x89c   : > { %v1174_v59 = vadd.f32 1.0, %v2401_v35 }
 0x89d   : > { %2402 = vrcp.f32 %v1172_v62  ;;  %v541_v62 = vadd.f32 %v3025_v37, %v3058_v56 }
 0x89e   : > { %2404 = vrcp.f32 %v1174_v59  ;;  %v543_v59 = vadd.f32 %v3027_v38, %v3064_v2 }
 0x8a7   : > { %v2403_v21 = vpop.eup %2402 }
 0x8a8   : > { %v2405_v29 = vpop.eup %2404  ;;  %v1186_v30 = vmul.f32 %v2403_v21, %v3124_v3  ;;  %v2069_v3 = vmul.f32 -1.442695, %v1159_v6  ;;  %v539_v6 = vadd.f32 %v3023_v36, %v3064_v2 }
 0x8a9   : > { %v1187_v26 = vmul.f32 %v2405_v29, %v3128_v9 }
 0x90a   : > { %v1191_v24 = vpop.permute.xlu0 %1190 }
 0x90b   : > { %v1196_v28 = vmul.f32 %v2403_v21, %v1191_v24 }
 0x90c   : > { %v1193_v23 = vpop.permute.xlu1 %1192 }
 0x90d   : > { %1200 = vrot.lane.b32.xlu0 %v1196_v28, %s2690_s25  ;;  %v1197_v27 = vmul.f32 %v2405_v29, %v1193_v23  ;;  %v545_v28 = vadd.f32 %v3029_v39, %v3058_v56 }
 0x90f   : > { %1202 = vrot.lane.b32.xlu1 %v1197_v27, %s2690_s25 }
 0x97f   : > { %v1201_v48 = vpop.permute.xlu0 %1200 }
 0x980   : > { %v3162_v18 = vadd.f32 %v1201_v48, %v1186_v30 }
 0x981   : > { %v1203_v49 = vpop.permute.xlu1 %1202 }
 0x982   : > { %2406 = vtanh.f32 %v3162_v18  ;;  %v3166_v55 = vadd.f32 %v1203_v49, %v1187_v26 }
 0x984   : > { %2408 = vtanh.f32 %v3166_v55 }
 0x985   : > { %2410 = vpow2.f32 %v2067_v60 }
 0x986   : > { %2412 = vpow2.f32 %v2069_v3 }
 0x98c   : > { %v2407_v57 = vpop.eup %2406 }
 0x98d   : > { %1212 = vrot.lane.b32.xlu0 %v2407_v57, %s2690_s25 }
 0x98e   : > { %v2409_v58 = vpop.eup %2408 }
 0x98f   : > { %1214 = vrot.lane.b32.xlu1 %v2409_v58, %s2690_s25  ;;  %v2411_v61 = vpop.eup %2410 }
 0x990   : > { %v2413_v22 = vpop.eup %2412  ;;  %v1173_v25 = vadd.f32 1.0, %v2411_v61 }
 0x991   : > { %v1175_v5 = vadd.f32 1.0, %v2413_v22 }
 0x992   : > { %2414 = vrcp.f32 %v1173_v25 }
 0x993   : > { %2416 = vrcp.f32 %v1175_v5 }
 0x99c   : > { %v2415_v32 = vpop.eup %2414 }
 0x99d   : > { %v2417_v33 = vpop.eup %2416 }
 0x9ff   : > { %v1213_v9 = vpop.permute.xlu0 %1212 }
 0xa00   : > { %v3171_v34 = vmul.f32 %v2415_v32, %v1213_v9 }
 0xa01   : > { %v1215_v13 = vpop.permute.xlu1 %1214 }
 0xa02   : > { %v3173_v16 = vmul.f32 %v2417_v33, %v1215_v13 }
 0xa04   : > { %v1253_v63 = vpack.c.bf16 %v3173_v16, %v3171_v34 }
 0xa06   : > { %2070 = vmatmul.mubr.msk.bf16.vlgmr.msra.gmra.mrb[8].mxu0 %vm675_vm2, %v1253_v63 }
 0xa07   : > { %1402 = vmatpush1.bf16.msra.mxu0 %v2940_v8  ;;  %1433 = vmatprep.mubr.bf16.mxu0 %v2689_v4 }
 0xa08   : > { %1403 = vmatprep.subr.bf16.mxu0 %v2944_v10 }
 0xa0b   : > { %1404 = vmatpush1.bf16.msra.mxu0 %v2950_v11 }
 0xa0c   : > { %1405 = vmatprep.subr.bf16.mxu0 %v2954_v12 }
 0xa0f   : > { %1406 = vmatpush1.bf16.msra.mxu0 %v2960_v14 }
 0xa10   : > { %1407 = vmatprep.subr.bf16.mxu0 %v2963_v15 }
 0xa13   : > { %1408 = vmatpush1.bf16.msra.mxu0 %v2970_v17 }
 0xa14   : > { %1545 = vmatprep.subr.bf16.mxu0 %v2938_v7 }
 0xad9   : > { %v1291_v35 = vpop.f32.mrb[8].mxu0 }
 0xada   : > { %v1300_v21 = vadd.f32 %v1291_v35, %v539_v6  ;;  %v1293_v24 = vpop.f32.mrb[9].mxu0 }
 0xadb   : > { %v1301_v29 = vadd.f32 %v1293_v24, %v541_v62  ;;  %v1295_v23 = vpop.f32.mrb[10].mxu0 }
 0xadc   : > { %v1302_v27 = vadd.f32 %v1295_v23, %v543_v59  ;;  %v1297_v30 = vpop.f32.mrb[11].mxu0  ;;  %v2071_v26 = vmul.f32 -1.442695, %v1300_v21 }
 0xadd   : > { %2418 = vtanh.f32 %v1301_v29  ;;  %v1303_v48 = vadd.f32 %v1297_v30, %v545_v28  ;;  %v2072_v59 = vmul.f32 -1.442695, %v1301_v29 }
 0xade   : > { %v2073_v38 = vmul.f32 -1.442695, %v1302_v27 }
 0xadf   : > { %2420 = vtanh.f32 %v1303_v48 }
 0xae0   : > { %2422 = vpow2.f32 %v2071_v26 }
 0xae1   : > { %2424 = vpow2.f32 %v2073_v38 }
 0xae7   : > { %v2419_v36 = vpop.eup %2418 }
 0xae8   : > { %1334 = vrot.lane.b32.xlu0 %v2419_v36, %s2690_s25 }
 0xae9   : > { %v2421_v37 = vpop.eup %2420 }
 0xaea   : > { %1336 = vrot.lane.b32.xlu1 %v2421_v37, %s2690_s25  ;;  %v2423_v49 = vpop.eup %2422 }
 0xaeb   : > { %v1316_v57 = vadd.f32 1.0, %v2423_v49  ;;  %v2425_v39 = vpop.eup %2424 }
 0xaec   : > { %v1318_v58 = vadd.f32 1.0, %v2425_v39 }
 0xaed   : > { %2426 = vrcp.f32 %v1316_v57 }
 0xaee   : > { %2428 = vrcp.f32 %v1318_v58 }
 0xaf7   : > { %v2427_v60 = vpop.eup %2426 }
 0xaf8   : > { %v2429_v22 = vpop.eup %2428  ;;  %v1330_v9 = vmul.f32 %v2427_v60, %v3162_v18  ;;  %v2074_v18 = vmul.f32 -1.442695, %v1303_v48  ;;  %v549_v48 = vadd.f32 %v3031_v40, %v3064_v2 }
 0xaf9   : > { %v1331_v13 = vmul.f32 %v2429_v22, %v3166_v55 }
 0xb5a   : > { %v1335_v3 = vpop.permute.xlu0 %1334 }
 0xb5b   : > { %v1340_v61 = vmul.f32 %v2427_v60, %v1335_v3 }
 0xb5c   : > { %v1337_v25 = vpop.permute.xlu1 %1336 }
 0xb5d   : > { %1344 = vrot.lane.b32.xlu0 %v1340_v61, %s2690_s25  ;;  %v1341_v5 = vmul.f32 %v2429_v22, %v1337_v25 }
 0xb5f   : > { %1346 = vrot.lane.b32.xlu1 %v1341_v5, %s2690_s25 }
 0xbcf   : > { %v1345_v32 = vpop.permute.xlu0 %1344 }
 0xbd0   : > { %v3200_v33 = vadd.f32 %v1345_v32, %v1330_v9 }
 0xbd1   : > { %v1347_v63 = vpop.permute.xlu1 %1346 }
 0xbd2   : > { %2430 = vtanh.f32 %v3200_v33  ;;  %v3204_v6 = vadd.f32 %v1347_v63, %v1331_v13 }
 0xbd4   : > { %2432 = vtanh.f32 %v3204_v6 }
 0xbd5   : > { %2434 = vpow2.f32 %v2072_v59 }
 0xbd6   : > { %2436 = vpow2.f32 %v2074_v18 }
 0xbdc   : > { %v2431_v62 = vpop.eup %2430 }
 0xbdd   : > { %1356 = vrot.lane.b32.xlu0 %v2431_v62, %s2690_s25 }
 0xbde   : > { %v2433_v35 = vpop.eup %2432 }
 0xbdf   : > { %1358 = vrot.lane.b32.xlu1 %v2433_v35, %s2690_s25  ;;  %v2435_v21 = vpop.eup %2434 }
 0xbe0   : > { %v2437_v24 = vpop.eup %2436  ;;  %v1317_v28 = vadd.f32 1.0, %v2435_v21 }
 0xbe1   : > { %v1319_v23 = vadd.f32 1.0, %v2437_v24 }
 0xbe2   : > { %2438 = vrcp.f32 %v1317_v28 }
 0xbe3   : > { %2440 = vrcp.f32 %v1319_v23 }
 0xbec   : > { %v2439_v27 = vpop.eup %2438 }
 0xbed   : > { %v2441_v30 = vpop.eup %2440 }
 0xc4f   : > { %v1357_v55 = vpop.permute.xlu0 %1356 }
 0xc50   : > { %v3209_v37 = vmul.f32 %v2439_v27, %v1357_v55 }
 0xc51   : > { %v1359_v36 = vpop.permute.xlu1 %1358 }
 0xc52   : > { %v3211_v26 = vmul.f32 %v2441_v30, %v1359_v36 }
 0xc54   : > { %v1397_v29 = vpack.c.bf16 %v3211_v26, %v3209_v37 }
 0xc56   : > { %2075 = vmatmul.mubr.msk.bf16.vlgmr.msra.gmra.mrb[12].mxu0 %vm675_vm2, %v1397_v29 }
 0xc57   : > { %1546 = vmatpush1.bf16.msra.mxu0 %v2940_v8  ;;  %1577 = vmatprep.mubr.bf16.mxu0 %v2689_v4  ;;  %v551_v8 = vadd.f32 %v3033_v41, %v3058_v56 }
 0xc58   : > { %1547 = vmatprep.subr.bf16.mxu0 %v2944_v10  ;;  %v553_v10 = vadd.f32 %v3035_v42, %v3064_v2 }
 0xc5b   : > { %1548 = vmatpush1.bf16.msra.mxu0 %v2950_v11 }
 0xc5c   : > { %1549 = vmatprep.subr.bf16.mxu0 %v2954_v12 }
 0xc5f   : > { %1550 = vmatpush1.bf16.msra.mxu0 %v2960_v14  ;;  %v555_v14 = vadd.f32 %v3037_v43, %v3058_v56 }
 0xc60   : > { %1551 = vmatprep.subr.bf16.mxu0 %v2963_v15 }
 0xc63   : > { %1552 = vmatpush1.bf16.msra.mxu0 %v2970_v17 }
 0xc64   : > { %1689 = vmatprep.subr.bf16.mxu0 %v2938_v7 }
 0xd29   : > { %v1435_v38 = vpop.f32.mrb[12].mxu0 }
 0xd2a   : > { %v1444_v11 = vadd.f32 %v1435_v38, %v549_v48  ;;  %v1437_v12 = vpop.f32.mrb[13].mxu0 }
 0xd2b   : > { %v1445_v15 = vadd.f32 %v1437_v12, %v551_v8  ;;  %v1439_v49 = vpop.f32.mrb[14].mxu0  ;;  %v2514_v12 = vld [vmem:[#allocation12] ss:$8 sps:$4 sm:$0xff]  }
 0xd2c   : > { %v1446_v57 = vadd.f32 %v1439_v49, %v553_v10  ;;  %v1441_v39 = vpop.f32.mrb[15].mxu0  ;;  %v2076_v58 = vmul.f32 -1.442695, %v1444_v11  ;;  %v2517_v49 = vld [vmem:[#allocation12 + $0x24] ss:$8 sps:$4 sm:$0xff]  }
 0xd2d   : > { %2442 = vtanh.f32 %v1445_v15  ;;  %v1447_v7 = vadd.f32 %v1441_v39, %v555_v14  ;;  %v2077_v23 = vmul.f32 -1.442695, %v1445_v15  ;;  %v2515_v14 = vld [vmem:[#allocation12 + $0x14] ss:$8 sps:$4 sm:$0xff]   ;;  %v2516_v15 = vld [vmem:[#allocation12 + $0x10] ss:$8 sps:$4 sm:$0xff]  }
 0xd2e   : > { %v2078_v42 = vmul.f32 -1.442695, %v1446_v57  ;;  %v2518_v57 = vld [vmem:[#allocation12 + $0x20] ss:$8 sps:$4 sm:$0xff]   ;;  %v2519_v39 = vld [vmem:[#allocation12 + $0x34] ss:$8 sps:$4 sm:$0xff]  }
 0xd2f   : > { %2444 = vtanh.f32 %v1447_v7 }
 0xd30   : > { %2446 = vpow2.f32 %v2076_v58  ;;  %v563_v58 = vadd.f32 %v3043_v46, %v3064_v2 }
 0xd31   : > { %2448 = vpow2.f32 %v2078_v42 }
 0xd37   : > { %v2443_v40 = vpop.eup %2442 }
 0xd38   : > { %1478 = vrot.lane.b32.xlu0 %v2443_v40, %s2690_s25  ;;  %v561_v40 = vadd.f32 %v3041_v45, %v3058_v56 }
 0xd39   : > { %v2445_v41 = vpop.eup %2444 }
 0xd3a   : > { %1480 = vrot.lane.b32.xlu1 %v2445_v41, %s2690_s25  ;;  %v2447_v60 = vpop.eup %2446 }
 0xd3b   : > { %v1460_v3 = vadd.f32 1.0, %v2447_v60  ;;  %v2449_v43 = vpop.eup %2448 }
 0xd3c   : > { %v1462_v61 = vadd.f32 1.0, %v2449_v43 }
 0xd3d   : > { %2450 = vrcp.f32 %v1460_v3  ;;  %v565_v3 = vadd.f32 %v3045_v47, %v3058_v56 }
 0xd3e   : > { %2452 = vrcp.f32 %v1462_v61 }
 0xd47   : > { %v2451_v22 = vpop.eup %2450 }
 0xd48   : > { %v2453_v9 = vpop.eup %2452  ;;  %v1474_v63 = vmul.f32 %v2451_v22, %v3200_v33  ;;  %v2079_v33 = vmul.f32 -1.442695, %v1447_v7  ;;  %v559_v7 = vadd.f32 %v3039_v44, %v3064_v2 }
 0xd49   : > { %v1475_v59 = vmul.f32 %v2453_v9, %v3204_v6 }
 0xdaa   : > { %v1479_v25 = vpop.permute.xlu0 %1478 }
 0xdab   : > { %v1484_v5 = vmul.f32 %v2451_v22, %v1479_v25 }
 0xdac   : > { %v1481_v32 = vpop.permute.xlu1 %1480 }
 0xdad   : > { %1488 = vrot.lane.b32.xlu0 %v1484_v5, %s2690_s25  ;;  %v1485_v13 = vmul.f32 %v2453_v9, %v1481_v32 }
 0xdaf   : > { %1490 = vrot.lane.b32.xlu1 %v1485_v13, %s2690_s25 }
 0xe1f   : > { %v1489_v62 = vpop.permute.xlu0 %1488 }
 0xe20   : > { %v3238_v35 = vadd.f32 %v1489_v62, %v1474_v63 }
 0xe21   : > { %v1491_v18 = vpop.permute.xlu1 %1490 }
 0xe22   : > { %2454 = vtanh.f32 %v3238_v35  ;;  %v3242_v21 = vadd.f32 %v1491_v18, %v1475_v59 }
 0xe24   : > { %2456 = vtanh.f32 %v3242_v21 }
 0xe25   : > { %2458 = vpow2.f32 %v2077_v23 }
 0xe26   : > { %2460 = vpow2.f32 %v2079_v33 }
 0xe2c   : > { %v2455_v24 = vpop.eup %2454 }
 0xe2d   : > { %1500 = vrot.lane.b32.xlu0 %v2455_v24, %s2690_s25 }
 0xe2e   : > { %v2457_v28 = vpop.eup %2456 }
 0xe2f   : > { %1502 = vrot.lane.b32.xlu1 %v2457_v28, %s2690_s25  ;;  %v2459_v55 = vpop.eup %2458 }
 0xe30   : > { %v2461_v27 = vpop.eup %2460  ;;  %v1461_v30 = vadd.f32 1.0, %v2459_v55 }
 0xe31   : > { %v1463_v36 = vadd.f32 1.0, %v2461_v27 }
 0xe32   : > { %2462 = vrcp.f32 %v1461_v30 }
 0xe33   : > { %2464 = vrcp.f32 %v1463_v36 }
 0xe3c   : > { %v2463_v29 = vpop.eup %2462 }
 0xe3d   : > { %v2465_v48 = vpop.eup %2464 }
 0xe9f   : > { %v1501_v6 = vpop.permute.xlu0 %1500 }
 0xea0   : > { %v3247_v38 = vmul.f32 %v2463_v29, %v1501_v6 }
 0xea1   : > { %v1503_v8 = vpop.permute.xlu1 %1502 }
 0xea2   : > { %v3249_v10 = vmul.f32 %v2465_v48, %v1503_v8 }
 0xea4   : > { %v1541_v11 = vpack.c.bf16 %v3249_v10, %v3247_v38 }
 0xea6   : > { %2080 = vmatmul.mubr.msk.bf16.vlgmr.msra.gmra.mrb[16].mxu0 %vm675_vm2, %v1541_v11 }
 0xea7   : > { %1690 = vmatpush1.bf16.msra.mxu0 %v2514_v12  ;;  %1721 = vmatprep.mubr.bf16.mxu0 %v2689_v4 }
 0xea8   : > { %1691 = vmatprep.subr.bf16.mxu0 %v2515_v14 }
 0xeab   : > { %1692 = vmatpush1.bf16.msra.mxu0 %v2516_v15 }
 0xeac   : > { %1693 = vmatprep.subr.bf16.mxu0 %v2517_v49 }
 0xeaf   : > { %1694 = vmatpush1.bf16.msra.mxu0 %v2518_v57 }
 0xeb0   : > { %1695 = vmatprep.subr.bf16.mxu0 %v2519_v39 }
 0xeb3   : > { %1696 = vmatpush1.bf16.msra.mxu0 %v2970_v17 }
 0xf79   : > { %v1579_v41 = vpop.f32.mrb[16].mxu0 }
 0xf7a   : > { %v1588_v42 = vadd.f32 %v1579_v41, %v559_v7  ;;  %v1581_v60 = vpop.f32.mrb[17].mxu0  ;;  %v569_v41 = vadd.f32 %v3047_v50, %v3064_v2 }
 0xf7b   : > { %v1589_v43 = vadd.f32 %v1581_v60, %v561_v40  ;;  %v1583_v61 = vpop.f32.mrb[18].mxu0  ;;  %v573_v60 = vadd.f32 %v3051_v52, %v3064_v2 }
 0xf7c   : > { %v1590_v22 = vadd.f32 %v1583_v61, %v563_v58  ;;  %v1585_v25 = vpop.f32.mrb[19].mxu0  ;;  %v2081_v5 = vmul.f32 -1.442695, %v1588_v42  ;;  %v571_v58 = vadd.f32 %v3049_v51, %v3058_v56  ;;  %v575_v61 = vadd.f32 %v3053_v53, %v3058_v56 }
 0xf7d   : > { %2466 = vtanh.f32 %v1589_v43  ;;  %v1591_v17 = vadd.f32 %v1585_v25, %v565_v3  ;;  %v2082_v48 = vmul.f32 -1.442695, %v1589_v43 }
 0xf7e   : > { %v2083_v46 = vmul.f32 -1.442695, %v1590_v22 }
 0xf7f   : > { %2468 = vtanh.f32 %v1591_v17 }
 0xf80   : > { %2470 = vpow2.f32 %v2081_v5 }
 0xf81   : > { %2472 = vpow2.f32 %v2083_v46 }
 0xf87   : > { %v2467_v44 = vpop.eup %2466 }
 0xf88   : > { %1622 = vrot.lane.b32.xlu0 %v2467_v44, %s2690_s25 }
 0xf89   : > { %v2469_v45 = vpop.eup %2468 }
 0xf8a   : > { %1624 = vrot.lane.b32.xlu1 %v2469_v45, %s2690_s25  ;;  %v2471_v9 = vpop.eup %2470 }
 0xf8b   : > { %v1604_v32 = vadd.f32 1.0, %v2471_v9  ;;  %v2473_v47 = vpop.eup %2472  ;;  %v3302_v9 = vld [vmem:[%s2915_s16] sm:$0xff] }
 0xf8c   : > { %v1606_v13 = vadd.f32 1.0, %v2473_v47 }
 0xf8d   : > { %2474 = vrcp.f32 %v1604_v32  ;;  %v794_v32 = vstv %s2910_s10 }
 0xf8e   : > { %2476 = vrcp.f32 %v1606_v13  ;;  %vm795_vm3 = vcmp.lt.s32.totalorder %v794_v32, %v3302_v9 }
 0xf97   : > { %v2475_v63 = vpop.eup %2474 }
 0xf98   : > { %v2477_v18 = vpop.eup %2476  ;;  %v1618_v23 = vmul.f32 %v2475_v63, %v3238_v35  ;;  %v2084_v35 = vmul.f32 -1.442695, %v1591_v17 }
 0xf99   : > { %v1619_v27 = vmul.f32 %v2477_v18, %v3242_v21 }
 0xffa   : > { %v1623_v62 = vpop.permute.xlu0 %1622 }
 0xffb   : > { %v1628_v59 = vmul.f32 %v2475_v63, %v1623_v62  ;;  %v932_v62 = vstv %s813_s17  ;;  %s1238_s17 = scalar_select %p3390_p0, 1, 0 }
 0xffc   : > { %v1625_v24 = vpop.permute.xlu1 %1624  ;;  %vm933_vm7 = vcmp.lt.s32.totalorder %v932_v62, %v3302_v9 }
 0xffd   : > { %1632 = vrot.lane.b32.xlu0 %v1628_v59, %s2690_s25  ;;  %v1629_v28 = vmul.f32 %v2477_v18, %v1625_v24  ;;  %v610_v59 = vld [vmem:[%s2915_s16 + $0x8] sm:$0xff]  ;;  %v797_v18 = vsel %vm795_vm3, 1, %v2689_v4  ;;  %s1245_s16 = sadd.s32 4, %s2910_s10 }
 0xffe   : > { %vm934_vm4 = vcmp.lt.s32.totalorder %v932_v62, %v610_v59  ;;  %vm796_vm5 = vcmp.lt.s32.totalorder %v794_v32, %v610_v59  ;;  %p3397_p1 = scmp.lt.s32.totalorder %s1245_s16, %s2905_s9  ;;  %v951_v62 = vstv %s950_s19 }
 0xfff   : > { %1634 = vrot.lane.b32.xlu1 %v1629_v28, %s2690_s25  ;;  %s1814_s10 = scalar_select %p3428_p10, 1, 0 }
0x106f   : > { %v1633_v33 = vpop.permute.xlu0 %1632 }
0x1070   : > { %v3269_v55 = vadd.f32 %v1633_v33, %v1618_v23  ;;  %v1076_v33 = vstv %s957_s22  ;;  %s1382_s22 = scalar_select %p3397_p1, 1, 0 }
0x1071   : > { %v1635_v30 = vpop.permute.xlu1 %1634  ;;  %vm1078_vm6 = vcmp.lt.s32.totalorder %v1076_v33, %v610_v59  ;;  %vm1077_vm9 = vcmp.lt.s32.totalorder %v1076_v33, %v3302_v9 }
0x1072   : > { %2478 = vtanh.f32 %v3269_v55  ;;  %v3273_v36 = vadd.f32 %v1635_v30, %v1619_v27  ;;  %v936_v27 = vsel %vm934_vm4, 1, %v2689_v4  ;;  %v798_v30 = vsel %vm796_vm5, 1, %v2689_v4 }
0x1074   : > { %2480 = vtanh.f32 %v3273_v36 }
0x1075   : > { %2482 = vpow2.f32 %v2082_v48  ;;  %v935_v48 = vsel %vm933_vm7, 1, %v2689_v4 }
0x1076   : > { %2484 = vpow2.f32 %v2084_v35  ;;  %v1364_v35 = vstv %s1245_s16  ;;  %s1526_s16 = scalar_select %p3406_p2, 1, 0 }
0x1077   : > { %vm1366_vm10 = vcmp.lt.s32.totalorder %v1364_v35, %v610_v59  ;;  %vm1365_vm13 = vcmp.lt.s32.totalorder %v1364_v35, %v3302_v9  ;;  %v624_v35 = vld [vmem:[#allocation5 + $0x8] sm:$0xff] }
0x1078   : > { %v3442_v33 = vstv %s1526_s16 }
0x107c   : > { %v2479_v6 = vpop.eup %2478 }
0x107d   : > { %1644 = vrot.lane.b32.xlu0 %v2479_v6, %s2690_s25  ;;  %v1220_v6 = vstv %s1101_s13 }
0x107e   : > { %v2481_v29 = vpop.eup %2480  ;;  %vm1222_vm8 = vcmp.lt.s32.totalorder %v1220_v6, %v610_v59  ;;  %vm1221_vm11 = vcmp.lt.s32.totalorder %v1220_v6, %v3302_v9 }
0x107f   : > { %1646 = vrot.lane.b32.xlu1 %v2481_v29, %s2690_s25  ;;  %v2483_v8 = vpop.eup %2482  ;;  %v1080_v29 = vsel %vm1078_vm6, 1, %v2689_v4 }
0x1080   : > { %v2485_v11 = vpop.eup %2484  ;;  %v1605_v12 = vadd.f32 1.0, %v2483_v8  ;;  %v1224_v8 = vsel %vm1222_vm8, 1, %v2689_v4  ;;  %vm952_vm8 = vcmp.eq.s32.totalorder %v951_v62, 1 }
0x1081   : > { %v1607_v14 = vadd.f32 1.0, %v2485_v11  ;;  %v1079_v11 = vsel %vm1077_vm9, 1, %v2689_v4 }
0x1082   : > { %2486 = vrcp.f32 %v1605_v12  ;;  %v1508_v12 = vstv %s1389_s12 }
0x1083   : > { %2488 = vrcp.f32 %v1607_v14  ;;  %v1368_v14 = vsel %vm1366_vm10, 1, %v2689_v4  ;;  %vm1510_vm12 = vcmp.lt.s32.totalorder %v1508_v12, %v610_v59  ;;  %vm1509_vm15 = vcmp.lt.s32.totalorder %v1508_v12, %v3302_v9 }
0x108c   : > { %v2487_v15 = vpop.eup %2486 }
0x108d   : > { %v2489_v49 = vpop.eup %2488 }
0x10ef   : > { %v1645_v21 = vpop.permute.xlu0 %1644 }
0x10f0   : > { %v3278_v39 = vmul.f32 %v2487_v15, %v1645_v21  ;;  %v1223_v21 = vsel %vm1221_vm11, 1, %v2689_v4  ;;  %v1652_v15 = vstv %s1533_s26  ;;  %s1670_s26 = scalar_select %p3419_p8, 1, 0 }
0x10f1   : > { %v1647_v57 = vpop.permute.xlu1 %1646  ;;  %vm1654_vm14 = vcmp.lt.s32.totalorder %v1652_v15, %v610_v59  ;;  %vm1653_vm1 = vcmp.lt.s32.totalorder %v1652_v15, %v3302_v9 }
0x10f2   : > { %v3280_v7 = vmul.f32 %v2489_v49, %v1647_v57  ;;  %v1512_v49 = vsel %vm1510_vm12, 1, %v2689_v4  ;;  %v1367_v57 = vsel %vm1365_vm13, 1, %v2689_v4 }
0x10f4   : > { %v1685_v40 = vpack.c.bf16 %v3280_v7, %v3278_v39 }
0x10f6   : > { %2085 = vmatmul.mubr.msk.bf16.vlgmr.msra.gmra.mrb[20].mxu0 %vm675_vm2, %v1685_v40  ;;  %v1796_v40 = vstv %s1677_s4 }
0x10f7   : > { %vm1798_vm0 = vcmp.lt.s32.totalorder %v1796_v40, %v610_v59  ;;  %vm1797_vm3 = vcmp.lt.s32.totalorder %v1796_v40, %v3302_v9  ;;  %v3432_v59 = vstv %s1094_s20 }
0x10f8   : > { %vm1096_vm9 = vcmp.eq.s32.totalorder %v3432_v59, 1 }
0x11c9   : > { %v1723_v42 = vpop.f32.mrb[20].mxu0 }
0x11ca   : > { %v1732_v3 = vadd.f32 %v1723_v42, %v569_v41  ;;  %v1725_v43 = vpop.f32.mrb[21].mxu0  ;;  %v1656_v41 = vsel %vm1654_vm14, 1, %v2689_v4  ;;  %v1800_v42 = vsel %vm1798_vm0, 1, %v2689_v4  ;;  %vm1528_vm14 = vcmp.eq.s32.totalorder %v3442_v33, 1 }
0x11cb   : > { %v3293_v22 = vadd.f32 %v1725_v43, %v571_v58  ;;  %v1727_v25 = vpop.f32.mrb[22].mxu0  ;;  %v1511_v58 = vsel %vm1509_vm15, 1, %v2689_v4 }
0x11cc   : > { %v1734_v17 = vadd.f32 %v1727_v25, %v573_v60  ;;  %v1729_v44 = vpop.f32.mrb[23].mxu0  ;;  %v2086_v53 = vmul.f32 -1.442695, %v1732_v3  ;;  %v1655_v60 = vsel %vm1653_vm1, 1, %v2689_v4  ;;  %v1799_v3 = vsel %vm1797_vm3, 1, %v2689_v4 }
0x11cd   : > { %2490 = vtanh.f32 %v3293_v22  ;;  %v3296_v50 = vadd.f32 %v1729_v44, %v575_v61 }
0x11ce   : > { %v2088_v56 = vmul.f32 -1.442695, %v1734_v17 }
0x11cf   : > { %2492 = vtanh.f32 %v3296_v50 }
0x11d0   : > { %2494 = vpow2.f32 %v2086_v53 }
0x11d1   : > { %2496 = vpow2.f32 %v2088_v56  ;;  %v2087_v56 = vmul.f32 -1.442695, %v3293_v22 }
0x11d7   : > { %v2491_v51 = vpop.eup %2490 }
0x11d8   : > { %1766 = vrot.lane.b32.xlu0 %v2491_v51, %s2690_s25 }
0x11d9   : > { %v2493_v52 = vpop.eup %2492 }
0x11da   : > { %1768 = vrot.lane.b32.xlu1 %v2493_v52, %s2690_s25  ;;  %v2495_v2 = vpop.eup %2494 }
0x11db   : > { %v1748_v45 = vadd.f32 1.0, %v2495_v2  ;;  %v2497_v5 = vpop.eup %2496  ;;  %v2089_v2 = vmul.f32 -1.442695, %v3296_v50 }
0x11dc   : > { %v1750_v46 = vadd.f32 1.0, %v2497_v5 }
0x11dd   : > { %2498 = vrcp.f32 %v1748_v45 }
0x11de   : > { %2500 = vrcp.f32 %v1750_v46 }
0x11e7   : > { %v3306_v47 = vpop.eup %2498 }
0x11e8   : > { %v3316_v24 = vpop.eup %2500  ;;  %v1762_v43 = vmul.f32 %v3306_v47, %v3269_v55 }
0x11e9   : > { %v1763_v17 = vmul.f32 %v3316_v24, %v3273_v36 }
0x124a   : > { %v1767_v13 = vpop.permute.xlu0 %1766 }
0x124b   : > { %v1772_v63 = vmul.f32 %v3306_v47, %v1767_v13 }
0x124c   : > { %v1769_v28 = vpop.permute.xlu1 %1768 }
0x124d   : > { %1776 = vrot.lane.b32.xlu0 %v1772_v63, %s2690_s25  ;;  %v1773_v23 = vmul.f32 %v3316_v24, %v1769_v28  ;;  %v3438_v24 = vstv %s1238_s17 }
0x124e   : > { %vm1240_vm11 = vcmp.eq.s32.totalorder %v3438_v24, 1 }
0x124f   : > { %1778 = vrot.lane.b32.xlu1 %v1773_v23, %s2690_s25  ;;  %v3440_v23 = vstv %s1382_s22 }
0x1250   : > { %vm1384_vm13 = vcmp.eq.s32.totalorder %v3440_v23, 1 }
0x1251   : > { %800 = vperm.xlu0 %2294, %v797_v18  }
0x1253   : > { %803 = vperm.xlu1 %2295, %v798_v30  }
0x1255   : > { %941 = vperm.xlu0 %2294, %v936_v27   ;;  %v623_v27 = vld [vmem:[#allocation5] sm:$0xff] }
0x1257   : > { %938 = vperm.xlu1 %2295, %v935_v48   ;;  %v3450_v48 = vstv %s1670_s26 }
0x1258   : > { %vm1672_vm1 = vcmp.eq.s32.totalorder %v3450_v48, 1 }
0x1259   : > { %1085 = vperm.xlu0 %2294, %v1080_v29   ;;  %v625_v29 = vld [vmem:[#allocation6] sm:$0xff] }
0x125b   : > { %1082 = vperm.xlu1 %2295, %v1079_v11  }
0x125d   : > { %1229 = vperm.xlu0 %2294, %v1224_v8  }
0x125f   : > { %1226 = vperm.xlu1 %2295, %v1223_v21   ;;  %v3459_v21 = vstv %s1814_s10 }
0x1261   : > { %1373 = vperm.xlu0 %2294, %v1368_v14  }
0x1263   : > { %1370 = vperm.xlu1 %2295, %v1367_v57  }
0x1265   : > { %1517 = vperm.xlu0 %2294, %v1512_v49  }
0x1267   : > { %1514 = vperm.xlu1 %2295, %v1511_v58  }
0x1269   : > { %1661 = vperm.xlu0 %2294, %v1656_v41  }
0x126b   : > { %1658 = vperm.xlu1 %2295, %v1655_v60  }
0x126d   : > { %1805 = vperm.xlu0 %2294, %v1800_v42  }
0x126f   : > { %1802 = vperm.xlu1 %2295, %v1799_v3  }
0x12bf   : > { %v1777_v61 = vpop.permute.xlu0 %1776 }
0x12c0   : > { %v1782_v25 = vadd.f32 %v1777_v61, %v1762_v43 }
0x12c1   : > { %v1779_v44 = vpop.permute.xlu1 %1778 }
0x12c2   : > { %2502 = vtanh.f32 %v1782_v25  ;;  %v1783_v51 = vadd.f32 %v1779_v44, %v1763_v17 }
0x12c4   : > { %2504 = vtanh.f32 %v1783_v51 }
0x12c5   : > { %2506 = vpow2.f32 %v2087_v56 }
0x12c6   : > { %2508 = vpow2.f32 %v2089_v2 }
0x12cc   : > { %v2503_v52 = vpop.eup %2502 }
0x12cd   : > { %1788 = vrot.lane.b32.xlu1 %v2503_v52, %s2690_s25 }
0x12ce   : > { %v2505_v4 = vpop.eup %2504 }
0x12cf   : > { %1790 = vrot.lane.b32.xlu0 %v2505_v4, %s2690_s25  ;;  %v2507_v46 = vpop.eup %2506 }
0x12d0   : > { %v801_v36 = vpop.permute.xlu0 %800  ;;  %v2509_v9 = vpop.eup %2508  ;;  %v1749_v47 = vadd.f32 1.0, %v2507_v46 }
0x12d1   : > { %1825 = vrot.lane.b32.xlu1 %v1782_v25, %s2690_s25  ;;  %v1751_v63 = vadd.f32 1.0, %v2509_v9  ;;  %vm805_vm4 = vcmp.eq.s32.totalorder %v801_v36, 1 }
0x12d2   : > { %v804_v55 = vpop.permute.xlu1 %803  ;;  %2510 = vrcp.f32 %v1749_v47  ;;  %v807_v30 = vsel %vm805_vm4, %v3072_v19, 0.0 }
0x12d3   : > { %1827 = vrot.lane.b32.xlu0 %v1783_v51, %s2690_s25  ;;  %2512 = vrcp.f32 %v1751_v63  ;;  %vm806_vm6 = vcmp.eq.s32.totalorder %v804_v55, 1  ;;  %v809_v19 = vadd.f32 %v807_v30, %v623_v27  ;;  %v811_v15 = vmax.f32 %v625_v29, %v807_v30 }
0x12d4   : > { %v942_v45 = vpop.permute.xlu0 %941  ;;  %v808_v8 = vsel %vm806_vm6, %v3074_v20, 0.0 }
0x12d5   : > { %vm944_vm10 = vcmp.eq.s32.totalorder %v942_v45, 1  ;;  %v810_v57 = vadd.f32 %v808_v8, %v624_v35 }
0x12d6   : > { %v939_v53 = vpop.permute.xlu1 %938  ;;  %v946_v49 = vsel %vm944_vm10, %v3097_v1, 0.0 }
0x12d7   : > { %vm943_vm5 = vcmp.eq.s32.totalorder %v939_v53, 1  ;;  %v954_v25 = vsel %vm952_vm8, %v946_v49, -inf  ;;  %v948_v51 = vadd.f32 %v946_v49, %v810_v57 }
0x12d8   : > { %v3383_v22 = vpop.permute.xlu0 %1085  ;;  %v945_v6 = vsel %vm943_vm5, %v3095_v0, 0.0  ;;  %v626_v0 = vld [vmem:[#allocation6 + $0x8] sm:$0xff]  ;;  %vm1816_vm5 = vcmp.eq.s32.totalorder %v3459_v21, 1 }
0x12d9   : > { %v953_v12 = vsel %vm952_vm8, %v945_v6, -inf  ;;  %vm1088_vm0 = vcmp.eq.s32.totalorder %v3383_v22, 1  ;;  %v947_v40 = vadd.f32 %v945_v6, %v809_v19  ;;  %v812_v42 = vmax.f32 %v626_v0, %v808_v8 }
0x12da   : > { %v1083_v5 = vpop.permute.xlu1 %1082  ;;  %v955_v60 = vmax.f32 %v811_v15, %v953_v12 }
0x12db   : > { %vm1087_vm7 = vcmp.eq.s32.totalorder %v1083_v5, 1  ;;  %v956_v2 = vmax.f32 %v812_v42, %v954_v25 }
0x12dc   : > { %v3412_v32 = vpop.permute.xlu0 %1229  ;;  %v1089_v11 = vsel %vm1087_vm7, %v3133_v54, 0.0  ;;  %v2511_v58 = vpop.eup %2510 }
0x12dd   : > { %v1097_v41 = vsel %vm1096_vm9, %v1089_v11, -inf  ;;  %vm1232_vm4 = vcmp.eq.s32.totalorder %v3412_v32, 1  ;;  %v1091_v3 = vadd.f32 %v1089_v11, %v947_v40  ;;  %v2513_v61 = vpop.eup %2512 }
0x12de   : > { %v1227_v50 = vpop.permute.xlu1 %1226  ;;  %v1099_v17 = vmax.f32 %v955_v60, %v1097_v41 }
0x12df   : > { %vm1231_vm12 = vcmp.eq.s32.totalorder %v1227_v50, 1 }
0x12e0   : > { %v3434_v18 = vpop.permute.xlu0 %1373  ;;  %v1233_v20 = vsel %vm1231_vm12, %v3171_v34, 0.0  ;;  %v1090_v34 = vsel %vm1088_vm0, %v3135_v31, 0.0 }
0x12e1   : > { %v1241_v43 = vsel %vm1240_vm11, %v1233_v20, -inf  ;;  %vm1376_vm7 = vcmp.eq.s32.totalorder %v3434_v18, 1  ;;  %v1235_v52 = vadd.f32 %v1233_v20, %v1091_v3  ;;  %v1098_v36 = vsel %vm1096_vm9, %v1090_v34, -inf }
0x12e2   : > { %v1371_v13 = vpop.permute.xlu1 %1370  ;;  %v1243_v53 = vmax.f32 %v1099_v17, %v1241_v43  ;;  %v1378_v45 = vsel %vm1376_vm7, %v3211_v26, 0.0  ;;  %v1092_v5 = vadd.f32 %v1090_v34, %v948_v51  ;;  %v1100_v46 = vmax.f32 %v956_v2, %v1098_v36 }
0x12e3   : > { %vm1375_vm15 = vcmp.eq.s32.totalorder %v1371_v13, 1  ;;  %v1386_v26 = vsel %vm1384_vm13, %v1378_v45, -inf }
0x12e4   : > { %v1518_v14 = vpop.permute.xlu0 %1517  ;;  %v1377_v1 = vsel %vm1375_vm15, %v3209_v37, 0.0  ;;  %v1234_v37 = vsel %vm1232_vm4, %v3173_v16, 0.0 }
0x12e5   : > { %v1385_v31 = vsel %vm1384_vm13, %v1377_v1, -inf  ;;  %vm1520_vm10 = vcmp.eq.s32.totalorder %v1518_v14, 1  ;;  %v1242_v22 = vsel %vm1240_vm11, %v1234_v37, -inf  ;;  %v1236_v13 = vadd.f32 %v1234_v37, %v1092_v5 }
0x12e6   : > { %v1515_v28 = vpop.permute.xlu1 %1514  ;;  %v1387_v50 = vmax.f32 %v1243_v53, %v1385_v31  ;;  %v1522_v9 = vsel %vm1520_vm10, %v3249_v10, 0.0  ;;  %v1244_v18 = vmax.f32 %v1100_v46, %v1242_v22 }
0x12e7   : > { %vm1519_vm3 = vcmp.eq.s32.totalorder %v1515_v28, 1  ;;  %v1380_v27 = vadd.f32 %v1378_v45, %v1236_v13  ;;  %v1530_v10 = vsel %vm1528_vm14, %v1522_v9, -inf }
0x12e8   : > { %v1521_v44 = vsel %vm1519_vm3, %v3247_v38, 0.0  ;;  %v1662_v4 = vpop.permute.xlu0 %1661  ;;  %v1379_v38 = vadd.f32 %v1377_v1, %v1235_v52  ;;  %v1388_v29 = vmax.f32 %v1244_v18, %v1386_v26 }
0x12e9   : > { %v1529_v16 = vsel %vm1528_vm14, %v1521_v44, -inf  ;;  %vm1664_vm8 = vcmp.eq.s32.totalorder %v1662_v4, 1  ;;  %v1524_v11 = vadd.f32 %v1522_v9, %v1380_v27 }
0x12ea   : > { %v1659_v54 = vpop.permute.xlu1 %1658  ;;  %v1523_v32 = vadd.f32 %v1521_v44, %v1379_v38  ;;  %v1531_v63 = vmax.f32 %v1387_v50, %v1529_v16  ;;  %v1666_v24 = vsel %vm1664_vm8, %v3280_v7, 0.0  ;;  %v1532_v33 = vmax.f32 %v1388_v29, %v1530_v10 }
0x12eb   : > { %vm1663_vm6 = vcmp.eq.s32.totalorder %v1659_v54, 1  ;;  %v1674_v7 = vsel %vm1672_vm1, %v1666_v24, -inf  ;;  %v1668_v14 = vadd.f32 %v1666_v24, %v1524_v11 }
0x12ec   : > { %v1665_v56 = vsel %vm1663_vm6, %v3278_v39, 0.0  ;;  %v1806_v62 = vpop.permute.xlu0 %1805  ;;  %v1676_v15 = vmax.f32 %v1532_v33, %v1674_v7 }
0x12ed   : > { %v1673_v39 = vsel %vm1672_vm1, %v1665_v56, -inf  ;;  %v1667_v28 = vadd.f32 %v1665_v56, %v1523_v32  ;;  %vm1808_vm11 = vcmp.eq.s32.totalorder %v1806_v62, 1 }
0x12ee   : > { %v1803_v55 = vpop.permute.xlu1 %1802  ;;  %v1675_v30 = vmax.f32 %v1531_v63, %v1673_v39 }
0x12ef   : > { %vm1807_vm9 = vcmp.eq.s32.totalorder %v1803_v55, 1 }
0x133f   : > { %v1789_v47 = vpop.permute.xlu1 %1788 }
0x1340   : > { %v1794_v59 = vmul.f32 %v2511_v58, %v1789_v47 }
0x1341   : > { %v1791_v0 = vpop.permute.xlu0 %1790 }
0x1342   : > { %v1809_v6 = vsel %vm1807_vm9, %v1794_v59, 0.0  ;;  %1821 = vst.msk [vmem:[#allocation3] sm:$0xff] %vm675_vm2, %v1794_v59  ;;  %v1795_v12 = vmul.f32 %v2513_v61, %v1791_v0 }
0x1343   : > { %v1811_v35 = vadd.f32 %v1809_v6, %v1667_v28  ;;  %v1817_v23 = vsel %vm1816_vm5, %v1809_v6, -inf  ;;  %v1826_v8 = vpop.permute.xlu1 %1825 }
0x1344   : > { %v1819_v19 = vmax.f32 %v1675_v30, %v1817_v23  ;;  %1831 = vst.msk [vmem:[#allocation4] sm:$0xff] %vm675_vm2, %v1826_v8  ;;  %v1810_v49 = vsel %vm1808_vm11, %v1795_v12, 0.0  ;;  %1822 = vst.msk [vmem:[#allocation3 + $0x8] sm:$0xff] %vm675_vm2, %v1795_v12 }
0x1345   : > { %1833 = vst.msk [vmem:[#allocation5] sm:$0xff] %vm675_vm2, %v1811_v35  ;;  %v1812_v20 = vadd.f32 %v1810_v49, %v1668_v14  ;;  %v1818_v48 = vsel %vm1816_vm5, %v1810_v49, -inf  ;;  %v1828_v54 = vpop.permute.xlu0 %1827 }
0x1346   : > { %1835 = vst.msk [vmem:[#allocation6] sm:$0xff] %vm675_vm2, %v1819_v19  ;;  %v1820_v57 = vmax.f32 %v1676_v15, %v1818_v48  ;;  %1832 = vst.msk [vmem:[#allocation4 + $0x8] sm:$0xff] %vm675_vm2, %v1828_v54 }
0x1347   : > { %1834 = vst.msk [vmem:[#allocation5 + $0x8] sm:$0xff] %vm675_vm2, %v1812_v20 }
0x1348   : > { %1836 = vst.msk [vmem:[#allocation6 + $0x8] sm:$0xff] %vm675_vm2, %v1820_v57 }
0x1349 PF: > { %p2090_p3 = scmp.ne.s32.totalorder %s2660_s29, 1 }
0x134a   : > { %p1841_p6 = scmp.gt.s32.totalorder (!%p2090_p3), %s2905_s9, 1  ;;  %s2691_s4 = smov (!%p2090_p3), 64   ;;  %vm1866_vm2 = vcmask (!%p2090_p3), 523264  }
0x134b   : > { %1840 = sbr.rel (%p2090_p3) target bundleno = 5065 (0x13c9), region = 60 }
0x134c   : > { %v1853_v1 = vld [vmem:[#allocation5] sm:$0xff] (!%p2090_p3) }
0x134d   : > { %v1847_v40 = vld [vmem:[#allocation6] sm:$0xff] (!%p2090_p3) }
0x134e   : > { %vm1849_vm12 = vcmp.gt.f32.partialorder (!%p2090_p3), %v1847_v40, -inf  ;;  %v1854_v43 = vld [vmem:[#allocation5 + $0x8] sm:$0xff] (!%p2090_p3) }
0x134f   : > { %v1848_v41 = vld [vmem:[#allocation6 + $0x8] sm:$0xff] (!%p2090_p3)  ;;  %v1851_v21 = vsel (!%p2090_p3), %vm1849_vm12, %v1847_v40, 0.0 }
0x1350   : > { %vm1850_vm13 = vcmp.gt.f32.partialorder (!%p2090_p3), %v1848_v41, -inf  ;;  %1860 = vrot.lane.b32.xlu0 (!%p2090_p3), %v1851_v21, %s2691_s4 }
0x1351   : > { %v1852_v58 = vsel (!%p2090_p3), %vm1850_vm13, %v1848_v41, 0.0 }
0x1352   : > { %s3660_s9 = smov (!%p1841_p6, %s2905_s9), 1 }
0x1353   : > { %s1843_s7 = scvt.s32.f32 %s3660_s9 }
0x1354   : > { %1862 = vrot.lane.b32.xlu0 %v1852_v58, %s2691_s4 }
0x1355   : > { %v1844_v42 = vstv %s1843_s7 }
0x1356   : > { %2520 = vrcp.f32 %v1844_v42 }
0x1360   : > { %v2521_v60 = vpop.eup %2520 }
0x1361   : > { %2162 = vpush %v2521_v60 }
0x1392   : > { %s2163_s29 = spop %2162 }
0x1393   : > { %v1855_v34 = vstv %s2163_s29 }
0x1394   : > { %v1856_v3 = vmul.f32 %v1855_v34, %v1853_v1  ;;  %v1857_v25 = vmul.f32 %v1855_v34, %v1854_v43 }
0x13c2   : > { %v1861_v61 = vpop.permute.xlu0 %1860 }
0x13c3   : > { %v1867_v17 = vsel %vm1866_vm2, %v1856_v3, %v1861_v61 }
0x13c4   : > { %1869 = vst [vmem:[%s2917_s14] sm:$0xff] %v1867_v17 }
0x13c6   : > { %v1863_v44 = vpop.permute.xlu0 %1862 }
0x13c7   : > { %v1868_v51 = vsel %vm1866_vm2, %v1857_v25, %v1863_v44 }
0x13c8   : > { %1870 = vst [vmem:[%s2917_s14 + $0x8] sm:$0xff] %v1868_v51 }
0x13c9 PF: > { %s2097_s9 = sshll.u32 %s2664_s0, 8  ;;  %s1885_s25 = sshll.u32 %s2917_s14, 4  ;;  %s3524_s25 = int_to_ptr.vmem [resolvable:$true] %s1885_s25 }
0x13ca   : > { %s3521_s15 = scalar_lea.hbm %s3595_s6, %s2097_s9  ;;  %s3528_s20 = scalar_lea.sflag [#allocation11], %s315_s30 }
0x13cb   : > { %s2550_s18 = scalar_lea.vmem %s3524_s25, 256  ;;  %p3636_p12 = scmp.ne.s32.totalorder %s3617_s21, 0 }
0x13cc   : > { %p2551_p7 = scmp.ne.s32.totalorder %s3524_s25, %s2550_s18  ;;  %s2692_s0 = smov [#allocation14]  }
0x13cd   : > { %s2554_s17 = sshll.u32 %s2692_s0, 4  ;;  %s2555_s17 = int_to_ptr.vmem [resolvable:$false] %s2554_s17 }
0x13ce   : > { %p2552_p4 = pnand %p2551_p7, %p3636_p12  ;;  %s2556_s22 = scalar_lea.vmem %s2555_s17, 512 }
0x13cf   : > { %p2557_p9 = scmp.lt.s32.totalorder %s3524_s25, %s2555_s17  ;;  %p2558_p11 = scmp.lt.s32.totalorder %s2556_s22, %s2550_s18 }
0x13d0   : > { %p2553_p5 = pneg %p2552_p4 }
0x13d1   : > { %p2559_p13 = por %p2558_p11, %p2557_p9 }
0x13d3   : > { %p2560_p0 = pnand %p2559_p13, %p2553_p5 }
0x13d5   : > { %2563 = shalt.err (!%p2560_p0)
}
0x13d6   : > { %s2564_s30 = scalar_lea.hbm %s3521_s15, 256  ;;  %s2568_s16 = scalar_lea.hbm %s3595_s6, 512 }
0x13d7   : > { %p2565_p1 = scmp.ne.s32.totalorder %s3521_s15, %s2564_s30  ;;  %p2569_p10 = scmp.lt.u32.totalorder %s3521_s15, %s3595_s6 }
0x13d8   : > { %p2570_p3 = scmp.lt.u32.totalorder %s2568_s16, %s2564_s30  ;;  %p2572_p7 = scmp.lt.u32.totalorder %s2564_s30, %s3521_s15 }
0x13d9   : > { %p2566_p2 = pnand %p2565_p1, %p3636_p12 }
0x13da   : > { %p2571_p6 = por %p2570_p3, %p2569_p10 }
0x13db   : > { %p2567_p8 = pneg %p2566_p2 }
0x13dc   : > { %p2573_p4 = por %p2572_p7, %p2571_p6 }
0x13de   : > { %p2574_p5 = pnand %p2573_p4, %p2567_p8 }
0x13e0   : > { %2577 = shalt.err (!%p2574_p5)
}
0x13e1   : > { %s2693_s10 = smov 128   ;;  %s2694_s4 = smov 8  }
0x13e2   : > { %2177 = dma.vmem_to_hbm [thread:$0]  (%p3636_p12), %s3524_s25, 256, %s3521_s15, %s3528_s20, %s2693_s10, %s2693_s10, %s2694_s4  }
0x13e3 PF: > { %s3637_s7 = sld [smem:[#allocation28_spill]]  ;;  %p2189_p9 = scmp.ge.s32.totalorder %s2676_s8, 2 }
0x13e4   : > { %s1900_s29 = sand.u32 1, %s2636_s23  }
0x13e5   : > { %s1901_s9 = scalar_lea.sflag [#allocation11], %s1900_s29 }
0x13e9   : > { %p3638_p11 = scmp.ne.s32.totalorder %s3637_s7, 0 }
0x13eb   : > { %p2184_p13 = pnand %p2189_p9, %p3638_p11 }
0x13ed   : > { %2631 = dma.done.wait (!%p2184_p13), %s1901_s9, 256  }
0x13ee   : > { %2633 = vsyncadd (!%p2184_p13), %s1901_s9, 4294967040  ;;  %s24_s8 = sadd.s32 1, %s2676_s8   ;;  %s3639_s11 = sld [smem:[#allocation21_spill]] }
0x13ef   : > { %p21_p0 = scmp.ge.s32.totalorder %s24_s8, 6   ;;  %s3640_s25 = sld [smem:[#allocation26_spill]] }
0x13f0   : > { %s3641_s21 = sld [smem:[#allocation27_spill]]  ;;  %s3642_s29 = sld [smem:[#allocation22_spill]] }
0x13f1   : > { %s3643_s0 = sld [smem:[#allocation23_spill]]  ;;  %s3644_s30 = sld [smem:[#allocation24_spill]] }
0x13f2   : > { %s3645_s7 = sld [smem:[#allocation25_spill]]  ;;  %s3646_s23 = smov %s2640_s24 }
0x13f3   : > { %s3648_s26 = smov %s2652_s27  ;;  %s3649_s27 = smov %s2656_s28 }
0x13f4   : > { %s3647_s24 = smov %s3639_s11  ;;  %23 = sbr.rel (!%p21_p0) target bundleno = 13 (0xd), region = 117 }
0x13f6   : > { %s3650_s28 = smov %s3641_s21 }
0x13fb   :  { %1906 = vsyncpa [#allocation10], 1 }
0x13fc   :  { %1908 = vsyncpa [#allocation10 + $0x1], 1 }
0x13fd   :  { %1909 = vsyncpa [#allocation13], 1 }
0x13fe   :  { %1910 = vsyncpa [#allocation11], 1 }
0x13ff   :  { %1912 = vsyncpa [#allocation11 + $0x1], 1 }

// kernel: tpu_custom_call.1
= control target key start
LH: loop header
LB: loop body
LE: loop exit
PB: predicated region body
PF: predicated region fallthrough
CT: control target
= control target key end

     0   :  { %s3589_s0 = inlined_call_operand.<no memory space> [shape: s32[1], index: 0, kind: input, shape index: {}]   ;;  %s3590_s1 = inlined_call_operand.hbm [shape: bf16[16,32,32], index: 1, kind: input, shape index: {}]   ;;  %s3591_s2 = inlined_call_operand.vmem [shape: s32[32,1], index: 2, kind: input, shape index: {}]   ;;  %s3592_s3 = inlined_call_operand.vmem [shape: bf16[32,256], index: 3, kind: input, shape index: {}]   ;;  %s3593_s4 = inlined_call_operand.hbm [shape: bf16[64,256], index: 4, kind: input, shape index: {}]   ;;  %s3594_s5 = inlined_call_operand.vmem [shape: f32[1,256], index: 5, kind: input, shape index: {}]   ;;  %s3595_s6 = inlined_call_operand.hbm [shape: f32[32,128], index: 6, kind: output, shape index: {}]  }
   0x1   :  { %3608 = sst [smem:[#allocation29_spill]] %s3593_s4 }
   0x2   :  { %11 = sst [smem:[#allocation8]] %s3589_s0 }
   0x3   :  { %12 = vsyncpa [#allocation10], 0 }
   0x4   :  { %14 = vsyncpa [#allocation10 + $0x1], 0 }
   0x5   :  { %15 = vsyncpa [#allocation13], 0 }
   0x6   :  { %16 = vsyncpa [#allocation11], 0 }
   0x7   :  { %18 = vsyncpa [#allocation11 + $0x1], 0  ;;  %s2733_s23 = smov 0   ;;  %s2735_s24 = smov 0  }
   0x8   :  { %s2737_s25 = smov 0   ;;  %s2739_s26 = smov 0  }
   0x9   :  { %s2741_s27 = smov 0   ;;  %s2743_s28 = smov 0  }
   0xa   :  { %s2745_s29 = smov 0   ;;  %s2747_s0 = smov 0  }
   0xb   :  { %s2749_s30 = smov 0   ;;  %s2751_s7 = smov 0  }
   0xc   :  { %s2753_s8 = smov 0  }
   0xd LB: > { %3609 = sst [smem:[#allocation21_spill]] %s2644_s25  ;;  %s2001_s9 = sadd.s32 4294967295, %s2676_s8   ;;  %s2676_s8 = sphi %s2753_s8, %s24_s8   ;;  %s2672_s7 = sphi %s2751_s7, %s3645_s7   ;;  %s2668_s30 = sphi %s2749_s30, %s3644_s30   ;;  %s2664_s0 = sphi %s2747_s0, %s3643_s0   ;;  %s2660_s29 = sphi %s2745_s29, %s3642_s29   ;;  %s2656_s28 = sphi %s2743_s28, %s3650_s28   ;;  %s2652_s27 = sphi %s2741_s27, %s3649_s27   ;;  %s2648_s26 = sphi %s2739_s26, %s3648_s26   ;;  %s2644_s25 = sphi %s2737_s25, %s3640_s25   ;;  %s2640_s24 = sphi %s2735_s24, %s3647_s24   ;;  %s2636_s23 = sphi %s2733_s23, %s3646_s23  }
   0xe   : > { %3610 = sst [smem:[#allocation22_spill]] %s2668_s30  ;;  %s2002_s10 = sadd.s32 4294967294, %s2676_s8  }
   0xf   : > { %3611 = sst [smem:[#allocation23_spill]] %s2672_s7  ;;  %s33_s11 = sadd.s32 1, %s2668_s30 }
  0x10   : > { %s36_s12 = sadd.s32 1, %s2672_s7  ;;  %p34_p0 = scmp.ge.s32.totalorder %s33_s11, 2 }
  0x11   : > { %s45_s13 = sadd.s32 1, %s2656_s28  ;;  %p52_p1 = scmp.ne.s32.totalorder %s2656_s28, %s2652_s27 }
  0x12   : > { %p53_p2 = scmp.eq.s32.totalorder %s2676_s8, 0  ;;  %s3652_s11 = smov (%p34_p0, %s33_s11), 0 }
  0x13   : > { %3612 = sst [smem:[#allocation24_spill]] %s3652_s11  ;;  %s3654_s12 = smov (!%p34_p0, %s36_s12), %s2672_s7 }
  0x14   : > { %s40_s14 = ssub.s32 %s2668_s30, %s3652_s11  ;;  %p2799_p3 = por %p53_p2, %p52_p1 }
  0x15   : > { %p38_p4 = scmp.ge.s32.totalorder %s3654_s12, 2  ;;  %p58_p5 = scmp.ne.s32.totalorder %s2652_s27, %s2648_s26 }
  0x16   : > { %s3613_s15 = scalar_select %p2799_p3, 1, 0 }
  0x17   : > { %p2804_p6 = scmp.eq.s32.totalorder %s2001_s9, 0  ;;  %s160_s17 = sadd.s32 1, %s2644_s25 }
  0x18   : > { %s3656_s12 = smov (%p38_p4, %s3654_s12), 0  ;;  %p170_p8 = scmp.ne.s32.totalorder %s2644_s25, %s2640_s24 }
  0x19   : > { %s3614_s16 = scalar_select %p2804_p6, 1, 0 }
  0x1a   : > { %3615 = sst [smem:[#allocation25_spill]] %s3656_s12  ;;  %p2813_p7 = por %p2804_p6, %p58_p5 }
  0x1b   : > { %s41_s19 = ssub.s32 %s2672_s7, %s3656_s12  ;;  %p171_p9 = scmp.eq.s32.totalorder %s2001_s9, 3 }
  0x1c   : > { %s3616_s18 = scalar_select %p2813_p7, 1, 0 }
  0x1d   : > { %s42_s20 = sor.u32 %s41_s19, %s40_s14  ;;  %p158_p10 = scmp.eq.s32.totalorder %s41_s19, 0 }
  0x1e   : > { %p43_p11 = scmp.eq.s32.totalorder %s42_s20, 0  ;;  %p2821_p12 = por %p171_p9, %p170_p8 }
  0x1f   : > { %s2826_s22 = scalar_select %p158_p10, %s2644_s25, %s160_s17  }
  0x20   : > { %s3617_s21 = scalar_select %p2821_p12, 1, 0 }
  0x21   : > { %3618 = sst [smem:[#allocation26_spill]] %s2826_s22  ;;  %p176_p13 = scmp.ne.s32.totalorder %s2640_s24, %s2636_s23 }
  0x22   : > { %s2829_s26 = scalar_select %p43_p11, %s2656_s28, %s45_s13  }
  0x23   : > { %p177_p0 = scmp.eq.s32.totalorder %s2002_s10, 3  ;;  %p2003_p1 = scmp.ge.s32.totalorder %s2676_s8, 1 }
  0x24   : > { %3619 = sst [smem:[#allocation27_spill]] %s2829_s26  ;;  %p184_p2 = scmp.lt.s32.totalorder %s2676_s8, 5 }
  0x25   : > { %p2835_p4 = por %p177_p0, %p176_p13  ;;  %s2678_s14 = smov [#allocation12]  }
  0x26   : > { %p2839_p5 = pnand %p2003_p1, %p184_p2  ;;  %s199_s19 = sshll.u32 %s2678_s14, 4  ;;  %s200_s19 = int_to_ptr.vmem [resolvable:$true] %s199_s19 }
  0x27   : > { %s3620_s11 = scalar_select %p2835_p4, 1, 0 }
  0x28   : > { %s3622_s9 = scalar_select %p2839_p5, 1, 0 }
  0x29   : > { %3621 = sst [smem:[#allocation28_spill]] %s3620_s11  ;;  %p2179_p8 = pneg %p2839_p5 }
  0x2a   : > { %s3624_s4 = sld [smem:[#allocation29_spill]] }
  0x2b   : > { %p2847_p9 = pnand %p2179_p8, %p2804_p6 }
  0x2d   : > { %p2524_p11 = pneg %p2847_p9 }
  0x30   : > { %s2522_s20 = scalar_lea.hbm %s3624_s4, 1024 }
  0x31   : > { %p2523_p10 = scmp.ne.s32.totalorder %s3624_s4, %s2522_s20  ;;  %p2529_p1 = scmp.lt.u32.totalorder %s2522_s20, %s3624_s4 }
  0x33   : > { %p2525_p13 = pnand %p2524_p11, %p2523_p10 }
  0x35   : > { %p2526_p0 = pneg %p2525_p13 }
  0x37   : > { %p2531_p2 = pnand %p2529_p1, %p2526_p0 }
  0x39   : > { %2534 = shalt.err (!%p2531_p2)
}
  0x3a   : > { %s2535_s25 = scalar_lea.vmem %s200_s19, 1024  ;;  %p2543_p6 = scmp.lt.s32.totalorder %s200_s19, %s200_s19 }
  0x3b   : > { %p2536_p8 = scmp.ne.s32.totalorder %s200_s19, %s2535_s25  ;;  %p2544_p7 = scmp.lt.s32.totalorder %s2535_s25, %s2535_s25 }
  0x3d   : > { %p2538_p4 = pnand %p2536_p8, %p2524_p11  ;;  %p2545_p5 = por %p2544_p7, %p2543_p6 }
  0x3f   : > { %p2539_p12 = pneg %p2538_p4 }
  0x41   : > { %p2546_p3 = pnand %p2545_p5, %p2539_p12 }
  0x43   : > { %2549 = shalt.err (!%p2546_p3)
}
  0x44   : > { %s2679_s12 = smov 128   ;;  %s2680_s26 = smov 8  }
  0x45   : > { %2182 = dma.hbm_to_vmem [thread:$0]  (!%p2847_p9), %s3624_s4, 1024, %s200_s19, [#allocation13], %s2679_s12, %s2679_s12, %s2680_s26  }
  0x46   : > { %p2005_p10 = scmp.ge.s32.totalorder %s2676_s8, 4 }
  0x48   : > { %212 = sbr.rel (%p2005_p10) target bundleno = 96 (0x60), region = 28 }
  0x4f   : > { %s216_s25 = sand.u32 1, %s2656_s28   ;;  %s2008_s22 = sshll.u32 %s2672_s7, 1 }
  0x50   : > { %s2006_s20 = sshll.u32 %s216_s25, 6  ;;  %s2096_s14 = sshll.u32 %s2668_s30, 5 }
  0x51   : > { %s227_s13 = sadd.s32 %s2096_s14, %s2008_s22  ;;  %s220_s11 = scalar_lea.vmem [#allocation9], %s2006_s20 }
  0x52   : > { %s242_s10 = sshll.u32 %s220_s11, 4  ;;  %s2010_s19 = sshll.u32 %s227_s13, 6  ;;  %s243_s10 = int_to_ptr.vmem [resolvable:$true] %s242_s10 }
  0x53   : > { %p3625_p3 = scmp.ne.s32.totalorder %s3613_s15, 0  ;;  %s2681_s26 = smov 256  }
  0x54   : > { %s2682_s4 = smov 128   ;;  %s2683_s7 = smov 2  }
  0x55   : > { %s2166_s12 = scalar_select %p3625_p3, [#allocation0], [#allocation17] }
  0x56   : > { %2167 = sst [smem:[#allocation16]] (%p3625_p3), %s2681_s26  ;;  %s2684_s22 = smov 64  }
  0x57   : > { %s234_s17 = sld [smem:[%s2166_s12]]   ;;  %s229_s14 = scalar_lea.hbm %s3590_s1, %s2010_s19 }
  0x58   : > { %2168 = sst [smem:[#allocation16 + $0x1]] (%p3625_p3), %s2682_s4  ;;  %s2685_s13 = smov 4  }
  0x59   : > { %2169 = sst [smem:[#allocation16 + $0x2]] (%p3625_p3), %s2683_s7  ;;  %s217_s30 = scalar_lea.sflag [#allocation10], %s216_s25 }
  0x5a   : > { %2170 = sst [smem:[#allocation16 + $0x3]] (%p3625_p3), %s2684_s22  ;;  %s2686_s4 = smov [#allocation15]  }
  0x5b   : > { %2171 = sst [smem:[#allocation16 + $0x4]] (%p3625_p3), %s2684_s22 }
  0x5c   : > { %2172 = sst [smem:[#allocation16 + $0x5]] (%p3625_p3), %s2685_s13 }
  0x5d   : > { %s2011_s12 = sshll.u32 %s234_s17, 26 }
  0x5e   : > { %s2012_s26 = sadd.s32 134217728, %s2011_s12 }
  0x5f   : > { %2173 = dma.general (%p3625_p3), %s229_s14, 1024, %s243_s10, %s217_s30, %s2686_s4, [#allocation16], %s2012_s26, 0  }
  0x60 PF: > { %p3626_p6 = scmp.ne.s32.totalorder %s3622_s9, 0 }
  0x61   : > { %s278_s7 = sand.u32 (!%p3626_p6), 1, %s2652_s27   ;;  %p3627_p7 = scmp.ne.s32.totalorder (!%p3626_p6), %s3616_s18, 0 }
  0x62   : > { %276 = sbr.rel (%p3626_p6) target bundleno = 5091 (0x13e3), region = 40  ;;  %s2014_s11 = sshll.u32 (!%p3626_p6), %s278_s7, 6 }
  0x63   : > { %s279_s19 = scalar_lea.sflag (!%p3626_p6), [#allocation10], %s278_s7  ;;  %s2893_s20 = scalar_lea.vmem (!%p3626_p6), [#allocation9], %s2014_s11 }
  0x69   : > { %2623 = dma.done.wait (%p3627_p7), %s279_s19, 1024  }
  0x6a   : > { %2625 = vsyncadd (%p3627_p7), %s279_s19, 4294966272  ;;  %p3628_p12 = scmp.ne.s32.totalorder %s3614_s16, 0 }
  0x6c   : > { %2627 = dma.done.wait (%p3628_p12), [#allocation13], 1024  }
  0x6d   : > { %2629 = vsyncadd (%p3628_p12), [#allocation13], 4294966272  ;;  %s315_s30 = sand.u32 1, %s2640_s24   ;;  %s2017_s15 = sshll.u32 %s2664_s0, 1 }
  0x6e   : > { %s2905_s9 = sld [smem:[#allocation8]]  ;;  %s2016_s25 = sshll.u32 %s315_s30, 4 }
  0x6f   : > { %p321_p4 = scmp.lt.s32.totalorder %s2017_s15, 3  ;;  %s2910_s10 = sshll.u32 %s2660_s29, 3 }
  0x70   : > { %s2917_s14 = scalar_lea.vmem [#allocation14], %s2016_s25  ;;  %p2020_p5 = scmp.ne.s32.totalorder %s2660_s29, 0 }
  0x71   : > { %s3658_s15 = smov (!%p321_p4, %s2017_s15), 3  ;;  %vm334_vm0 = vcmask (!%p2020_p5), 523264   ;;  %v2687_v0 = vmov (!%p2020_p5), 0.0   ;;  %v2688_v1 = vmov (!%p2020_p5), -inf  }
  0x72   : > { %s2018_s18 = sshll.u32 %s3658_s15, 3  ;;  %333 = sbr.rel (%p2020_p5) target bundleno = 121 (0x79), region = 52  ;;  %335 = vst.msk [vmem:[#allocation3] sm:$0xff] (!%p2020_p5), %vm334_vm0, %v2687_v0  ;;  %336 = vst.msk [vmem:[#allocation3 + $0x8] sm:$0xff] (!%p2020_p5), %vm334_vm0, %v2687_v0 }
  0x73   : > { %s2915_s16 = scalar_lea.vmem %s3591_s2, %s2018_s18  ;;  %337 = vst.msk [vmem:[#allocation4] sm:$0xff] (!%p2020_p5), %vm334_vm0, %v2687_v0  ;;  %338 = vst.msk [vmem:[#allocation4 + $0x8] sm:$0xff] (!%p2020_p5), %vm334_vm0, %v2687_v0 }
  0x74   : > { %339 = vst.msk [vmem:[#allocation5] sm:$0xff] (!%p2020_p5), %vm334_vm0, %v2687_v0  ;;  %340 = vst.msk [vmem:[#allocation5 + $0x8] sm:$0xff] (!%p2020_p5), %vm334_vm0, %v2687_v0 }
  0x75   : > { %341 = vst.msk [vmem:[#allocation6] sm:$0xff] (!%p2020_p5), %vm334_vm0, %v2688_v1  ;;  %342 = vst.msk [vmem:[#allocation6 + $0x8] sm:$0xff] (!%p2020_p5), %vm334_vm0, %v2688_v1 }
  0x79 PF: > { %p2021_p9 = scmp.ge.s32.totalorder %s2910_s10, %s2905_s9 }
  0x7a   : > { %v2296_v2 = vld [vmem:[%s3592_s3 + $0x4] ss:$8 sps:$4 sm:$0xff] (!%p2021_p9)   ;;  %v2298_v3 = vld [vmem:[%s3592_s3] ss:$8 sps:$4 sm:$0xff] (!%p2021_p9)   ;;  %v2689_v4 = vmov (!%p2021_p9), 0   ;;  %vm439_vm1 = vcmask (!%p2021_p9), 261120   ;;  %v369_v48 = vlaneseq (!%p2021_p9) }
  0x7b   : > { %346 = sbr.rel (%p2021_p9) target bundleno = 4937 (0x1349), region = 56  ;;  %496 = vmatprep.mubr.bf16.mxu1 (!%p2021_p9), %v2689_v4  ;;  %1001 = vmatprep.mubr.bf16.mxu0 (!%p2021_p9), %v2689_v4  ;;  %v2299_v5 = vld [vmem:[%s3592_s3 + $0x14] ss:$8 sps:$4 sm:$0xff] (!%p2021_p9)   ;;  %v2301_v6 = vld [vmem:[%s3592_s3 + $0x10] ss:$8 sps:$4 sm:$0xff] (!%p2021_p9)   ;;  %v2302_v9 = vld [vmem:[%s2893_s20] sm:$0xff] (!%p2021_p9)  }
  0x7c   : > { %464 = vmatprep.subr.bf16.mxu1 (!%p2021_p9), %v2296_v2  ;;  %2294 = vset.pattern.permute.xlu0 (!%p2021_p9), %v2689_v4  ;;  %v2938_v7 = vld [vmem:[#allocation12 + $0x4] ss:$8 sps:$4 sm:$0xff] (!%p2021_p9)   ;;  %v2940_v8 = vld [vmem:[#allocation12] ss:$8 sps:$4 sm:$0xff] (!%p2021_p9)   ;;  %v2944_v10 = vld [vmem:[#allocation12 + $0x14] ss:$8 sps:$4 sm:$0xff] (!%p2021_p9)  }
  0x7d   : > { %465 = vmatpush1.bf16.msra.mxu1 (!%p2021_p9), %v2298_v3  ;;  %2295 = vset.pattern.permute.xlu1 (!%p2021_p9), %v2689_v4  ;;  %v2950_v11 = vld [vmem:[#allocation12 + $0x10] ss:$8 sps:$4 sm:$0xff] (!%p2021_p9)   ;;  %v2954_v12 = vld [vmem:[#allocation12 + $0x24] ss:$8 sps:$4 sm:$0xff] (!%p2021_p9)   ;;  %v2960_v14 = vld [vmem:[#allocation12 + $0x20] ss:$8 sps:$4 sm:$0xff] (!%p2021_p9)  }
  0x7e   : > { %466 = vmatprep.subr.bf16.mxu1 (!%p2021_p9), %v2299_v5  ;;  %969 = vmatprep.subr.bf16.mxu0 (!%p2021_p9), %v2938_v7  ;;  %v2306_v13 = vld [vmem:[%s2893_s20 + $0x8] sm:$0xff] (!%p2021_p9)   ;;  %v2963_v15 = vld [vmem:[#allocation12 + $0x34] ss:$8 sps:$4 sm:$0xff] (!%p2021_p9)   ;;  %s2690_s25 = smov (!%p2021_p9), 64   ;;  %v2970_v17 = vld [vmem:[#allocation12 + $0x30] ss:$8 sps:$4 sm:$0xff] (!%p2021_p9)  }
  0x7f   : > { %970 = vmatpush1.bf16.msra.mxu0 (!%p2021_p9), %v2940_v8  ;;  %v621_v16 = vld [vmem:[#allocation4] sm:$0xff] (!%p2021_p9)  ;;  %v622_v18 = vld [vmem:[#allocation4 + $0x8] sm:$0xff] (!%p2021_p9)  ;;  %v2312_v21 = vld [vmem:[%s2893_s20 + $0x20] sm:$0xff] (!%p2021_p9)   ;;  %vm675_vm2 = vcmask (!%p2021_p9), 523264   ;;  %v370_v49 = vshrl.u32 (!%p2021_p9), %v369_v48, 7  ;;  %s813_s17 = sadd.s32 (!%p2021_p9), 1, %s2910_s10 }
  0x80   : > { %971 = vmatprep.subr.bf16.mxu0 (!%p2021_p9), %v2944_v10  ;;  %754 = vrot.lane.b32.xlu1 (!%p2021_p9), %v621_v16, %s2690_s25  ;;  %v2307_v19 = vld [vmem:[%s2893_s20 + $0x10] sm:$0xff] (!%p2021_p9)   ;;  %v2311_v20 = vld [vmem:[%s2893_s20 + $0x18] sm:$0xff] (!%p2021_p9)   ;;  %v2316_v22 = vld [vmem:[%s2893_s20 + $0x28] sm:$0xff] (!%p2021_p9)   ;;  %s957_s22 = sadd.s32 (!%p2021_p9), 2, %s2910_s10  ;;  %s1101_s13 = sadd.s32 (!%p2021_p9), 3, %s2910_s10 }
  0x81   : > { %467 = vmatpush1.bf16.msra.mxu1 (!%p2021_p9), %v2301_v6  ;;  %v2317_v23 = vld [vmem:[%s2893_s20 + $0x30] sm:$0xff] (!%p2021_p9)   ;;  %v2321_v24 = vld [vmem:[%s2893_s20 + $0x38] sm:$0xff] (!%p2021_p9)   ;;  %v619_v25 = vld [vmem:[#allocation3] sm:$0xff] (!%p2021_p9)  ;;  %v375_v54 = vsub.s32 (!%p2021_p9), 1, %v370_v49  ;;  %v371_v1 = vsub.s32 (!%p2021_p9), 0, %v370_v49  ;;  %s1389_s12 = sadd.s32 (!%p2021_p9), 5, %s2910_s10  ;;  %p3372_p11 = scmp.lt.s32.totalorder (!%p2021_p9), %s813_s17, %s2905_s9 }
  0x82   : > { %679 = vmatprep.subr.bf16.mxu1 %v2938_v7  ;;  %v620_v26 = vld [vmem:[#allocation3 + $0x8] sm:$0xff]  ;;  %v367_v55 = vld [vmem:[%s3594_s5] sm:$0x3]  ;;  %s1533_s26 = sadd.s32 6, %s2910_s10  ;;  %s1677_s4 = sadd.s32 7, %s2910_s10 }
  0x83   : > { %972 = vmatpush1.bf16.msra.mxu0 %v2950_v11  ;;  %v634_v27 = vpack.c.bf16 %v620_v26, %v619_v25  ;;  %v3058_v56 = vrot.slane %v367_v55, %v375_v54  ;;  %v3064_v2 = vrot.slane %v367_v55, %v371_v1  ;;  %p3379_p13 = scmp.lt.s32.totalorder %s957_s22, %s2905_s9  ;;  %p3390_p0 = scmp.lt.s32.totalorder %s1101_s13, %s2905_s9 }
  0x84   : > { %2034 = vmatmul.mubr.msk.bf16.vlgmr.msra.gmra.mrb[0].mxu1 %vm439_vm1, %v2302_v9  ;;  %973 = vmatprep.subr.bf16.mxu0 %v2954_v12  ;;  %s950_s19 = scalar_select %p3372_p11, 1, 0 }
  0x85   : > { %680 = vmatpush1.bf16.msra.mxu1 %v2940_v8  ;;  %506 = vmatprep.mubr.bf16.mxu1 %v2689_v4  ;;  %s1094_s20 = scalar_select %p3379_p13, 1, 0 }
  0x86   : > { %681 = vmatprep.subr.bf16.mxu1 %v2944_v10  ;;  %756 = vrot.lane.b32.xlu1 %v622_v18, %s2690_s25  ;;  %p3406_p2 = scmp.lt.s32.totalorder %s1389_s12, %s2905_s9  ;;  %p3419_p8 = scmp.lt.s32.totalorder %s1533_s26, %s2905_s9 }
  0x87   : > { %974 = vmatpush1.bf16.msra.mxu0 %v2960_v14  ;;  %p3428_p10 = scmp.lt.s32.totalorder %s1677_s4, %s2905_s9 }
  0x88   : > { %975 = vmatprep.subr.bf16.mxu0 %v2963_v15 }
  0x89   : > { %682 = vmatpush1.bf16.msra.mxu1 %v2950_v11 }
  0x8a   : > { %683 = vmatprep.subr.bf16.mxu1 %v2954_v12 }
  0x8b   : > { %976 = vmatpush1.bf16.msra.mxu0 %v2970_v17 }
  0x8c   : > { %2035 = vmatmul.mubr.msk.bf16.gmra.mrb[4].mxu1 %vm439_vm1, %v2306_v13  ;;  %1113 = vmatprep.subr.bf16.mxu0 %v2938_v7 }
  0x8d   : > { %516 = vmatprep.mubr.bf16.mxu1 %v2689_v4  ;;  %684 = vmatpush1.bf16.msra.mxu1 %v2960_v14 }
  0x8e   : > { %685 = vmatprep.subr.bf16.mxu1 %v2963_v15 }
  0x91   : > { %686 = vmatpush1.bf16.msra.mxu1 %v2970_v17 }
  0x92   : > { %825 = vmatprep.subr.bf16.mxu1 %v2938_v7 }
  0x94   : > { %2036 = vmatmul.mubr.msk.bf16.gmra.mrb[8].mxu1 %vm439_vm1, %v2307_v19 }
  0x95   : > { %526 = vmatprep.mubr.bf16.mxu1 %v2689_v4 }
  0x9c   : > { %2037 = vmatmul.mubr.msk.bf16.gmra.mrb[12].mxu1 %vm439_vm1, %v2311_v20 }
  0x9d   : > { %536 = vmatprep.mubr.bf16.mxu1 %v2689_v4 }
  0xa4   : > { %2038 = vmatmul.mubr.msk.bf16.gmra.mrb[16].mxu1 %vm439_vm1, %v2312_v21 }
  0xa5   : > { %546 = vmatprep.mubr.bf16.mxu1 %v2689_v4 }
  0xac   : > { %2039 = vmatmul.mubr.msk.bf16.gmra.mrb[20].mxu1 %vm439_vm1, %v2316_v22 }
  0xad   : > { %556 = vmatprep.mubr.bf16.mxu1 %v2689_v4 }
  0xb4   : > { %2040 = vmatmul.mubr.msk.bf16.gmra.mrb[24].mxu1 %vm439_vm1, %v2317_v23 }
  0xb5   : > { %566 = vmatprep.mubr.bf16.mxu1 %v2689_v4 }
  0xbc   : > { %2041 = vmatmul.mubr.msk.bf16.gmra.mrb[28].mxu1 %vm439_vm1, %v2321_v24 }
  0xbd   : > { %711 = vmatprep.mubr.bf16.mxu1 %v2689_v4 }
  0xc4   : > { %2050 = vmatmul.mubr.msk.bf16.vlgmr.msra.gmra.mrb[0].mxu1 %vm675_vm2, %v634_v27 }
  0xc5   : > { %826 = vmatpush1.bf16.msra.mxu1 %v2940_v8  ;;  %857 = vmatprep.mubr.bf16.mxu1 %v2689_v4 }
  0xc6   : > { %827 = vmatprep.subr.bf16.mxu1 %v2944_v10 }
  0xc9   : > { %828 = vmatpush1.bf16.msra.mxu1 %v2950_v11 }
  0xca   : > { %829 = vmatprep.subr.bf16.mxu1 %v2954_v12 }
  0xcd   : > { %830 = vmatpush1.bf16.msra.mxu1 %v2960_v14 }
  0xce   : > { %831 = vmatprep.subr.bf16.mxu1 %v2963_v15 }
  0xd1   : > { %832 = vmatpush1.bf16.msra.mxu1 %v2970_v17 }
  0xf2   : > { %v755_v26 = vpop.permute.xlu1 %754 }
  0xf8   : > { %v757_v49 = vpop.permute.xlu1 %756 }
 0x167   : > { %v3007_v28 = vpop.f32.mrb[8].mxu1 }
 0x168   : > { %v3009_v29 = vpop.f32.mrb[9].mxu1 }
 0x169   : > { %v3011_v30 = vpop.f32.mrb[10].mxu1 }
 0x16a   : > { %v3013_v31 = vpop.f32.mrb[11].mxu1 }
 0x16f   : > { %v3015_v32 = vpop.f32.mrb[12].mxu1 }
 0x170   : > { %v3017_v33 = vpop.f32.mrb[13].mxu1 }
 0x171   : > { %v3019_v34 = vpop.f32.mrb[14].mxu1 }
 0x172   : > { %v3021_v35 = vpop.f32.mrb[15].mxu1 }
 0x177   : > { %v3023_v36 = vpop.f32.mrb[16].mxu1 }
 0x178   : > { %v3025_v37 = vpop.f32.mrb[17].mxu1 }
 0x179   : > { %v3027_v38 = vpop.f32.mrb[18].mxu1 }
 0x17a   : > { %v3029_v39 = vpop.f32.mrb[19].mxu1 }
 0x17f   : > { %v3031_v40 = vpop.f32.mrb[20].mxu1 }
 0x180   : > { %v3033_v41 = vpop.f32.mrb[21].mxu1 }
 0x181   : > { %v3035_v42 = vpop.f32.mrb[22].mxu1 }
 0x182   : > { %v3037_v43 = vpop.f32.mrb[23].mxu1 }
 0x187   : > { %v3039_v44 = vpop.f32.mrb[24].mxu1 }
 0x188   : > { %v3041_v45 = vpop.f32.mrb[25].mxu1 }
 0x189   : > { %v3043_v46 = vpop.f32.mrb[26].mxu1 }
 0x18a   : > { %v3045_v47 = vpop.f32.mrb[27].mxu1 }
 0x18f   : > { %v3047_v50 = vpop.f32.mrb[28].mxu1 }
 0x190   : > { %v3049_v51 = vpop.f32.mrb[29].mxu1 }
 0x191   : > { %v3051_v52 = vpop.f32.mrb[30].mxu1 }
 0x192   : > { %v3053_v53 = vpop.f32.mrb[31].mxu1 }
 0x197   : > { %v713_v57 = vpop.f32.mrb[0].mxu1 }
 0x198   : > { %v715_v58 = vpop.f32.mrb[1].mxu1  ;;  %v2098_v3 = vadd.f32 %v713_v57, %v3064_v2 }
 0x199   : > { %v2099_v59 = vadd.f32 %v715_v58, %v3058_v56  ;;  %v717_v60 = vpop.f32.mrb[2].mxu1 }
 0x19a   : > { %v719_v61 = vpop.f32.mrb[3].mxu1  ;;  %v2051_v5 = vmul.f32 -1.442695, %v2098_v3  ;;  %v2100_v6 = vadd.f32 %v717_v60, %v3064_v2 }
 0x19b   : > { %2322 = vtanh.f32 %v2099_v59  ;;  %v2101_v62 = vadd.f32 %v719_v61, %v3058_v56 }
 0x19c   : > { %v2053_v9 = vmul.f32 -1.442695, %v2100_v6 }
 0x19d   : > { %2324 = vtanh.f32 %v2101_v62 }
 0x19e   : > { %2326 = vpow2.f32 %v2051_v5 }
 0x19f   : > { %2328 = vpow2.f32 %v2053_v9 }
 0x1a5   : > { %v2323_v63 = vpop.eup %2322 }
 0x1a6   : > { %764 = vrot.lane.b32.xlu0 %v2323_v63, %s2690_s25  ;;  %v2052_v63 = vmul.f32 -1.442695, %v2099_v59 }
 0x1a7   : > { %v2325_v0 = vpop.eup %2324 }
 0x1a8   : > { %v2327_v13 = vpop.eup %2326 }
 0x1a9   : > { %v738_v16 = vadd.f32 1.0, %v2327_v13  ;;  %v2329_v18 = vpop.eup %2328 }
 0x1aa   : > { %766 = vrot.lane.b32.xlu0 %v2325_v0, %s2690_s25  ;;  %v740_v19 = vadd.f32 1.0, %v2329_v18  ;;  %v2054_v0 = vmul.f32 -1.442695, %v2101_v62 }
 0x1ab   : > { %2330 = vrcp.f32 %v738_v16 }
 0x1ac   : > { %2332 = vrcp.f32 %v740_v19 }
 0x1b5   : > { %v2331_v20 = vpop.eup %2330 }
 0x1b6   : > { %v2333_v23 = vpop.eup %2332  ;;  %v760_v27 = vmul.f32 %v2331_v20, %v755_v26 }
 0x1b7   : > { %v761_v55 = vmul.f32 %v2333_v23, %v757_v49 }
 0x218   : > { %v765_v21 = vpop.permute.xlu0 %764 }
 0x219   : > { %v770_v22 = vmul.f32 %v2331_v20, %v765_v21 }
 0x21b   : > { %774 = vrot.lane.b32.xlu0 %v770_v22, %s2690_s25 }
 0x21c   : > { %v767_v24 = vpop.permute.xlu0 %766 }
 0x21d   : > { %v771_v25 = vmul.f32 %v2333_v23, %v767_v24 }
 0x21f   : > { %776 = vrot.lane.b32.xlu1 %v771_v25, %s2690_s25 }
 0x28d   : > { %v775_v48 = vpop.permute.xlu0 %774 }
 0x28e   : > { %v780_v54 = vadd.f32 %v775_v48, %v760_v27 }
 0x290   : > { %2334 = vtanh.f32 %v780_v54 }
 0x291   : > { %v777_v57 = vpop.permute.xlu1 %776 }
 0x292   : > { %v781_v58 = vadd.f32 %v777_v57, %v761_v55 }
 0x294   : > { %2336 = vtanh.f32 %v781_v58 }
 0x295   : > { %2338 = vpow2.f32 %v2052_v63 }
 0x296   : > { %2340 = vpow2.f32 %v2054_v0 }
 0x29a   : > { %v2335_v60 = vpop.eup %2334 }
 0x29b   : > { %786 = vrot.lane.b32.xlu0 %v2335_v60, %s2690_s25 }
 0x29e   : > { %v2337_v61 = vpop.eup %2336 }
 0x29f   : > { %788 = vrot.lane.b32.xlu1 %v2337_v61, %s2690_s25  ;;  %v2339_v1 = vpop.eup %2338 }
 0x2a0   : > { %v2341_v3 = vpop.eup %2340  ;;  %v739_v5 = vadd.f32 1.0, %v2339_v1 }
 0x2a1   : > { %v741_v6 = vadd.f32 1.0, %v2341_v3 }
 0x2a2   : > { %2342 = vrcp.f32 %v739_v5 }
 0x2a3   : > { %2344 = vrcp.f32 %v741_v6 }
 0x2ac   : > { %v2343_v13 = vpop.eup %2342 }
 0x2ad   : > { %v2345_v16 = vpop.eup %2344 }
 0x30d   : > { %v787_v9 = vpop.permute.xlu0 %786 }
 0x30e   : > { %v3072_v19 = vmul.f32 %v2343_v13, %v787_v9 }
 0x311   : > { %v789_v18 = vpop.permute.xlu1 %788 }
 0x312   : > { %v3074_v20 = vmul.f32 %v2345_v16, %v789_v18 }
 0x314   : > { %v821_v59 = vpack.c.bf16 %v3074_v20, %v3072_v19 }
 0x316   : > { %2055 = vmatmul.mubr.msk.bf16.vlgmr.msra.gmra.mrb[4].mxu1 %vm675_vm2, %v821_v59 }
 0x3e9   : > { %v859_v62 = vpop.f32.mrb[4].mxu1 }
 0x3ea   : > { %v861_v21 = vpop.f32.mrb[5].mxu1  ;;  %v2102_v48 = vadd.f32 %v859_v62, %v3064_v2 }
 0x3eb   : > { %v2103_v22 = vadd.f32 %v861_v21, %v3058_v56  ;;  %v863_v23 = vpop.f32.mrb[6].mxu1 }
 0x3ec   : > { %v865_v24 = vpop.f32.mrb[7].mxu1  ;;  %v2056_v49 = vmul.f32 -1.442695, %v2102_v48  ;;  %v2104_v55 = vadd.f32 %v863_v23, %v3064_v2 }
 0x3ed   : > { %2346 = vtanh.f32 %v2103_v22  ;;  %v2105_v25 = vadd.f32 %v865_v24, %v3058_v56 }
 0x3ee   : > { %v2058_v57 = vmul.f32 -1.442695, %v2104_v55 }
 0x3ef   : > { %2348 = vtanh.f32 %v2105_v25  ;;  %v2059_v48 = vmul.f32 -1.442695, %v2105_v25  ;;  %v519_v25 = vadd.f32 %v3007_v28, %v3064_v2 }
 0x3f0   : > { %2350 = vpow2.f32 %v2056_v49 }
 0x3f1   : > { %2352 = vpow2.f32 %v2058_v57 }
 0x3f7   : > { %v2347_v26 = vpop.eup %2346 }
 0x3f8   : > { %902 = vrot.lane.b32.xlu0 %v2347_v26, %s2690_s25 }
 0x3f9   : > { %v2349_v27 = vpop.eup %2348 }
 0x3fa   : > { %904 = vrot.lane.b32.xlu1 %v2349_v27, %s2690_s25  ;;  %v2351_v60 = vpop.eup %2350  ;;  %v2057_v27 = vmul.f32 -1.442695, %v2103_v22 }
 0x3fb   : > { %v884_v61 = vadd.f32 1.0, %v2351_v60  ;;  %v2353_v63 = vpop.eup %2352 }
 0x3fc   : > { %v886_v0 = vadd.f32 1.0, %v2353_v63 }
 0x3fd   : > { %2354 = vrcp.f32 %v884_v61 }
 0x3fe   : > { %2356 = vrcp.f32 %v886_v0 }
 0x407   : > { %v2355_v1 = vpop.eup %2354 }
 0x408   : > { %v2357_v6 = vpop.eup %2356  ;;  %v898_v16 = vmul.f32 %v2355_v1, %v780_v54 }
 0x409   : > { %v899_v62 = vmul.f32 %v2357_v6, %v781_v58 }
 0x46a   : > { %v903_v3 = vpop.permute.xlu0 %902 }
 0x46b   : > { %v908_v5 = vmul.f32 %v2355_v1, %v903_v3  ;;  %v521_v3 = vadd.f32 %v3009_v29, %v3058_v56 }
 0x46c   : > { %v905_v9 = vpop.permute.xlu1 %904 }
 0x46d   : > { %912 = vrot.lane.b32.xlu0 %v908_v5, %s2690_s25  ;;  %v909_v13 = vmul.f32 %v2357_v6, %v905_v9  ;;  %v523_v6 = vadd.f32 %v3011_v30, %v3064_v2 }
 0x46f   : > { %914 = vrot.lane.b32.xlu1 %v909_v13, %s2690_s25 }
 0x4df   : > { %v913_v18 = vpop.permute.xlu0 %912 }
 0x4e0   : > { %v3087_v59 = vadd.f32 %v913_v18, %v898_v16  ;;  %v525_v16 = vadd.f32 %v3013_v31, %v3058_v56 }
 0x4e1   : > { %v915_v21 = vpop.permute.xlu1 %914 }
 0x4e2   : > { %2358 = vtanh.f32 %v3087_v59  ;;  %v3090_v23 = vadd.f32 %v915_v21, %v899_v62 }
 0x4e4   : > { %2360 = vtanh.f32 %v3090_v23 }
 0x4e5   : > { %2362 = vpow2.f32 %v2057_v27 }
 0x4e6   : > { %2364 = vpow2.f32 %v2059_v48 }
 0x4ec   : > { %v2359_v24 = vpop.eup %2358 }
 0x4ed   : > { %924 = vrot.lane.b32.xlu0 %v2359_v24, %s2690_s25 }
 0x4ee   : > { %v2361_v26 = vpop.eup %2360 }
 0x4ef   : > { %926 = vrot.lane.b32.xlu1 %v2361_v26, %s2690_s25  ;;  %v2363_v54 = vpop.eup %2362 }
 0x4f0   : > { %v2365_v49 = vpop.eup %2364  ;;  %v885_v55 = vadd.f32 1.0, %v2363_v54 }
 0x4f1   : > { %v887_v57 = vadd.f32 1.0, %v2365_v49 }
 0x4f2   : > { %2366 = vrcp.f32 %v885_v55 }
 0x4f3   : > { %2368 = vrcp.f32 %v887_v57 }
 0x4fc   : > { %v2367_v60 = vpop.eup %2366 }
 0x4fd   : > { %v2369_v61 = vpop.eup %2368 }
 0x55f   : > { %v925_v58 = vpop.permute.xlu0 %924 }
 0x560   : > { %v3095_v0 = vmul.f32 %v2367_v60, %v925_v58 }
 0x561   : > { %v927_v63 = vpop.permute.xlu1 %926 }
 0x562   : > { %v3097_v1 = vmul.f32 %v2369_v61, %v927_v63 }
 0x564   : > { %v965_v22 = vpack.c.bf16 %v3097_v1, %v3095_v0 }
 0x566   : > { %2060 = vmatmul.mubr.msk.bf16.vlgmr.msra.gmra.mrb[0].mxu0 %vm675_vm2, %v965_v22 }
 0x567   : > { %1114 = vmatpush1.bf16.msra.mxu0 %v2940_v8  ;;  %1145 = vmatprep.mubr.bf16.mxu0 %v2689_v4 }
 0x568   : > { %1115 = vmatprep.subr.bf16.mxu0 %v2944_v10 }
 0x56b   : > { %1116 = vmatpush1.bf16.msra.mxu0 %v2950_v11 }
 0x56c   : > { %1117 = vmatprep.subr.bf16.mxu0 %v2954_v12 }
 0x56f   : > { %1118 = vmatpush1.bf16.msra.mxu0 %v2960_v14 }
 0x570   : > { %1119 = vmatprep.subr.bf16.mxu0 %v2963_v15 }
 0x573   : > { %1120 = vmatpush1.bf16.msra.mxu0 %v2970_v17 }
 0x574   : > { %1257 = vmatprep.subr.bf16.mxu0 %v2938_v7 }
 0x639   : > { %v1003_v5 = vpop.f32.mrb[0].mxu0 }
 0x63a   : > { %v1012_v9 = vadd.f32 %v1003_v5, %v519_v25  ;;  %v1005_v13 = vpop.f32.mrb[1].mxu0 }
 0x63b   : > { %v1013_v18 = vadd.f32 %v1005_v13, %v521_v3  ;;  %v1007_v62 = vpop.f32.mrb[2].mxu0 }
 0x63c   : > { %v1014_v21 = vadd.f32 %v1007_v62, %v523_v6  ;;  %v1009_v24 = vpop.f32.mrb[3].mxu0  ;;  %v2061_v27 = vmul.f32 -1.442695, %v1012_v9 }
 0x63d   : > { %2370 = vtanh.f32 %v1013_v18  ;;  %v1015_v26 = vadd.f32 %v1009_v24, %v525_v16  ;;  %v2062_v62 = vmul.f32 -1.442695, %v1013_v18 }
 0x63e   : > { %v2063_v30 = vmul.f32 -1.442695, %v1014_v21 }
 0x63f   : > { %2372 = vtanh.f32 %v1015_v26 }
 0x640   : > { %2374 = vpow2.f32 %v2061_v27 }
 0x641   : > { %2376 = vpow2.f32 %v2063_v30 }
 0x647   : > { %v2371_v28 = vpop.eup %2370 }
 0x648   : > { %1046 = vrot.lane.b32.xlu0 %v2371_v28, %s2690_s25 }
 0x649   : > { %v2373_v29 = vpop.eup %2372 }
 0x64a   : > { %1048 = vrot.lane.b32.xlu1 %v2373_v29, %s2690_s25  ;;  %v2375_v48 = vpop.eup %2374 }
 0x64b   : > { %v1028_v54 = vadd.f32 1.0, %v2375_v48  ;;  %v2377_v31 = vpop.eup %2376 }
 0x64c   : > { %v1030_v49 = vadd.f32 1.0, %v2377_v31 }
 0x64d   : > { %2378 = vrcp.f32 %v1028_v54 }
 0x64e   : > { %2380 = vrcp.f32 %v1030_v49  ;;  %v531_v49 = vadd.f32 %v3017_v33, %v3058_v56 }
 0x657   : > { %v2379_v55 = vpop.eup %2378 }
 0x658   : > { %v2381_v60 = vpop.eup %2380  ;;  %v1042_v22 = vmul.f32 %v2379_v55, %v3087_v59  ;;  %v2064_v59 = vmul.f32 -1.442695, %v1015_v26  ;;  %v529_v26 = vadd.f32 %v3015_v32, %v3064_v2 }
 0x659   : > { %v1043_v5 = vmul.f32 %v2381_v60, %v3090_v23 }
 0x6ba   : > { %v1047_v57 = vpop.permute.xlu0 %1046 }
 0x6bb   : > { %v1052_v58 = vmul.f32 %v2379_v55, %v1047_v57  ;;  %v533_v57 = vadd.f32 %v3019_v34, %v3064_v2 }
 0x6bc   : > { %v1049_v61 = vpop.permute.xlu1 %1048 }
 0x6bd   : > { %1056 = vrot.lane.b32.xlu0 %v1052_v58, %s2690_s25  ;;  %v1053_v63 = vmul.f32 %v2381_v60, %v1049_v61  ;;  %v535_v61 = vadd.f32 %v3021_v35, %v3058_v56 }
 0x6bf   : > { %1058 = vrot.lane.b32.xlu1 %v1053_v63, %s2690_s25 }
 0x72f   : > { %v1057_v25 = vpop.permute.xlu0 %1056 }
 0x730   : > { %v3124_v3 = vadd.f32 %v1057_v25, %v1042_v22 }
 0x731   : > { %v1059_v6 = vpop.permute.xlu1 %1058 }
 0x732   : > { %2382 = vtanh.f32 %v3124_v3  ;;  %v3128_v9 = vadd.f32 %v1059_v6, %v1043_v5 }
 0x734   : > { %2384 = vtanh.f32 %v3128_v9 }
 0x735   : > { %2386 = vpow2.f32 %v2062_v62 }
 0x736   : > { %2388 = vpow2.f32 %v2064_v59 }
 0x73c   : > { %v2383_v13 = vpop.eup %2382 }
 0x73d   : > { %1068 = vrot.lane.b32.xlu0 %v2383_v13, %s2690_s25 }
 0x73e   : > { %v2385_v16 = vpop.eup %2384 }
 0x73f   : > { %1070 = vrot.lane.b32.xlu1 %v2385_v16, %s2690_s25  ;;  %v2387_v21 = vpop.eup %2386 }
 0x740   : > { %v2389_v24 = vpop.eup %2388  ;;  %v1029_v28 = vadd.f32 1.0, %v2387_v21 }
 0x741   : > { %v1031_v29 = vadd.f32 1.0, %v2389_v24 }
 0x742   : > { %2390 = vrcp.f32 %v1029_v28 }
 0x743   : > { %2392 = vrcp.f32 %v1031_v29 }
 0x74c   : > { %v2391_v27 = vpop.eup %2390 }
 0x74d   : > { %v2393_v30 = vpop.eup %2392 }
 0x7af   : > { %v1069_v23 = vpop.permute.xlu0 %1068 }
 0x7b0   : > { %v3133_v54 = vmul.f32 %v2391_v27, %v1069_v23 }
 0x7b1   : > { %v1071_v48 = vpop.permute.xlu1 %1070 }
 0x7b2   : > { %v3135_v31 = vmul.f32 %v2393_v30, %v1071_v48 }
 0x7b4   : > { %v1109_v18 = vpack.c.bf16 %v3135_v31, %v3133_v54 }
 0x7b6   : > { %2065 = vmatmul.mubr.msk.bf16.vlgmr.msra.gmra.mrb[4].mxu0 %vm675_vm2, %v1109_v18 }
 0x7b7   : > { %1258 = vmatpush1.bf16.msra.mxu0 %v2940_v8  ;;  %1289 = vmatprep.mubr.bf16.mxu0 %v2689_v4 }
 0x7b8   : > { %1259 = vmatprep.subr.bf16.mxu0 %v2944_v10 }
 0x7bb   : > { %1260 = vmatpush1.bf16.msra.mxu0 %v2950_v11 }
 0x7bc   : > { %1261 = vmatprep.subr.bf16.mxu0 %v2954_v12 }
 0x7bf   : > { %1262 = vmatpush1.bf16.msra.mxu0 %v2960_v14 }
 0x7c0   : > { %1263 = vmatprep.subr.bf16.mxu0 %v2963_v15 }
 0x7c3   : > { %1264 = vmatpush1.bf16.msra.mxu0 %v2970_v17 }
 0x7c4   : > { %1401 = vmatprep.subr.bf16.mxu0 %v2938_v7 }
 0x889   : > { %v1147_v55 = vpop.f32.mrb[4].mxu0 }
 0x88a   : > { %v1156_v58 = vadd.f32 %v1147_v55, %v529_v26  ;;  %v1149_v60 = vpop.f32.mrb[5].mxu0 }
 0x88b   : > { %v1157_v63 = vadd.f32 %v1149_v60, %v531_v49  ;;  %v1151_v22 = vpop.f32.mrb[6].mxu0 }
 0x88c   : > { %v1158_v25 = vadd.f32 %v1151_v22, %v533_v57  ;;  %v1153_v5 = vpop.f32.mrb[7].mxu0  ;;  %v2066_v13 = vmul.f32 -1.442695, %v1156_v58 }
 0x88d   : > { %2394 = vtanh.f32 %v1157_v63  ;;  %v1159_v6 = vadd.f32 %v1153_v5, %v535_v61  ;;  %v2067_v60 = vmul.f32 -1.442695, %v1157_v63 }
 0x88e   : > { %v2068_v34 = vmul.f32 -1.442695, %v1158_v25 }
 0x88f   : > { %2396 = vtanh.f32 %v1159_v6 }
 0x890   : > { %2398 = vpow2.f32 %v2066_v13 }
 0x891   : > { %2400 = vpow2.f32 %v2068_v34 }
 0x897   : > { %v2395_v32 = vpop.eup %2394 }
 0x898   : > { %1190 = vrot.lane.b32.xlu0 %v2395_v32, %s2690_s25 }
 0x899   : > { %v2397_v33 = vpop.eup %2396 }
 0x89a   : > { %1192 = vrot.lane.b32.xlu1 %v2397_v33, %s2690_s25  ;;  %v2399_v16 = vpop.eup %2398 }
 0x89b   : > { %v1172_v62 = vadd.f32 1.0, %v2399_v16  ;;  %v2401_v35 = vpop.eup %2400 }
 0x89c   : > { %v1174_v59 = vadd.f32 1.0, %v2401_v35 }
 0x89d   : > { %2402 = vrcp.f32 %v1172_v62  ;;  %v541_v62 = vadd.f32 %v3025_v37, %v3058_v56 }
 0x89e   : > { %2404 = vrcp.f32 %v1174_v59  ;;  %v543_v59 = vadd.f32 %v3027_v38, %v3064_v2 }
 0x8a7   : > { %v2403_v21 = vpop.eup %2402 }
 0x8a8   : > { %v2405_v29 = vpop.eup %2404  ;;  %v1186_v30 = vmul.f32 %v2403_v21, %v3124_v3  ;;  %v2069_v3 = vmul.f32 -1.442695, %v1159_v6  ;;  %v539_v6 = vadd.f32 %v3023_v36, %v3064_v2 }
 0x8a9   : > { %v1187_v26 = vmul.f32 %v2405_v29, %v3128_v9 }
 0x90a   : > { %v1191_v24 = vpop.permute.xlu0 %1190 }
 0x90b   : > { %v1196_v28 = vmul.f32 %v2403_v21, %v1191_v24 }
 0x90c   : > { %v1193_v23 = vpop.permute.xlu1 %1192 }
 0x90d   : > { %1200 = vrot.lane.b32.xlu0 %v1196_v28, %s2690_s25  ;;  %v1197_v27 = vmul.f32 %v2405_v29, %v1193_v23  ;;  %v545_v28 = vadd.f32 %v3029_v39, %v3058_v56 }
 0x90f   : > { %1202 = vrot.lane.b32.xlu1 %v1197_v27, %s2690_s25 }
 0x97f   : > { %v1201_v48 = vpop.permute.xlu0 %1200 }
 0x980   : > { %v3162_v18 = vadd.f32 %v1201_v48, %v1186_v30 }
 0x981   : > { %v1203_v49 = vpop.permute.xlu1 %1202 }
 0x982   : > { %2406 = vtanh.f32 %v3162_v18  ;;  %v3166_v55 = vadd.f32 %v1203_v49, %v1187_v26 }
 0x984   : > { %2408 = vtanh.f32 %v3166_v55 }
 0x985   : > { %2410 = vpow2.f32 %v2067_v60 }
 0x986   : > { %2412 = vpow2.f32 %v2069_v3 }
 0x98c   : > { %v2407_v57 = vpop.eup %2406 }
 0x98d   : > { %1212 = vrot.lane.b32.xlu0 %v2407_v57, %s2690_s25 }
 0x98e   : > { %v2409_v58 = vpop.eup %2408 }
 0x98f   : > { %1214 = vrot.lane.b32.xlu1 %v2409_v58, %s2690_s25  ;;  %v2411_v61 = vpop.eup %2410 }
 0x990   : > { %v2413_v22 = vpop.eup %2412  ;;  %v1173_v25 = vadd.f32 1.0, %v2411_v61 }
 0x991   : > { %v1175_v5 = vadd.f32 1.0, %v2413_v22 }
 0x992   : > { %2414 = vrcp.f32 %v1173_v25 }
 0x993   : > { %2416 = vrcp.f32 %v1175_v5 }
 0x99c   : > { %v2415_v32 = vpop.eup %2414 }
 0x99d   : > { %v2417_v33 = vpop.eup %2416 }
 0x9ff   : > { %v1213_v9 = vpop.permute.xlu0 %1212 }
 0xa00   : > { %v3171_v34 = vmul.f32 %v2415_v32, %v1213_v9 }
 0xa01   : > { %v1215_v13 = vpop.permute.xlu1 %1214 }
 0xa02   : > { %v3173_v16 = vmul.f32 %v2417_v33, %v1215_v13 }
 0xa04   : > { %v1253_v63 = vpack.c.bf16 %v3173_v16, %v3171_v34 }
 0xa06   : > { %2070 = vmatmul.mubr.msk.bf16.vlgmr.msra.gmra.mrb[8].mxu0 %vm675_vm2, %v1253_v63 }
 0xa07   : > { %1402 = vmatpush1.bf16.msra.mxu0 %v2940_v8  ;;  %1433 = vmatprep.mubr.bf16.mxu0 %v2689_v4 }
 0xa08   : > { %1403 = vmatprep.subr.bf16.mxu0 %v2944_v10 }
 0xa0b   : > { %1404 = vmatpush1.bf16.msra.mxu0 %v2950_v11 }
 0xa0c   : > { %1405 = vmatprep.subr.bf16.mxu0 %v2954_v12 }
 0xa0f   : > { %1406 = vmatpush1.bf16.msra.mxu0 %v2960_v14 }
 0xa10   : > { %1407 = vmatprep.subr.bf16.mxu0 %v2963_v15 }
 0xa13   : > { %1408 = vmatpush1.bf16.msra.mxu0 %v2970_v17 }
 0xa14   : > { %1545 = vmatprep.subr.bf16.mxu0 %v2938_v7 }
 0xad9   : > { %v1291_v35 = vpop.f32.mrb[8].mxu0 }
 0xada   : > { %v1300_v21 = vadd.f32 %v1291_v35, %v539_v6  ;;  %v1293_v24 = vpop.f32.mrb[9].mxu0 }
 0xadb   : > { %v1301_v29 = vadd.f32 %v1293_v24, %v541_v62  ;;  %v1295_v23 = vpop.f32.mrb[10].mxu0 }
 0xadc   : > { %v1302_v27 = vadd.f32 %v1295_v23, %v543_v59  ;;  %v1297_v30 = vpop.f32.mrb[11].mxu0  ;;  %v2071_v26 = vmul.f32 -1.442695, %v1300_v21 }
 0xadd   : > { %2418 = vtanh.f32 %v1301_v29  ;;  %v1303_v48 = vadd.f32 %v1297_v30, %v545_v28  ;;  %v2072_v59 = vmul.f32 -1.442695, %v1301_v29 }
 0xade   : > { %v2073_v38 = vmul.f32 -1.442695, %v1302_v27 }
 0xadf   : > { %2420 = vtanh.f32 %v1303_v48 }
 0xae0   : > { %2422 = vpow2.f32 %v2071_v26 }
 0xae1   : > { %2424 = vpow2.f32 %v2073_v38 }
 0xae7   : > { %v2419_v36 = vpop.eup %2418 }
 0xae8   : > { %1334 = vrot.lane.b32.xlu0 %v2419_v36, %s2690_s25 }
 0xae9   : > { %v2421_v37 = vpop.eup %2420 }
 0xaea   : > { %1336 = vrot.lane.b32.xlu1 %v2421_v37, %s2690_s25  ;;  %v2423_v49 = vpop.eup %2422 }
 0xaeb   : > { %v1316_v57 = vadd.f32 1.0, %v2423_v49  ;;  %v2425_v39 = vpop.eup %2424 }
 0xaec   : > { %v1318_v58 = vadd.f32 1.0, %v2425_v39 }
 0xaed   : > { %2426 = vrcp.f32 %v1316_v57 }
 0xaee   : > { %2428 = vrcp.f32 %v1318_v58 }
 0xaf7   : > { %v2427_v60 = vpop.eup %2426 }
 0xaf8   : > { %v2429_v22 = vpop.eup %2428  ;;  %v1330_v9 = vmul.f32 %v2427_v60, %v3162_v18  ;;  %v2074_v18 = vmul.f32 -1.442695, %v1303_v48  ;;  %v549_v48 = vadd.f32 %v3031_v40, %v3064_v2 }
 0xaf9   : > { %v1331_v13 = vmul.f32 %v2429_v22, %v3166_v55 }
 0xb5a   : > { %v1335_v3 = vpop.permute.xlu0 %1334 }
 0xb5b   : > { %v1340_v61 = vmul.f32 %v2427_v60, %v1335_v3 }
 0xb5c   : > { %v1337_v25 = vpop.permute.xlu1 %1336 }
 0xb5d   : > { %1344 = vrot.lane.b32.xlu0 %v1340_v61, %s2690_s25  ;;  %v1341_v5 = vmul.f32 %v2429_v22, %v1337_v25 }
 0xb5f   : > { %1346 = vrot.lane.b32.xlu1 %v1341_v5, %s2690_s25 }
 0xbcf   : > { %v1345_v32 = vpop.permute.xlu0 %1344 }
 0xbd0   : > { %v3200_v33 = vadd.f32 %v1345_v32, %v1330_v9 }
 0xbd1   : > { %v1347_v63 = vpop.permute.xlu1 %1346 }
 0xbd2   : > { %2430 = vtanh.f32 %v3200_v33  ;;  %v3204_v6 = vadd.f32 %v1347_v63, %v1331_v13 }
 0xbd4   : > { %2432 = vtanh.f32 %v3204_v6 }
 0xbd5   : > { %2434 = vpow2.f32 %v2072_v59 }
 0xbd6   : > { %2436 = vpow2.f32 %v2074_v18 }
 0xbdc   : > { %v2431_v62 = vpop.eup %2430 }
 0xbdd   : > { %1356 = vrot.lane.b32.xlu0 %v2431_v62, %s2690_s25 }
 0xbde   : > { %v2433_v35 = vpop.eup %2432 }
 0xbdf   : > { %1358 = vrot.lane.b32.xlu1 %v2433_v35, %s2690_s25  ;;  %v2435_v21 = vpop.eup %2434 }
 0xbe0   : > { %v2437_v24 = vpop.eup %2436  ;;  %v1317_v28 = vadd.f32 1.0, %v2435_v21 }
 0xbe1   : > { %v1319_v23 = vadd.f32 1.0, %v2437_v24 }
 0xbe2   : > { %2438 = vrcp.f32 %v1317_v28 }
 0xbe3   : > { %2440 = vrcp.f32 %v1319_v23 }
 0xbec   : > { %v2439_v27 = vpop.eup %2438 }
 0xbed   : > { %v2441_v30 = vpop.eup %2440 }
 0xc4f   : > { %v1357_v55 = vpop.permute.xlu0 %1356 }
 0xc50   : > { %v3209_v37 = vmul.f32 %v2439_v27, %v1357_v55 }
 0xc51   : > { %v1359_v36 = vpop.permute.xlu1 %1358 }
 0xc52   : > { %v3211_v26 = vmul.f32 %v2441_v30, %v1359_v36 }
 0xc54   : > { %v1397_v29 = vpack.c.bf16 %v3211_v26, %v3209_v37 }
 0xc56   : > { %2075 = vmatmul.mubr.msk.bf16.vlgmr.msra.gmra.mrb[12].mxu0 %vm675_vm2, %v1397_v29 }
 0xc57   : > { %1546 = vmatpush1.bf16.msra.mxu0 %v2940_v8  ;;  %1577 = vmatprep.mubr.bf16.mxu0 %v2689_v4  ;;  %v551_v8 = vadd.f32 %v3033_v41, %v3058_v56 }
 0xc58   : > { %1547 = vmatprep.subr.bf16.mxu0 %v2944_v10  ;;  %v553_v10 = vadd.f32 %v3035_v42, %v3064_v2 }
 0xc5b   : > { %1548 = vmatpush1.bf16.msra.mxu0 %v2950_v11 }
 0xc5c   : > { %1549 = vmatprep.subr.bf16.mxu0 %v2954_v12 }
 0xc5f   : > { %1550 = vmatpush1.bf16.msra.mxu0 %v2960_v14  ;;  %v555_v14 = vadd.f32 %v3037_v43, %v3058_v56 }
 0xc60   : > { %1551 = vmatprep.subr.bf16.mxu0 %v2963_v15 }
 0xc63   : > { %1552 = vmatpush1.bf16.msra.mxu0 %v2970_v17 }
 0xc64   : > { %1689 = vmatprep.subr.bf16.mxu0 %v2938_v7 }
 0xd29   : > { %v1435_v38 = vpop.f32.mrb[12].mxu0 }
 0xd2a   : > { %v1444_v11 = vadd.f32 %v1435_v38, %v549_v48  ;;  %v1437_v12 = vpop.f32.mrb[13].mxu0 }
 0xd2b   : > { %v1445_v15 = vadd.f32 %v1437_v12, %v551_v8  ;;  %v1439_v49 = vpop.f32.mrb[14].mxu0  ;;  %v2514_v12 = vld [vmem:[#allocation12] ss:$8 sps:$4 sm:$0xff]  }
 0xd2c   : > { %v1446_v57 = vadd.f32 %v1439_v49, %v553_v10  ;;  %v1441_v39 = vpop.f32.mrb[15].mxu0  ;;  %v2076_v58 = vmul.f32 -1.442695, %v1444_v11  ;;  %v2517_v49 = vld [vmem:[#allocation12 + $0x24] ss:$8 sps:$4 sm:$0xff]  }
 0xd2d   : > { %2442 = vtanh.f32 %v1445_v15  ;;  %v1447_v7 = vadd.f32 %v1441_v39, %v555_v14  ;;  %v2077_v23 = vmul.f32 -1.442695, %v1445_v15  ;;  %v2515_v14 = vld [vmem:[#allocation12 + $0x14] ss:$8 sps:$4 sm:$0xff]   ;;  %v2516_v15 = vld [vmem:[#allocation12 + $0x10] ss:$8 sps:$4 sm:$0xff]  }
 0xd2e   : > { %v2078_v42 = vmul.f32 -1.442695, %v1446_v57  ;;  %v2518_v57 = vld [vmem:[#allocation12 + $0x20] ss:$8 sps:$4 sm:$0xff]   ;;  %v2519_v39 = vld [vmem:[#allocation12 + $0x34] ss:$8 sps:$4 sm:$0xff]  }
 0xd2f   : > { %2444 = vtanh.f32 %v1447_v7 }
 0xd30   : > { %2446 = vpow2.f32 %v2076_v58  ;;  %v563_v58 = vadd.f32 %v3043_v46, %v3064_v2 }
 0xd31   : > { %2448 = vpow2.f32 %v2078_v42 }
 0xd37   : > { %v2443_v40 = vpop.eup %2442 }
 0xd38   : > { %1478 = vrot.lane.b32.xlu0 %v2443_v40, %s2690_s25  ;;  %v561_v40 = vadd.f32 %v3041_v45, %v3058_v56 }
 0xd39   : > { %v2445_v41 = vpop.eup %2444 }
 0xd3a   : > { %1480 = vrot.lane.b32.xlu1 %v2445_v41, %s2690_s25  ;;  %v2447_v60 = vpop.eup %2446 }
 0xd3b   : > { %v1460_v3 = vadd.f32 1.0, %v2447_v60  ;;  %v2449_v43 = vpop.eup %2448 }
 0xd3c   : > { %v1462_v61 = vadd.f32 1.0, %v2449_v43 }
 0xd3d   : > { %2450 = vrcp.f32 %v1460_v3  ;;  %v565_v3 = vadd.f32 %v3045_v47, %v3058_v56 }
 0xd3e   : > { %2452 = vrcp.f32 %v1462_v61 }
 0xd47   : > { %v2451_v22 = vpop.eup %2450 }
 0xd48   : > { %v2453_v9 = vpop.eup %2452  ;;  %v1474_v63 = vmul.f32 %v2451_v22, %v3200_v33  ;;  %v2079_v33 = vmul.f32 -1.442695, %v1447_v7  ;;  %v559_v7 = vadd.f32 %v3039_v44, %v3064_v2 }
 0xd49   : > { %v1475_v59 = vmul.f32 %v2453_v9, %v3204_v6 }
 0xdaa   : > { %v1479_v25 = vpop.permute.xlu0 %1478 }
 0xdab   : > { %v1484_v5 = vmul.f32 %v2451_v22, %v1479_v25 }
 0xdac   : > { %v1481_v32 = vpop.permute.xlu1 %1480 }
 0xdad   : > { %1488 = vrot.lane.b32.xlu0 %v1484_v5, %s2690_s25  ;;  %v1485_v13 = vmul.f32 %v2453_v9, %v1481_v32 }
 0xdaf   : > { %1490 = vrot.lane.b32.xlu1 %v1485_v13, %s2690_s25 }
 0xe1f   : > { %v1489_v62 = vpop.permute.xlu0 %1488 }
 0xe20   : > { %v3238_v35 = vadd.f32 %v1489_v62, %v1474_v63 }
 0xe21   : > { %v1491_v18 = vpop.permute.xlu1 %1490 }
 0xe22   : > { %2454 = vtanh.f32 %v3238_v35  ;;  %v3242_v21 = vadd.f32 %v1491_v18, %v1475_v59 }
 0xe24   : > { %2456 = vtanh.f32 %v3242_v21 }
 0xe25   : > { %2458 = vpow2.f32 %v2077_v23 }
 0xe26   : > { %2460 = vpow2.f32 %v2079_v33 }
 0xe2c   : > { %v2455_v24 = vpop.eup %2454 }
 0xe2d   : > { %1500 = vrot.lane.b32.xlu0 %v2455_v24, %s2690_s25 }
 0xe2e   : > { %v2457_v28 = vpop.eup %2456 }
 0xe2f   : > { %1502 = vrot.lane.b32.xlu1 %v2457_v28, %s2690_s25  ;;  %v2459_v55 = vpop.eup %2458 }
 0xe30   : > { %v2461_v27 = vpop.eup %2460  ;;  %v1461_v30 = vadd.f32 1.0, %v2459_v55 }
 0xe31   : > { %v1463_v36 = vadd.f32 1.0, %v2461_v27 }
 0xe32   : > { %2462 = vrcp.f32 %v1461_v30 }
 0xe33   : > { %2464 = vrcp.f32 %v1463_v36 }
 0xe3c   : > { %v2463_v29 = vpop.eup %2462 }
 0xe3d   : > { %v2465_v48 = vpop.eup %2464 }
 0xe9f   : > { %v1501_v6 = vpop.permute.xlu0 %1500 }
 0xea0   : > { %v3247_v38 = vmul.f32 %v2463_v29, %v1501_v6 }
 0xea1   : > { %v1503_v8 = vpop.permute.xlu1 %1502 }
 0xea2   : > { %v3249_v10 = vmul.f32 %v2465_v48, %v1503_v8 }
 0xea4   : > { %v1541_v11 = vpack.c.bf16 %v3249_v10, %v3247_v38 }
 0xea6   : > { %2080 = vmatmul.mubr.msk.bf16.vlgmr.msra.gmra.mrb[16].mxu0 %vm675_vm2, %v1541_v11 }
 0xea7   : > { %1690 = vmatpush1.bf16.msra.mxu0 %v2514_v12  ;;  %1721 = vmatprep.mubr.bf16.mxu0 %v2689_v4 }
 0xea8   : > { %1691 = vmatprep.subr.bf16.mxu0 %v2515_v14 }
 0xeab   : > { %1692 = vmatpush1.bf16.msra.mxu0 %v2516_v15 }
 0xeac   : > { %1693 = vmatprep.subr.bf16.mxu0 %v2517_v49 }
 0xeaf   : > { %1694 = vmatpush1.bf16.msra.mxu0 %v2518_v57 }
 0xeb0   : > { %1695 = vmatprep.subr.bf16.mxu0 %v2519_v39 }
 0xeb3   : > { %1696 = vmatpush1.bf16.msra.mxu0 %v2970_v17 }
 0xf79   : > { %v1579_v41 = vpop.f32.mrb[16].mxu0 }
 0xf7a   : > { %v1588_v42 = vadd.f32 %v1579_v41, %v559_v7  ;;  %v1581_v60 = vpop.f32.mrb[17].mxu0  ;;  %v569_v41 = vadd.f32 %v3047_v50, %v3064_v2 }
 0xf7b   : > { %v1589_v43 = vadd.f32 %v1581_v60, %v561_v40  ;;  %v1583_v61 = vpop.f32.mrb[18].mxu0  ;;  %v573_v60 = vadd.f32 %v3051_v52, %v3064_v2 }
 0xf7c   : > { %v1590_v22 = vadd.f32 %v1583_v61, %v563_v58  ;;  %v1585_v25 = vpop.f32.mrb[19].mxu0  ;;  %v2081_v5 = vmul.f32 -1.442695, %v1588_v42  ;;  %v571_v58 = vadd.f32 %v3049_v51, %v3058_v56  ;;  %v575_v61 = vadd.f32 %v3053_v53, %v3058_v56 }
 0xf7d   : > { %2466 = vtanh.f32 %v1589_v43  ;;  %v1591_v17 = vadd.f32 %v1585_v25, %v565_v3  ;;  %v2082_v48 = vmul.f32 -1.442695, %v1589_v43 }
 0xf7e   : > { %v2083_v46 = vmul.f32 -1.442695, %v1590_v22 }
 0xf7f   : > { %2468 = vtanh.f32 %v1591_v17 }
 0xf80   : > { %2470 = vpow2.f32 %v2081_v5 }
 0xf81   : > { %2472 = vpow2.f32 %v2083_v46 }
 0xf87   : > { %v2467_v44 = vpop.eup %2466 }
 0xf88   : > { %1622 = vrot.lane.b32.xlu0 %v2467_v44, %s2690_s25 }
 0xf89   : > { %v2469_v45 = vpop.eup %2468 }
 0xf8a   : > { %1624 = vrot.lane.b32.xlu1 %v2469_v45, %s2690_s25  ;;  %v2471_v9 = vpop.eup %2470 }
 0xf8b   : > { %v1604_v32 = vadd.f32 1.0, %v2471_v9  ;;  %v2473_v47 = vpop.eup %2472  ;;  %v3302_v9 = vld [vmem:[%s2915_s16] sm:$0xff] }
 0xf8c   : > { %v1606_v13 = vadd.f32 1.0, %v2473_v47 }
 0xf8d   : > { %2474 = vrcp.f32 %v1604_v32  ;;  %v794_v32 = vstv %s2910_s10 }
 0xf8e   : > { %2476 = vrcp.f32 %v1606_v13  ;;  %vm795_vm3 = vcmp.lt.s32.totalorder %v794_v32, %v3302_v9 }
 0xf97   : > { %v2475_v63 = vpop.eup %2474 }
 0xf98   : > { %v2477_v18 = vpop.eup %2476  ;;  %v1618_v23 = vmul.f32 %v2475_v63, %v3238_v35  ;;  %v2084_v35 = vmul.f32 -1.442695, %v1591_v17 }
 0xf99   : > { %v1619_v27 = vmul.f32 %v2477_v18, %v3242_v21 }
 0xffa   : > { %v1623_v62 = vpop.permute.xlu0 %1622 }
 0xffb   : > { %v1628_v59 = vmul.f32 %v2475_v63, %v1623_v62  ;;  %v932_v62 = vstv %s813_s17  ;;  %s1238_s17 = scalar_select %p3390_p0, 1, 0 }
 0xffc   : > { %v1625_v24 = vpop.permute.xlu1 %1624  ;;  %vm933_vm7 = vcmp.lt.s32.totalorder %v932_v62, %v3302_v9 }
 0xffd   : > { %1632 = vrot.lane.b32.xlu0 %v1628_v59, %s2690_s25  ;;  %v1629_v28 = vmul.f32 %v2477_v18, %v1625_v24  ;;  %v610_v59 = vld [vmem:[%s2915_s16 + $0x8] sm:$0xff]  ;;  %v797_v18 = vsel %vm795_vm3, 1, %v2689_v4  ;;  %s1245_s16 = sadd.s32 4, %s2910_s10 }
 0xffe   : > { %vm934_vm4 = vcmp.lt.s32.totalorder %v932_v62, %v610_v59  ;;  %vm796_vm5 = vcmp.lt.s32.totalorder %v794_v32, %v610_v59  ;;  %p3397_p1 = scmp.lt.s32.totalorder %s1245_s16, %s2905_s9  ;;  %v951_v62 = vstv %s950_s19 }
 0xfff   : > { %1634 = vrot.lane.b32.xlu1 %v1629_v28, %s2690_s25  ;;  %s1814_s10 = scalar_select %p3428_p10, 1, 0 }
0x106f   : > { %v1633_v33 = vpop.permute.xlu0 %1632 }
0x1070   : > { %v3269_v55 = vadd.f32 %v1633_v33, %v1618_v23  ;;  %v1076_v33 = vstv %s957_s22  ;;  %s1382_s22 = scalar_select %p3397_p1, 1, 0 }
0x1071   : > { %v1635_v30 = vpop.permute.xlu1 %1634  ;;  %vm1078_vm6 = vcmp.lt.s32.totalorder %v1076_v33, %v610_v59  ;;  %vm1077_vm9 = vcmp.lt.s32.totalorder %v1076_v33, %v3302_v9 }
0x1072   : > { %2478 = vtanh.f32 %v3269_v55  ;;  %v3273_v36 = vadd.f32 %v1635_v30, %v1619_v27  ;;  %v936_v27 = vsel %vm934_vm4, 1, %v2689_v4  ;;  %v798_v30 = vsel %vm796_vm5, 1, %v2689_v4 }
0x1074   : > { %2480 = vtanh.f32 %v3273_v36 }
0x1075   : > { %2482 = vpow2.f32 %v2082_v48  ;;  %v935_v48 = vsel %vm933_vm7, 1, %v2689_v4 }
0x1076   : > { %2484 = vpow2.f32 %v2084_v35  ;;  %v1364_v35 = vstv %s1245_s16  ;;  %s1526_s16 = scalar_select %p3406_p2, 1, 0 }
0x1077   : > { %vm1366_vm10 = vcmp.lt.s32.totalorder %v1364_v35, %v610_v59  ;;  %vm1365_vm13 = vcmp.lt.s32.totalorder %v1364_v35, %v3302_v9  ;;  %v624_v35 = vld [vmem:[#allocation5 + $0x8] sm:$0xff] }
0x1078   : > { %v3442_v33 = vstv %s1526_s16 }
0x107c   : > { %v2479_v6 = vpop.eup %2478 }
0x107d   : > { %1644 = vrot.lane.b32.xlu0 %v2479_v6, %s2690_s25  ;;  %v1220_v6 = vstv %s1101_s13 }
0x107e   : > { %v2481_v29 = vpop.eup %2480  ;;  %vm1222_vm8 = vcmp.lt.s32.totalorder %v1220_v6, %v610_v59  ;;  %vm1221_vm11 = vcmp.lt.s32.totalorder %v1220_v6, %v3302_v9 }
0x107f   : > { %1646 = vrot.lane.b32.xlu1 %v2481_v29, %s2690_s25  ;;  %v2483_v8 = vpop.eup %2482  ;;  %v1080_v29 = vsel %vm1078_vm6, 1, %v2689_v4 }
0x1080   : > { %v2485_v11 = vpop.eup %2484  ;;  %v1605_v12 = vadd.f32 1.0, %v2483_v8  ;;  %v1224_v8 = vsel %vm1222_vm8, 1, %v2689_v4  ;;  %vm952_vm8 = vcmp.eq.s32.totalorder %v951_v62, 1 }
0x1081   : > { %v1607_v14 = vadd.f32 1.0, %v2485_v11  ;;  %v1079_v11 = vsel %vm1077_vm9, 1, %v2689_v4 }
0x1082   : > { %2486 = vrcp.f32 %v1605_v12  ;;  %v1508_v12 = vstv %s1389_s12 }
0x1083   : > { %2488 = vrcp.f32 %v1607_v14  ;;  %v1368_v14 = vsel %vm1366_vm10, 1, %v2689_v4  ;;  %vm1510_vm12 = vcmp.lt.s32.totalorder %v1508_v12, %v610_v59  ;;  %vm1509_vm15 = vcmp.lt.s32.totalorder %v1508_v12, %v3302_v9 }
0x108c   : > { %v2487_v15 = vpop.eup %2486 }
0x108d   : > { %v2489_v49 = vpop.eup %2488 }
0x10ef   : > { %v1645_v21 = vpop.permute.xlu0 %1644 }
0x10f0   : > { %v3278_v39 = vmul.f32 %v2487_v15, %v1645_v21  ;;  %v1223_v21 = vsel %vm1221_vm11, 1, %v2689_v4  ;;  %v1652_v15 = vstv %s1533_s26  ;;  %s1670_s26 = scalar_select %p3419_p8, 1, 0 }
0x10f1   : > { %v1647_v57 = vpop.permute.xlu1 %1646  ;;  %vm1654_vm14 = vcmp.lt.s32.totalorder %v1652_v15, %v610_v59  ;;  %vm1653_vm1 = vcmp.lt.s32.totalorder %v1652_v15, %v3302_v9 }
0x10f2   : > { %v3280_v7 = vmul.f32 %v2489_v49, %v1647_v57  ;;  %v1512_v49 = vsel %vm1510_vm12, 1, %v2689_v4  ;;  %v1367_v57 = vsel %vm1365_vm13, 1, %v2689_v4 }
0x10f4   : > { %v1685_v40 = vpack.c.bf16 %v3280_v7, %v3278_v39 }
0x10f6   : > { %2085 = vmatmul.mubr.msk.bf16.vlgmr.msra.gmra.mrb[20].mxu0 %vm675_vm2, %v1685_v40  ;;  %v1796_v40 = vstv %s1677_s4 }
0x10f7   : > { %vm1798_vm0 = vcmp.lt.s32.totalorder %v1796_v40, %v610_v59  ;;  %vm1797_vm3 = vcmp.lt.s32.totalorder %v1796_v40, %v3302_v9  ;;  %v3432_v59 = vstv %s1094_s20 }
0x10f8   : > { %vm1096_vm9 = vcmp.eq.s32.totalorder %v3432_v59, 1 }
0x11c9   : > { %v1723_v42 = vpop.f32.mrb[20].mxu0 }
0x11ca   : > { %v1732_v3 = vadd.f32 %v1723_v42, %v569_v41  ;;  %v1725_v43 = vpop.f32.mrb[21].mxu0  ;;  %v1656_v41 = vsel %vm1654_vm14, 1, %v2689_v4  ;;  %v1800_v42 = vsel %vm1798_vm0, 1, %v2689_v4  ;;  %vm1528_vm14 = vcmp.eq.s32.totalorder %v3442_v33, 1 }
0x11cb   : > { %v3293_v22 = vadd.f32 %v1725_v43, %v571_v58  ;;  %v1727_v25 = vpop.f32.mrb[22].mxu0  ;;  %v1511_v58 = vsel %vm1509_vm15, 1, %v2689_v4 }
0x11cc   : > { %v1734_v17 = vadd.f32 %v1727_v25, %v573_v60  ;;  %v1729_v44 = vpop.f32.mrb[23].mxu0  ;;  %v2086_v53 = vmul.f32 -1.442695, %v1732_v3  ;;  %v1655_v60 = vsel %vm1653_vm1, 1, %v2689_v4  ;;  %v1799_v3 = vsel %vm1797_vm3, 1, %v2689_v4 }
0x11cd   : > { %2490 = vtanh.f32 %v3293_v22  ;;  %v3296_v50 = vadd.f32 %v1729_v44, %v575_v61 }
0x11ce   : > { %v2088_v56 = vmul.f32 -1.442695, %v1734_v17 }
0x11cf   : > { %2492 = vtanh.f32 %v3296_v50 }
0x11d0   : > { %2494 = vpow2.f32 %v2086_v53 }
0x11d1   : > { %2496 = vpow2.f32 %v2088_v56  ;;  %v2087_v56 = vmul.f32 -1.442695, %v3293_v22 }
0x11d7   : > { %v2491_v51 = vpop.eup %2490 }
0x11d8   : > { %1766 = vrot.lane.b32.xlu0 %v2491_v51, %s2690_s25 }
0x11d9   : > { %v2493_v52 = vpop.eup %2492 }
0x11da   : > { %1768 = vrot.lane.b32.xlu1 %v2493_v52, %s2690_s25  ;;  %v2495_v2 = vpop.eup %2494 }
0x11db   : > { %v1748_v45 = vadd.f32 1.0, %v2495_v2  ;;  %v2497_v5 = vpop.eup %2496  ;;  %v2089_v2 = vmul.f32 -1.442695, %v3296_v50 }
0x11dc   : > { %v1750_v46 = vadd.f32 1.0, %v2497_v5 }
0x11dd   : > { %2498 = vrcp.f32 %v1748_v45 }
0x11de   : > { %2500 = vrcp.f32 %v1750_v46 }
0x11e7   : > { %v3306_v47 = vpop.eup %2498 }
0x11e8   : > { %v3316_v24 = vpop.eup %2500  ;;  %v1762_v43 = vmul.f32 %v3306_v47, %v3269_v55 }
0x11e9   : > { %v1763_v17 = vmul.f32 %v3316_v24, %v3273_v36 }
0x124a   : > { %v1767_v13 = vpop.permute.xlu0 %1766 }
0x124b   : > { %v1772_v63 = vmul.f32 %v3306_v47, %v1767_v13 }
0x124c   : > { %v1769_v28 = vpop.permute.xlu1 %1768 }
0x124d   : > { %1776 = vrot.lane.b32.xlu0 %v1772_v63, %s2690_s25  ;;  %v1773_v23 = vmul.f32 %v3316_v24, %v1769_v28  ;;  %v3438_v24 = vstv %s1238_s17 }
0x124e   : > { %vm1240_vm11 = vcmp.eq.s32.totalorder %v3438_v24, 1 }
0x124f   : > { %1778 = vrot.lane.b32.xlu1 %v1773_v23, %s2690_s25  ;;  %v3440_v23 = vstv %s1382_s22 }
0x1250   : > { %vm1384_vm13 = vcmp.eq.s32.totalorder %v3440_v23, 1 }
0x1251   : > { %800 = vperm.xlu0 %2294, %v797_v18  }
0x1253   : > { %803 = vperm.xlu1 %2295, %v798_v30  }
0x1255   : > { %941 = vperm.xlu0 %2294, %v936_v27   ;;  %v623_v27 = vld [vmem:[#allocation5] sm:$0xff] }
0x1257   : > { %938 = vperm.xlu1 %2295, %v935_v48   ;;  %v3450_v48 = vstv %s1670_s26 }
0x1258   : > { %vm1672_vm1 = vcmp.eq.s32.totalorder %v3450_v48, 1 }
0x1259   : > { %1085 = vperm.xlu0 %2294, %v1080_v29   ;;  %v625_v29 = vld [vmem:[#allocation6] sm:$0xff] }
0x125b   : > { %1082 = vperm.xlu1 %2295, %v1079_v11  }
0x125d   : > { %1229 = vperm.xlu0 %2294, %v1224_v8  }
0x125f   : > { %1226 = vperm.xlu1 %2295, %v1223_v21   ;;  %v3459_v21 = vstv %s1814_s10 }
0x1261   : > { %1373 = vperm.xlu0 %2294, %v1368_v14  }
0x1263   : > { %1370 = vperm.xlu1 %2295, %v1367_v57  }
0x1265   : > { %1517 = vperm.xlu0 %2294, %v1512_v49  }
0x1267   : > { %1514 = vperm.xlu1 %2295, %v1511_v58  }
0x1269   : > { %1661 = vperm.xlu0 %2294, %v1656_v41  }
0x126b   : > { %1658 = vperm.xlu1 %2295, %v1655_v60  }
0x126d   : > { %1805 = vperm.xlu0 %2294, %v1800_v42  }
0x126f   : > { %1802 = vperm.xlu1 %2295, %v1799_v3  }
0x12bf   : > { %v1777_v61 = vpop.permute.xlu0 %1776 }
0x12c0   : > { %v1782_v25 = vadd.f32 %v1777_v61, %v1762_v43 }
0x12c1   : > { %v1779_v44 = vpop.permute.xlu1 %1778 }
0x12c2   : > { %2502 = vtanh.f32 %v1782_v25  ;;  %v1783_v51 = vadd.f32 %v1779_v44, %v1763_v17 }
0x12c4   : > { %2504 = vtanh.f32 %v1783_v51 }
0x12c5   : > { %2506 = vpow2.f32 %v2087_v56 }
0x12c6   : > { %2508 = vpow2.f32 %v2089_v2 }
0x12cc   : > { %v2503_v52 = vpop.eup %2502 }
0x12cd   : > { %1788 = vrot.lane.b32.xlu1 %v2503_v52, %s2690_s25 }
0x12ce   : > { %v2505_v4 = vpop.eup %2504 }
0x12cf   : > { %1790 = vrot.lane.b32.xlu0 %v2505_v4, %s2690_s25  ;;  %v2507_v46 = vpop.eup %2506 }
0x12d0   : > { %v801_v36 = vpop.permute.xlu0 %800  ;;  %v2509_v9 = vpop.eup %2508  ;;  %v1749_v47 = vadd.f32 1.0, %v2507_v46 }
0x12d1   : > { %1825 = vrot.lane.b32.xlu1 %v1782_v25, %s2690_s25  ;;  %v1751_v63 = vadd.f32 1.0, %v2509_v9  ;;  %vm805_vm4 = vcmp.eq.s32.totalorder %v801_v36, 1 }
0x12d2   : > { %v804_v55 = vpop.permute.xlu1 %803  ;;  %2510 = vrcp.f32 %v1749_v47  ;;  %v807_v30 = vsel %vm805_vm4, %v3072_v19, 0.0 }
0x12d3   : > { %1827 = vrot.lane.b32.xlu0 %v1783_v51, %s2690_s25  ;;  %2512 = vrcp.f32 %v1751_v63  ;;  %vm806_vm6 = vcmp.eq.s32.totalorder %v804_v55, 1  ;;  %v809_v19 = vadd.f32 %v807_v30, %v623_v27  ;;  %v811_v15 = vmax.f32 %v625_v29, %v807_v30 }
0x12d4   : > { %v942_v45 = vpop.permute.xlu0 %941  ;;  %v808_v8 = vsel %vm806_vm6, %v3074_v20, 0.0 }
0x12d5   : > { %vm944_vm10 = vcmp.eq.s32.totalorder %v942_v45, 1  ;;  %v810_v57 = vadd.f32 %v808_v8, %v624_v35 }
0x12d6   : > { %v939_v53 = vpop.permute.xlu1 %938  ;;  %v946_v49 = vsel %vm944_vm10, %v3097_v1, 0.0 }
0x12d7   : > { %vm943_vm5 = vcmp.eq.s32.totalorder %v939_v53, 1  ;;  %v954_v25 = vsel %vm952_vm8, %v946_v49, -inf  ;;  %v948_v51 = vadd.f32 %v946_v49, %v810_v57 }
0x12d8   : > { %v3383_v22 = vpop.permute.xlu0 %1085  ;;  %v945_v6 = vsel %vm943_vm5, %v3095_v0, 0.0  ;;  %v626_v0 = vld [vmem:[#allocation6 + $0x8] sm:$0xff]  ;;  %vm1816_vm5 = vcmp.eq.s32.totalorder %v3459_v21, 1 }
0x12d9   : > { %v953_v12 = vsel %vm952_vm8, %v945_v6, -inf  ;;  %vm1088_vm0 = vcmp.eq.s32.totalorder %v3383_v22, 1  ;;  %v947_v40 = vadd.f32 %v945_v6, %v809_v19  ;;  %v812_v42 = vmax.f32 %v626_v0, %v808_v8 }
0x12da   : > { %v1083_v5 = vpop.permute.xlu1 %1082  ;;  %v955_v60 = vmax.f32 %v811_v15, %v953_v12 }
0x12db   : > { %vm1087_vm7 = vcmp.eq.s32.totalorder %v1083_v5, 1  ;;  %v956_v2 = vmax.f32 %v812_v42, %v954_v25 }
0x12dc   : > { %v3412_v32 = vpop.permute.xlu0 %1229  ;;  %v1089_v11 = vsel %vm1087_vm7, %v3133_v54, 0.0  ;;  %v2511_v58 = vpop.eup %2510 }
0x12dd   : > { %v1097_v41 = vsel %vm1096_vm9, %v1089_v11, -inf  ;;  %vm1232_vm4 = vcmp.eq.s32.totalorder %v3412_v32, 1  ;;  %v1091_v3 = vadd.f32 %v1089_v11, %v947_v40  ;;  %v2513_v61 = vpop.eup %2512 }
0x12de   : > { %v1227_v50 = vpop.permute.xlu1 %1226  ;;  %v1099_v17 = vmax.f32 %v955_v60, %v1097_v41 }
0x12df   : > { %vm1231_vm12 = vcmp.eq.s32.totalorder %v1227_v50, 1 }
0x12e0   : > { %v3434_v18 = vpop.permute.xlu0 %1373  ;;  %v1233_v20 = vsel %vm1231_vm12, %v3171_v34, 0.0  ;;  %v1090_v34 = vsel %vm1088_vm0, %v3135_v31, 0.0 }
0x12e1   : > { %v1241_v43 = vsel %vm1240_vm11, %v1233_v20, -inf  ;;  %vm1376_vm7 = vcmp.eq.s32.totalorder %v3434_v18, 1  ;;  %v1235_v52 = vadd.f32 %v1233_v20, %v1091_v3  ;;  %v1098_v36 = vsel %vm1096_vm9, %v1090_v34, -inf }
0x12e2   : > { %v1371_v13 = vpop.permute.xlu1 %1370  ;;  %v1243_v53 = vmax.f32 %v1099_v17, %v1241_v43  ;;  %v1378_v45 = vsel %vm1376_vm7, %v3211_v26, 0.0  ;;  %v1092_v5 = vadd.f32 %v1090_v34, %v948_v51  ;;  %v1100_v46 = vmax.f32 %v956_v2, %v1098_v36 }
0x12e3   : > { %vm1375_vm15 = vcmp.eq.s32.totalorder %v1371_v13, 1  ;;  %v1386_v26 = vsel %vm1384_vm13, %v1378_v45, -inf }
0x12e4   : > { %v1518_v14 = vpop.permute.xlu0 %1517  ;;  %v1377_v1 = vsel %vm1375_vm15, %v3209_v37, 0.0  ;;  %v1234_v37 = vsel %vm1232_vm4, %v3173_v16, 0.0 }
0x12e5   : > { %v1385_v31 = vsel %vm1384_vm13, %v1377_v1, -inf  ;;  %vm1520_vm10 = vcmp.eq.s32.totalorder %v1518_v14, 1  ;;  %v1242_v22 = vsel %vm1240_vm11, %v1234_v37, -inf  ;;  %v1236_v13 = vadd.f32 %v1234_v37, %v1092_v5 }
0x12e6   : > { %v1515_v28 = vpop.permute.xlu1 %1514  ;;  %v1387_v50 = vmax.f32 %v1243_v53, %v1385_v31  ;;  %v1522_v9 = vsel %vm1520_vm10, %v3249_v10, 0.0  ;;  %v1244_v18 = vmax.f32 %v1100_v46, %v1242_v22 }
0x12e7   : > { %vm1519_vm3 = vcmp.eq.s32.totalorder %v1515_v28, 1  ;;  %v1380_v27 = vadd.f32 %v1378_v45, %v1236_v13  ;;  %v1530_v10 = vsel %vm1528_vm14, %v1522_v9, -inf }
0x12e8   : > { %v1521_v44 = vsel %vm1519_vm3, %v3247_v38, 0.0  ;;  %v1662_v4 = vpop.permute.xlu0 %1661  ;;  %v1379_v38 = vadd.f32 %v1377_v1, %v1235_v52  ;;  %v1388_v29 = vmax.f32 %v1244_v18, %v1386_v26 }
0x12e9   : > { %v1529_v16 = vsel %vm1528_vm14, %v1521_v44, -inf  ;;  %vm1664_vm8 = vcmp.eq.s32.totalorder %v1662_v4, 1  ;;  %v1524_v11 = vadd.f32 %v1522_v9, %v1380_v27 }
0x12ea   : > { %v1659_v54 = vpop.permute.xlu1 %1658  ;;  %v1523_v32 = vadd.f32 %v1521_v44, %v1379_v38  ;;  %v1531_v63 = vmax.f32 %v1387_v50, %v1529_v16  ;;  %v1666_v24 = vsel %vm1664_vm8, %v3280_v7, 0.0  ;;  %v1532_v33 = vmax.f32 %v1388_v29, %v1530_v10 }
0x12eb   : > { %vm1663_vm6 = vcmp.eq.s32.totalorder %v1659_v54, 1  ;;  %v1674_v7 = vsel %vm1672_vm1, %v1666_v24, -inf  ;;  %v1668_v14 = vadd.f32 %v1666_v24, %v1524_v11 }
0x12ec   : > { %v1665_v56 = vsel %vm1663_vm6, %v3278_v39, 0.0  ;;  %v1806_v62 = vpop.permute.xlu0 %1805  ;;  %v1676_v15 = vmax.f32 %v1532_v33, %v1674_v7 }
0x12ed   : > { %v1673_v39 = vsel %vm1672_vm1, %v1665_v56, -inf  ;;  %v1667_v28 = vadd.f32 %v1665_v56, %v1523_v32  ;;  %vm1808_vm11 = vcmp.eq.s32.totalorder %v1806_v62, 1 }
0x12ee   : > { %v1803_v55 = vpop.permute.xlu1 %1802  ;;  %v1675_v30 = vmax.f32 %v1531_v63, %v1673_v39 }
0x12ef   : > { %vm1807_vm9 = vcmp.eq.s32.totalorder %v1803_v55, 1 }
0x133f   : > { %v1789_v47 = vpop.permute.xlu1 %1788 }
0x1340   : > { %v1794_v59 = vmul.f32 %v2511_v58, %v1789_v47 }
0x1341   : > { %v1791_v0 = vpop.permute.xlu0 %1790 }
0x1342   : > { %v1809_v6 = vsel %vm1807_vm9, %v1794_v59, 0.0  ;;  %1821 = vst.msk [vmem:[#allocation3] sm:$0xff] %vm675_vm2, %v1794_v59  ;;  %v1795_v12 = vmul.f32 %v2513_v61, %v1791_v0 }
0x1343   : > { %v1811_v35 = vadd.f32 %v1809_v6, %v1667_v28  ;;  %v1817_v23 = vsel %vm1816_vm5, %v1809_v6, -inf  ;;  %v1826_v8 = vpop.permute.xlu1 %1825 }
0x1344   : > { %v1819_v19 = vmax.f32 %v1675_v30, %v1817_v23  ;;  %1831 = vst.msk [vmem:[#allocation4] sm:$0xff] %vm675_vm2, %v1826_v8  ;;  %v1810_v49 = vsel %vm1808_vm11, %v1795_v12, 0.0  ;;  %1822 = vst.msk [vmem:[#allocation3 + $0x8] sm:$0xff] %vm675_vm2, %v1795_v12 }
0x1345   : > { %1833 = vst.msk [vmem:[#allocation5] sm:$0xff] %vm675_vm2, %v1811_v35  ;;  %v1812_v20 = vadd.f32 %v1810_v49, %v1668_v14  ;;  %v1818_v48 = vsel %vm1816_vm5, %v1810_v49, -inf  ;;  %v1828_v54 = vpop.permute.xlu0 %1827 }
0x1346   : > { %1835 = vst.msk [vmem:[#allocation6] sm:$0xff] %vm675_vm2, %v1819_v19  ;;  %v1820_v57 = vmax.f32 %v1676_v15, %v1818_v48  ;;  %1832 = vst.msk [vmem:[#allocation4 + $0x8] sm:$0xff] %vm675_vm2, %v1828_v54 }
0x1347   : > { %1834 = vst.msk [vmem:[#allocation5 + $0x8] sm:$0xff] %vm675_vm2, %v1812_v20 }
0x1348   : > { %1836 = vst.msk [vmem:[#allocation6 + $0x8] sm:$0xff] %vm675_vm2, %v1820_v57 }
0x1349 PF: > { %p2090_p3 = scmp.ne.s32.totalorder %s2660_s29, 1 }
0x134a   : > { %p1841_p6 = scmp.gt.s32.totalorder (!%p2090_p3), %s2905_s9, 1  ;;  %s2691_s4 = smov (!%p2090_p3), 64   ;;  %vm1866_vm2 = vcmask (!%p2090_p3), 523264  }
0x134b   : > { %1840 = sbr.rel (%p2090_p3) target bundleno = 5065 (0x13c9), region = 60 }
0x134c   : > { %v1853_v1 = vld [vmem:[#allocation5] sm:$0xff] (!%p2090_p3) }
0x134d   : > { %v1847_v40 = vld [vmem:[#allocation6] sm:$0xff] (!%p2090_p3) }
0x134e   : > { %vm1849_vm12 = vcmp.gt.f32.partialorder (!%p2090_p3), %v1847_v40, -inf  ;;  %v1854_v43 = vld [vmem:[#allocation5 + $0x8] sm:$0xff] (!%p2090_p3) }
0x134f   : > { %v1848_v41 = vld [vmem:[#allocation6 + $0x8] sm:$0xff] (!%p2090_p3)  ;;  %v1851_v21 = vsel (!%p2090_p3), %vm1849_vm12, %v1847_v40, 0.0 }
0x1350   : > { %vm1850_vm13 = vcmp.gt.f32.partialorder (!%p2090_p3), %v1848_v41, -inf  ;;  %1860 = vrot.lane.b32.xlu0 (!%p2090_p3), %v1851_v21, %s2691_s4 }
0x1351   : > { %v1852_v58 = vsel (!%p2090_p3), %vm1850_vm13, %v1848_v41, 0.0 }
0x1352   : > { %s3660_s9 = smov (!%p1841_p6, %s2905_s9), 1 }
0x1353   : > { %s1843_s7 = scvt.s32.f32 %s3660_s9 }
0x1354   : > { %1862 = vrot.lane.b32.xlu0 %v1852_v58, %s2691_s4 }
0x1355   : > { %v1844_v42 = vstv %s1843_s7 }
0x1356   : > { %2520 = vrcp.f32 %v1844_v42 }
0x1360   : > { %v2521_v60 = vpop.eup %2520 }
0x1361   : > { %2162 = vpush %v2521_v60 }
0x1392   : > { %s2163_s29 = spop %2162 }
0x1393   : > { %v1855_v34 = vstv %s2163_s29 }
0x1394   : > { %v1856_v3 = vmul.f32 %v1855_v34, %v1853_v1  ;;  %v1857_v25 = vmul.f32 %v1855_v34, %v1854_v43 }
0x13c2   : > { %v1861_v61 = vpop.permute.xlu0 %1860 }
0x13c3   : > { %v1867_v17 = vsel %vm1866_vm2, %v1856_v3, %v1861_v61 }
0x13c4   : > { %1869 = vst [vmem:[%s2917_s14] sm:$0xff] %v1867_v17 }
0x13c6   : > { %v1863_v44 = vpop.permute.xlu0 %1862 }
0x13c7   : > { %v1868_v51 = vsel %vm1866_vm2, %v1857_v25, %v1863_v44 }
0x13c8   : > { %1870 = vst [vmem:[%s2917_s14 + $0x8] sm:$0xff] %v1868_v51 }
0x13c9 PF: > { %s2097_s9 = sshll.u32 %s2664_s0, 8  ;;  %s1885_s25 = sshll.u32 %s2917_s14, 4  ;;  %s3524_s25 = int_to_ptr.vmem [resolvable:$true] %s1885_s25 }
0x13ca   : > { %s3521_s15 = scalar_lea.hbm %s3595_s6, %s2097_s9  ;;  %s3528_s20 = scalar_lea.sflag [#allocation11], %s315_s30 }
0x13cb   : > { %s2550_s18 = scalar_lea.vmem %s3524_s25, 256  ;;  %p3636_p12 = scmp.ne.s32.totalorder %s3617_s21, 0 }
0x13cc   : > { %p2551_p7 = scmp.ne.s32.totalorder %s3524_s25, %s2550_s18  ;;  %s2692_s0 = smov [#allocation14]  }
0x13cd   : > { %s2554_s17 = sshll.u32 %s2692_s0, 4  ;;  %s2555_s17 = int_to_ptr.vmem [resolvable:$false] %s2554_s17 }
0x13ce   : > { %p2552_p4 = pnand %p2551_p7, %p3636_p12  ;;  %s2556_s22 = scalar_lea.vmem %s2555_s17, 512 }
0x13cf   : > { %p2557_p9 = scmp.lt.s32.totalorder %s3524_s25, %s2555_s17  ;;  %p2558_p11 = scmp.lt.s32.totalorder %s2556_s22, %s2550_s18 }
0x13d0   : > { %p2553_p5 = pneg %p2552_p4 }
0x13d1   : > { %p2559_p13 = por %p2558_p11, %p2557_p9 }
0x13d3   : > { %p2560_p0 = pnand %p2559_p13, %p2553_p5 }
0x13d5   : > { %2563 = shalt.err (!%p2560_p0)
}
0x13d6   : > { %s2564_s30 = scalar_lea.hbm %s3521_s15, 256  ;;  %s2568_s16 = scalar_lea.hbm %s3595_s6, 512 }
0x13d7   : > { %p2565_p1 = scmp.ne.s32.totalorder %s3521_s15, %s2564_s30  ;;  %p2569_p10 = scmp.lt.u32.totalorder %s3521_s15, %s3595_s6 }
0x13d8   : > { %p2570_p3 = scmp.lt.u32.totalorder %s2568_s16, %s2564_s30  ;;  %p2572_p7 = scmp.lt.u32.totalorder %s2564_s30, %s3521_s15 }
0x13d9   : > { %p2566_p2 = pnand %p2565_p1, %p3636_p12 }
0x13da   : > { %p2571_p6 = por %p2570_p3, %p2569_p10 }
0x13db   : > { %p2567_p8 = pneg %p2566_p2 }
0x13dc   : > { %p2573_p4 = por %p2572_p7, %p2571_p6 }
0x13de   : > { %p2574_p5 = pnand %p2573_p4, %p2567_p8 }
0x13e0   : > { %2577 = shalt.err (!%p2574_p5)
}
0x13e1   : > { %s2693_s10 = smov 128   ;;  %s2694_s4 = smov 8  }
0x13e2   : > { %2177 = dma.vmem_to_hbm [thread:$0]  (%p3636_p12), %s3524_s25, 256, %s3521_s15, %s3528_s20, %s2693_s10, %s2693_s10, %s2694_s4  }
0x13e3 PF: > { %s3637_s7 = sld [smem:[#allocation28_spill]]  ;;  %p2189_p9 = scmp.ge.s32.totalorder %s2676_s8, 2 }
0x13e4   : > { %s1900_s29 = sand.u32 1, %s2636_s23  }
0x13e5   : > { %s1901_s9 = scalar_lea.sflag [#allocation11], %s1900_s29 }
0x13e9   : > { %p3638_p11 = scmp.ne.s32.totalorder %s3637_s7, 0 }
0x13eb   : > { %p2184_p13 = pnand %p2189_p9, %p3638_p11 }
0x13ed   : > { %2631 = dma.done.wait (!%p2184_p13), %s1901_s9, 256  }
0x13ee   : > { %2633 = vsyncadd (!%p2184_p13), %s1901_s9, 4294967040  ;;  %s24_s8 = sadd.s32 1, %s2676_s8   ;;  %s3639_s11 = sld [smem:[#allocation21_spill]] }
0x13ef   : > { %p21_p0 = scmp.ge.s32.totalorder %s24_s8, 6   ;;  %s3640_s25 = sld [smem:[#allocation26_spill]] }
0x13f0   : > { %s3641_s21 = sld [smem:[#allocation27_spill]]  ;;  %s3642_s29 = sld [smem:[#allocation22_spill]] }
0x13f1   : > { %s3643_s0 = sld [smem:[#allocation23_spill]]  ;;  %s3644_s30 = sld [smem:[#allocation24_spill]] }
0x13f2   : > { %s3645_s7 = sld [smem:[#allocation25_spill]]  ;;  %s3646_s23 = smov %s2640_s24 }
0x13f3   : > { %s3648_s26 = smov %s2652_s27  ;;  %s3649_s27 = smov %s2656_s28 }
0x13f4   : > { %s3647_s24 = smov %s3639_s11  ;;  %23 = sbr.rel (!%p21_p0) target bundleno = 13 (0xd), region = 117 }
0x13f6   : > { %s3650_s28 = smov %s3641_s21 }
0x13fb   :  { %1906 = vsyncpa [#allocation10], 1 }
0x13fc   :  { %1908 = vsyncpa [#allocation10 + $0x1], 1 }
0x13fd   :  { %1909 = vsyncpa [#allocation13], 1 }
0x13fe   :  { %1910 = vsyncpa [#allocation11], 1 }
0x13ff   :  { %1912 = vsyncpa [#allocation11 + $0x1], 1 }

</bundles_post_ra>
